<compile_context>
chip_gen: v5e
topology: v5e:2x2
jax: 0.10.0
libtpu: 0.0.40
codegen_flags: <defaults>
</compile_context>

<pallas_src>
import jax
import jax.numpy as jnp
from jax import lax
from jax.experimental import pallas as pl
from jax.experimental.pallas import tpu as pltpu


def _round_up(x, m):
    return ((x + m - 1) // m) * m


def _round_down(x, m):
    return (x // m) * m


def _make_kernel(K, Din, aggr_method, use_bias, compute_dtype, flat_layout, dchunk):
    """Builds the fused (aggregate-over-K + project) kernel body."""

    def load_chunk(nbr_ref, k, co, cs):
        # Static neighbor index k, static Din-chunk [co, co+cs).
        if flat_layout:
            return nbr_ref[:, k * Din + co:k * Din + co + cs].astype(jnp.float32)
        return nbr_ref[:, k, co:co + cs].astype(jnp.float32)

    def load_chunk_dyn(nbr_ref, k, co, cs):
        # Traced neighbor index (only used on the rolled large-K path).
        if flat_layout:
            start = pl.multiple_of(k * Din + co, 128)  # Din, co, cs all %128==0
            return nbr_ref[:, pl.ds(start, cs)].astype(jnp.float32)
        v = nbr_ref[:, pl.ds(k, 1), co:co + cs]
        return v.reshape(v.shape[0], cs).astype(jnp.float32)

    def combine(a, b):
        return jnp.maximum(a, b) if aggr_method == "max" else a + b

    def kernel(nbr_ref, w_ref, *rest):
        if use_bias:
            b_ref, out_ref, aggr_ref = rest
        else:
            out_ref, aggr_ref = rest
            b_ref = None

        j = pl.program_id(1)  # Dout-tile axis (innermost)

        # Aggregate the K neighbors once per node tile; the result (already in
        # compute_dtype) is reused for every Dout tile.
        @pl.when(j == 0)
        def _():
            for co in range(0, Din, dchunk):
                cs = min(dchunk, Din - co)
                if K <= 64:
                    # Pairwise tree: static unroll, short VALU dependency chain.
                    vals = [load_chunk(nbr_ref, k, co, cs) for k in range(K)]
                    while len(vals) > 1:
                        nxt = [combine(a, b)
                               for a, b in zip(vals[0::2], vals[1::2])]
                        if len(vals) % 2:
                            nxt.append(vals[-1])
                        vals = nxt
                    acc = vals[0]
                else:
                    # Very large K: rolled loop keeps the bundle stream small.
                    def body(k, acc):
                        return combine(acc, load_chunk_dyn(nbr_ref, k, co, cs))
                    acc = lax.fori_loop(1, K, body,
                                        load_chunk(nbr_ref, 0, co, cs),
                                        unroll=8)
                if aggr_method == "mean":
                    acc = acc * jnp.float32(1.0 / K)
                aggr_ref[:, co:co + cs] = acc.astype(aggr_ref.dtype)

        lhs = aggr_ref[...]                       # already compute_dtype
        w = w_ref[...]
        if w.dtype != compute_dtype:
            w = w.astype(compute_dtype)
        hidden = jnp.dot(lhs, w, preferred_element_type=jnp.float32)
        if use_bias:
            hidden = hidden + b_ref[...].astype(jnp.float32)
        out_ref[...] = hidden.astype(out_ref.dtype)

    return kernel


def neighbor_aggregator(neighbor_feature, weight, bias=None, aggr_method="mean",
                        tile_n=512, tile_dout=None, compute_dtype=None):
    """Pallas implementation of NeighborAggregator.forward.

    neighbor_feature: (N, K, Din);  weight: (Din, Dout);  bias: (Dout,) or None
    returns: (N, Dout)
    """
    if aggr_method not in ("mean", "sum", "max"):
        raise ValueError(
            "Unknown aggr type, expected sum, max, or mean, but got "
            f"{aggr_method}")

    N, K, Din = neighbor_feature.shape
    Din_w, Dout = weight.shape
    assert Din == Din_w, (Din, Din_w)
    use_bias = bias is not None

    out_dtype = jnp.promote_types(neighbor_feature.dtype, weight.dtype)
    if compute_dtype is None:
        # bf16 weights -> native bf16 MXU matmul (f32 accumulation); else f32.
        # TODO(synk): optional bf16 MXU path for f32 inputs at very large Dout
        # (compute-leaning shapes) is not enabled by default to keep reference
        # precision.
        compute_dtype = (jnp.bfloat16 if weight.dtype == jnp.bfloat16
                         else jnp.float32)
    compute_dtype = jnp.dtype(compute_dtype)

    # --- Device-aware VMEM budget ----------------------------------------
    try:
        vmem_cap = int(pltpu.get_tpu_info().vmem_capacity_bytes)
    except Exception:
        vmem_cap = 64 * 1024 * 1024           # conservative fallback (v7x-sized)
    budget = (vmem_cap * 5) // 8              # tile footprint target (~62%)
    vmem_limit = (vmem_cap * 13) // 16        # compiler scoped-VMEM limit (~81%)

    nbr_bytes = jnp.dtype(neighbor_feature.dtype).itemsize
    w_bytes = jnp.dtype(weight.dtype).itemsize
    out_bytes = jnp.dtype(out_dtype).itemsize
    cd_bytes = compute_dtype.itemsize
    b_bytes = jnp.dtype(bias.dtype).itemsize if use_bias else 0

    # --- Node tiling (no padding: ragged last block handled by Pallas). ----
    if N < 8:
        tile_n = N                            # block == full dim (always legal)
    else:
        tile_n = max(8, _round_down(min(int(tile_n), N), 8))
        # Keep >= 2 node tiles so both TensorCores get work on v7x megacore.
        if N >= 64 and pl.cdiv(N, tile_n) < 2:
            tile_n = min(tile_n, max(8, _round_up(pl.cdiv(N, 2), 8)))

    # --- Dout tiling: lane-dense 128-multiples whenever Dout allows it. ----
    if Dout < 128:
        tile_dout = Dout                      # block == full dim (always legal)
    else:
        td = _round_down(Dout, 128) if tile_dout is None else int(tile_dout)
        tile_dout = max(128, _round_down(min(td, _round_down(Dout, 128)), 128))

    def nbr_term(tn):
        return 2 * tn * K * Din * nbr_bytes + tn * Din * cd_bytes

    def footprint(tn, td):
        return (2 * tn * K * Din * nbr_bytes      # double-buffered neighbor tile
                + 2 * Din * td * w_bytes          # double-buffered weight tile
                + 2 * tn * td * out_bytes         # double-buffered output tile
                + tn * Din * cd_bytes             # aggregate scratch
                + (2 * td * b_bytes if use_bias else 0))

    # Keep the dominant neighbor stream within ~2/3 of the tile budget first,
    # then shrink the weight/output tile, then (last resort) the node tile.
    while nbr_term(tile_n) > (2 * budget) // 3 and tile_n > 8:
        tile_n = max(8, _round_up(tile_n // 2, 8))
    while footprint(tile_n, tile_dout) > budget and tile_dout > 128:
        tile_dout = max(128, _round_up(tile_dout // 2, 128))
    while footprint(tile_n, tile_dout) > budget and tile_n > 8:
        tile_n = max(8, _round_up(tile_n // 2, 8))

    grid = (pl.cdiv(N, tile_n), pl.cdiv(Dout, tile_dout))

    # Lane-dense flattened neighbor layout when Din is 128-aligned (free
    # contiguous reshape in HBM); otherwise keep the 3-D layout.
    flat_layout = (Din % 128 == 0)
    if flat_layout:
        nbr_in = neighbor_feature.reshape(N, K * Din)
        nbr_spec = pl.BlockSpec((tile_n, K * Din), lambda i, j: (i, 0))
    else:
        nbr_in = neighbor_feature
        nbr_spec = pl.BlockSpec((tile_n, K, Din), lambda i, j: (i, 0, 0))

    in_specs = [nbr_spec, pl.BlockSpec((Din, tile_dout), lambda i, j: (0, j))]
    args = [nbr_in, weight]
    if use_bias:
        in_specs.append(pl.BlockSpec((1, tile_dout), lambda i, j: (0, j)))
        args.append(bias.reshape(1, Dout))

    out_spec = pl.BlockSpec((tile_n, tile_dout), lambda i, j: (i, j))

    # Din chunk for the K-accumulation (keeps the running f32 accumulator small
    # -- matters most on v5e's single vector-store slot).
    dchunk = Din if Din <= 512 else 256

    kernel = _make_kernel(K, Din, aggr_method, use_bias, compute_dtype,
                          flat_layout, dchunk)

    out = pl.pallas_call(
        kernel,
        out_shape=jax.ShapeDtypeStruct((N, Dout), out_dtype),
        grid_spec=pltpu.PrefetchScalarGridSpec(
            num_scalar_prefetch=0,
            grid=grid,
            in_specs=in_specs,
            out_specs=out_spec,
            scratch_shapes=[pltpu.VMEM((tile_n, Din), compute_dtype)],
        ),
        compiler_params=pltpu.CompilerParams(
            # Node axis parallel (megacore); the Dout axis carries the
            # aggregate-scratch dependency -> arbitrary.
            dimension_semantics=("parallel", "arbitrary"),
            vmem_limit_bytes=int(vmem_limit),
        ),
    )(*args)
    return out


def kaiming_uniform_init(key, shape, dtype=jnp.float32):
    # Mimics torch.nn.init.kaiming_uniform_ (a=0).
    fan_in = shape[1]
    gain = jnp.sqrt(2.0)
    bound = gain * jnp.sqrt(3.0 / fan_in)
    return jax.random.uniform(key, shape, dtype=dtype, minval=-bound, maxval=bound)


def _reference(neighbor_feature, weight, bias, aggr_method):
    if aggr_method == "mean":
        aggr = neighbor_feature.mean(axis=1)
    elif aggr_method == "sum":
        aggr = neighbor_feature.sum(axis=1)
    else:  # max (values; torch's .max(dim=1) would return (values, indices))
        aggr = neighbor_feature.max(axis=1)
    out = jnp.dot(aggr, weight)
    if bias is not None:
        out = out + bias
    return out


if __name__ == "__main__":
    key = jax.random.PRNGKey(0)
    k1, k2, k3, k4 = jax.random.split(key, 4)

    # Case 1: GraphSAGE-like small shapes — ragged N, Dout < 128, Din not a
    # multiple of 128 (3-D neighbor layout path), all three aggregations.
    N1, K1, Din1, Dout1 = 100, 8, 64, 32
    nbr1 = jax.random.normal(k1, (N1, K1, Din1), dtype=jnp.float32)
    w1 = kaiming_uniform_init(k2, (Din1, Dout1))
    b1 = jax.random.normal(k3, (Dout1,), dtype=jnp.float32) * 0.1

    for aggr, bias in (("mean", None), ("sum", b1), ("max", None)):
        out = jax.block_until_ready(
            neighbor_aggregator(nbr1, w1, bias=bias, aggr_method=aggr))
        ref = _reference(nbr1, w1, bias, aggr)
        assert out.shape == ref.shape, (out.shape, ref.shape)
        assert jnp.allclose(out, ref, atol=1e-4, rtol=1e-4), aggr

    # Case 2: Din multiple of 128 (flat lane-dense layout), Dout split into two
    # 128-wide tiles (exercises aggregate reuse across the Dout axis), bias.
    N2, K2, Din2, Dout2 = 96, 5, 128, 256
    nbr2 = jax.random.normal(k4, (N2, K2, Din2), dtype=jnp.float32)
    w2 = kaiming_uniform_init(k2, (Din2, Dout2))
    b2 = jnp.arange(Dout2, dtype=jnp.float32) * 0.01
    out2 = jax.block_until_ready(
        neighbor_aggregator(nbr2, w2, bias=b2, aggr_method="mean",
                            tile_dout=128))
    ref2 = _reference(nbr2, w2, b2, "mean")
    assert out2.shape == ref2.shape
    assert jnp.allclose(out2, ref2, atol=1e-4, rtol=1e-4)

    print("KERNEL_OK")
</pallas_src>

<mosaic_0001>
module attributes {stable_mosaic.version = 11 : i64} {
  func.func @kernel(%arg0: i32, %arg1: i32, %arg2: memref<96x8x64xf32, #tpu.memory_space<vmem>>, %arg3: memref<64x32xf32, #tpu.memory_space<vmem>>, %arg4: memref<96x32xf32, #tpu.memory_space<vmem>>, %arg5: memref<96x64xf32, #tpu.memory_space<vmem>>) attributes {dimension_semantics = [#tpu.dimension_semantics<parallel>, #tpu.dimension_semantics<arbitrary>], iteration_bounds = array<i64: 2, 1>, scalar_prefetch = 0 : i64, scratch_operands = 1 : i64, tpu.core_type = #tpu.core_type<tc>, window_params = [{transform_indices = @transform_0, window_bounds = array<i64: 96, 8, 64>}, {transform_indices = @transform_1, window_bounds = array<i64: 64, 32>}, {transform_indices = @transform_2, window_bounds = array<i64: 96, 32>}]} {
    %c0_i32 = arith.constant 0 : i32
    %0 = arith.cmpi eq, %arg1, %c0_i32 : i32
    %1 = arith.extui %0 : i1 to i32
    %c0_i32_0 = arith.constant 0 : i32
    %2 = arith.cmpi ne, %1, %c0_i32_0 : i32
    scf.if %2 {
      %c0_6 = arith.constant 0 : index
      %c0_7 = arith.constant 0 : index
      %c0_8 = arith.constant 0 : index
      %7 = vector.load %arg2[%c0_6, %c0_7, %c0_8] : memref<96x8x64xf32, #tpu.memory_space<vmem>>, vector<96x1x64xf32>
      %8 = vector.shape_cast %7 : vector<96x1x64xf32> to vector<96x64xf32>
      %c0_9 = arith.constant 0 : index
      %c1 = arith.constant 1 : index
      %c0_10 = arith.constant 0 : index
      %9 = vector.load %arg2[%c0_9, %c1, %c0_10] : memref<96x8x64xf32, #tpu.memory_space<vmem>>, vector<96x1x64xf32>
      %10 = vector.shape_cast %9 : vector<96x1x64xf32> to vector<96x64xf32>
      %c0_11 = arith.constant 0 : index
      %c2 = arith.constant 2 : index
      %c0_12 = arith.constant 0 : index
      %11 = vector.load %arg2[%c0_11, %c2, %c0_12] : memref<96x8x64xf32, #tpu.memory_space<vmem>>, vector<96x1x64xf32>
      %12 = vector.shape_cast %11 : vector<96x1x64xf32> to vector<96x64xf32>
      %c0_13 = arith.constant 0 : index
      %c3 = arith.constant 3 : index
      %c0_14 = arith.constant 0 : index
      %13 = vector.load %arg2[%c0_13, %c3, %c0_14] : memref<96x8x64xf32, #tpu.memory_space<vmem>>, vector<96x1x64xf32>
      %14 = vector.shape_cast %13 : vector<96x1x64xf32> to vector<96x64xf32>
      %c0_15 = arith.constant 0 : index
      %c4 = arith.constant 4 : index
      %c0_16 = arith.constant 0 : index
      %15 = vector.load %arg2[%c0_15, %c4, %c0_16] : memref<96x8x64xf32, #tpu.memory_space<vmem>>, vector<96x1x64xf32>
      %16 = vector.shape_cast %15 : vector<96x1x64xf32> to vector<96x64xf32>
      %c0_17 = arith.constant 0 : index
      %c5 = arith.constant 5 : index
      %c0_18 = arith.constant 0 : index
      %17 = vector.load %arg2[%c0_17, %c5, %c0_18] : memref<96x8x64xf32, #tpu.memory_space<vmem>>, vector<96x1x64xf32>
      %18 = vector.shape_cast %17 : vector<96x1x64xf32> to vector<96x64xf32>
      %c0_19 = arith.constant 0 : index
      %c6 = arith.constant 6 : index
      %c0_20 = arith.constant 0 : index
      %19 = vector.load %arg2[%c0_19, %c6, %c0_20] : memref<96x8x64xf32, #tpu.memory_space<vmem>>, vector<96x1x64xf32>
      %20 = vector.shape_cast %19 : vector<96x1x64xf32> to vector<96x64xf32>
      %c0_21 = arith.constant 0 : index
      %c7 = arith.constant 7 : index
      %c0_22 = arith.constant 0 : index
      %21 = vector.load %arg2[%c0_21, %c7, %c0_22] : memref<96x8x64xf32, #tpu.memory_space<vmem>>, vector<96x1x64xf32>
      %22 = vector.shape_cast %21 : vector<96x1x64xf32> to vector<96x64xf32>
      %23 = arith.addf %8, %10 : vector<96x64xf32>
      %24 = arith.addf %12, %14 : vector<96x64xf32>
      %25 = arith.addf %16, %18 : vector<96x64xf32>
      %26 = arith.addf %20, %22 : vector<96x64xf32>
      %27 = arith.addf %23, %24 : vector<96x64xf32>
      %28 = arith.addf %25, %26 : vector<96x64xf32>
      %29 = arith.addf %27, %28 : vector<96x64xf32>
      %cst_23 = arith.constant 1.250000e-01 : f32
      %30 = vector.broadcast %cst_23 : f32 to vector<96x64xf32>
      %31 = arith.mulf %29, %30 : vector<96x64xf32>
      %c0_24 = arith.constant 0 : index
      %c0_25 = arith.constant 0 : index
      %32 = vector.load %arg5[%c0_24, %c0_25] : memref<96x64xf32, #tpu.memory_space<vmem>>, vector<96x64xf32>
      tpu.vector_store %arg5[%c0_24, %c0_25], %31 {strides = array<i32>} : memref<96x64xf32, #tpu.memory_space<vmem>>, vector<96x64xf32>,
    } else {
    }
    %c0 = arith.constant 0 : index
    %c0_1 = arith.constant 0 : index
    %3 = vector.load %arg5[%c0, %c0_1] : memref<96x64xf32, #tpu.memory_space<vmem>>, vector<96x64xf32>
    %c0_2 = arith.constant 0 : index
    %c0_3 = arith.constant 0 : index
    %4 = vector.load %arg3[%c0_2, %c0_3] : memref<64x32xf32, #tpu.memory_space<vmem>>, vector<64x32xf32>
    %cst = arith.constant dense<0.000000e+00> : vector<96x32xf32>
    %5 = tpu.matmul %3, %4, %cst {dimension_numbers = #tpu.dot_dimension_numbers<[1], [0], [0], [1], [0, 0, 1, 1], [], []>} : vector<96x64xf32>, vector<64x32xf32>, vector<96x32xf32> -> vector<96x32xf32>
    %c0_4 = arith.constant 0 : index
    %c0_5 = arith.constant 0 : index
    %6 = vector.load %arg4[%c0_4, %c0_5] : memref<96x32xf32, #tpu.memory_space<vmem>>, vector<96x32xf32>
    tpu.vector_store %arg4[%c0_4, %c0_5], %5 {strides = array<i32>} : memref<96x32xf32, #tpu.memory_space<vmem>>, vector<96x32xf32>,
    return
  }
  func.func @transform_0(%arg0: i32, %arg1: i32) -> (i32, i32, i32) {
    %c0_i32 = arith.constant 0 : i32
    %c0_i32_0 = arith.constant 0 : i32
    %c0_i32_1 = arith.constant 0 : i32
    return %arg0, %c0_i32, %c0_i32_0 : i32, i32, i32
  }
  func.func @transform_1(%arg0: i32, %arg1: i32) -> (i32, i32) {
    %c0_i32 = arith.constant 0 : i32
    %c0_i32_0 = arith.constant 0 : i32
    return %c0_i32, %arg1 : i32, i32
  }
  func.func @transform_2(%arg0: i32, %arg1: i32) -> (i32, i32) {
    %c0_i32 = arith.constant 0 : i32
    return %arg0, %arg1 : i32, i32
  }
}

</mosaic_0001>

<bundles_post_ra>
// kernel: tpu_custom_call.1
= control target key start
LH: loop header
LB: loop body
LE: loop exit
PB: predicated region body
PF: predicated region fallthrough
CT: control target
= control target key end

     0   :  { %s2730_s9 = smov 0   ;;  %s2732_s10 = smov 0   ;;  %s3795_s0 = inlined_call_operand.vmem [shape: f32[100,8,64], index: 0, kind: input, shape index: {}]   ;;  %s3796_s1 = inlined_call_operand.vmem [shape: f32[64,32], index: 1, kind: input, shape index: {}]   ;;  %s3797_s2 = inlined_call_operand.vmem [shape: f32[100,32], index: 2, kind: output, shape index: {}]  }
   0x1   :  { %s2734_s11 = smov 0   ;;  %s2736_s12 = smov 0  }
   0x2   :  { %s2738_s13 = smov 0  }
   0x3 LB: > { %s2443_s14 = sadd.s32 4294967295, %s2681_s13   ;;  %s24_s15 = sadd.s32 1, %s2677_s12  ;;  %s2681_s13 = sphi %s2738_s13, %s12_s13   ;;  %s2677_s12 = sphi %s2736_s12, %s3807_s12   ;;  %s2673_s11 = sphi %s2734_s11, %s3806_s11   ;;  %s2669_s10 = sphi %s2732_s10, %s3805_s10   ;;  %s2665_s9 = sphi %s2730_s9, %s3804_s9  }
   0x4   : > { %p26_p0 = scmp.ge.s32.totalorder %s24_s15, 2  ;;  %s85_s16 = sadd.s32 1, %s2669_s10 }
   0x5   : > { %p95_p1 = scmp.ne.s32.totalorder %s2669_s10, %s2665_s9  ;;  %p96_p2 = scmp.eq.s32.totalorder %s2443_s14, 1 }
   0x6   : > { %s3809_s15 = smov (%p26_p0, %s24_s15), 0  ;;  %p2448_p4 = scmp.ge.s32.totalorder %s2681_s13, 1 }
   0x7   : > { %p2762_p3 = por %p96_p2, %p95_p1  ;;  %s80_s18 = ssub.s32 %s2677_s12, %s3809_s15 }
   0x8   : > { %p144_p5 = scmp.lt.s32.totalorder %s2681_s13, 3  ;;  %p83_p6 = scmp.eq.s32.totalorder %s80_s18, 0 }
   0xa   : > { %p145_p7 = pnand %p2448_p4, %p144_p5 }
   0xb   : > { %s2771_s19 = scalar_select %p83_p6, %s2669_s10, %s85_s16  }
   0xc   : > { %148 = sbr.rel (%p145_p7) target bundleno = 527 (0x20f), region = 28  ;;  %s170_s22 = sand.u32 (!%p145_p7), 1, %s2665_s9  }
   0xd   : > { %s2780_s24 = smul.u32 (!%p145_p7), 96, %s2673_s11 }
   0xe   : > { %s3609_s9 = smul.u32 (!%p145_p7), 96, %s170_s22 }
   0xf   : > { %p178_p8 = scmp.lt.s32.totalorder (!%p145_p7), %s2780_s24, 99 }
  0x10   : > { %s3678_s23 = scalar_lea.vmem (!%p145_p7), [#allocation3], %s3609_s9  }
  0x11   : > { %v2051_v0 = vld [vmem:[%s3796_s1 + $0x38] sm:$0xff]  ;;  %v2050_v1 = vld [vmem:[%s3796_s1 + $0x30] sm:$0xff]  ;;  %v2049_v2 = vld [vmem:[%s3796_s1 + $0x28] sm:$0xff]  ;;  %s179_s29 = scalar_select %p178_p8, %s2780_s24, 99  ;;  %vm1833_vm0 = vcmask 1041409   ;;  %vm1836_vm1 = vcmask 1042434  }
  0x12   : > { %2476 = vmatpush.msra.mxu2 %v2051_v0  ;;  %2477 = vmatpush.msra.mxu3 %v2051_v0  ;;  %v2048_v3 = vld [vmem:[%s3796_s1 + $0x20] sm:$0xff]  ;;  %v2047_v4 = vld [vmem:[%s3796_s1 + $0x18] sm:$0xff]  ;;  %v2046_v5 = vld [vmem:[%s3796_s1 + $0x10] sm:$0xff]  ;;  %vm1839_vm2 = vcmask 1043459   ;;  %vm1842_vm3 = vcmask 1044484   ;;  %vm1845_vm4 = vcmask 1045509   ;;  %s3720_s28 = scalar_lea.vmem (%p2762_p3), %s3797_s2, %s2780_s24  }
  0x13   : > { %2097 = vmatpush.msra.mxu0 %v2051_v0  ;;  %2475 = vmatpush.msra.mxu1 %v2051_v0  ;;  %s2449_s4 = sshll.u32 %s179_s29, 3  ;;  %v2045_v6 = vld [vmem:[%s3796_s1 + $0x8] sm:$0xff]  ;;  %v2044_v7 = vld [vmem:[%s3796_s1] sm:$0xff]  ;;  %vm1848_vm5 = vcmask 1046534   ;;  %vm1851_vm6 = vcmask 1047559   ;;  %vm2019_vm7 = vcmask 523264  }
  0x14   : > { %2479 = vmatpush.msra.mxu2 %v2050_v1  ;;  %2480 = vmatpush.msra.mxu3 %v2050_v1  ;;  %s2802_s18 = scalar_lea.vmem %s3795_s0, %s2449_s4  ;;  %vm2142_vm8 = vcmask 261120   ;;  %s2162_s25 = smul.u32 (%p2762_p3), 12, %s2673_s11 }
  0x15   : > { %2098 = vmatpush.msra.mxu0 %v2050_v1  ;;  %2478 = vmatpush.msra.mxu1 %v2050_v1  ;;  %v248_v8 = vld [vmem:[%s2802_s18 + $0x180] sm:$0x1]  ;;  %v249_v9 = vld [vmem:[%s2802_s18 + $0x188] sm:$0x1]  ;;  %v344_v10 = vld [vmem:[%s2802_s18 + $0x181] sm:$0x1] }
  0x16   : > { %2482 = vmatpush.msra.mxu2 %v2049_v2  ;;  %2483 = vmatpush.msra.mxu3 %v2049_v2  ;;  %v345_v11 = vld [vmem:[%s2802_s18 + $0x189] sm:$0x1]  ;;  %v250_v12 = vld [vmem:[%s2802_s18 + $0x190] sm:$0x1]  ;;  %v251_v13 = vld [vmem:[%s2802_s18 + $0x198] sm:$0x1]  ;;  %v1016_v37 = vadd.f32 %v344_v10, %v248_v8 }
  0x17   : > { %2099 = vmatpush.msra.mxu0 %v2049_v2  ;;  %2481 = vmatpush.msra.mxu1 %v2049_v2  ;;  %v252_v14 = vld [vmem:[%s2802_s18 + $0x1a0] sm:$0x1]  ;;  %v253_v15 = vld [vmem:[%s2802_s18 + $0x1a8] sm:$0x1]  ;;  %v346_v16 = vld [vmem:[%s2802_s18 + $0x191] sm:$0x1]  ;;  %v1017_v38 = vadd.f32 %v345_v11, %v249_v9 }
  0x18   : > { %2485 = vmatpush.msra.mxu2 %v2048_v3  ;;  %2486 = vmatpush.msra.mxu3 %v2048_v3  ;;  %v347_v17 = vld [vmem:[%s2802_s18 + $0x199] sm:$0x1]  ;;  %v348_v18 = vld [vmem:[%s2802_s18 + $0x1a1] sm:$0x1]  ;;  %v349_v19 = vld [vmem:[%s2802_s18 + $0x1a9] sm:$0x1]  ;;  %v1018_v42 = vadd.f32 %v346_v16, %v250_v12 }
  0x19   : > { %2100 = vmatpush.msra.mxu0 %v2048_v3  ;;  %2484 = vmatpush.msra.mxu1 %v2048_v3  ;;  %v440_v20 = vld [vmem:[%s2802_s18 + $0x182] sm:$0x1]  ;;  %v441_v21 = vld [vmem:[%s2802_s18 + $0x18a] sm:$0x1]  ;;  %v442_v22 = vld [vmem:[%s2802_s18 + $0x192] sm:$0x1]  ;;  %v1019_v43 = vadd.f32 %v347_v17, %v251_v13  ;;  %v1020_v44 = vadd.f32 %v348_v18, %v252_v14  ;;  %v1021_v45 = vadd.f32 %v349_v19, %v253_v15 }
  0x1a   : > { %2488 = vmatpush.msra.mxu2 %v2047_v4  ;;  %2489 = vmatpush.msra.mxu3 %v2047_v4  ;;  %v443_v23 = vld [vmem:[%s2802_s18 + $0x19a] sm:$0x1]  ;;  %v254_v24 = vld [vmem:[%s2802_s18 + $0x1b0] sm:$0x1]  ;;  %v350_v25 = vld [vmem:[%s2802_s18 + $0x1b1] sm:$0x1] }
  0x1b   : > { %2101 = vmatpush.msra.mxu0 %v2047_v4  ;;  %2487 = vmatpush.msra.mxu1 %v2047_v4  ;;  %v444_v26 = vld [vmem:[%s2802_s18 + $0x1a2] sm:$0x1]  ;;  %v445_v27 = vld [vmem:[%s2802_s18 + $0x1aa] sm:$0x1]  ;;  %v446_v28 = vld [vmem:[%s2802_s18 + $0x1b2] sm:$0x1]  ;;  %v1022_v56 = vadd.f32 %v350_v25, %v254_v24 }
  0x1c   : > { %2491 = vmatpush.msra.mxu2 %v2046_v5  ;;  %2492 = vmatpush.msra.mxu3 %v2046_v5  ;;  %v536_v29 = vld [vmem:[%s2802_s18 + $0x183] sm:$0x1]  ;;  %v255_v30 = vld [vmem:[%s2802_s18 + $0x1b8] sm:$0x1]  ;;  %v537_v31 = vld [vmem:[%s2802_s18 + $0x18b] sm:$0x1] }
  0x1d   : > { %2102 = vmatpush.msra.mxu0 %v2046_v5  ;;  %2490 = vmatpush.msra.mxu1 %v2046_v5  ;;  %v538_v32 = vld [vmem:[%s2802_s18 + $0x193] sm:$0x1]  ;;  %v539_v33 = vld [vmem:[%s2802_s18 + $0x19b] sm:$0x1]  ;;  %v540_v34 = vld [vmem:[%s2802_s18 + $0x1a3] sm:$0x1]  ;;  %v1112_v47 = vadd.f32 %v536_v29, %v440_v20  ;;  %v1113_v48 = vadd.f32 %v537_v31, %v441_v21 }
  0x1e   : > { %2494 = vmatpush.msra.mxu2 %v2045_v6  ;;  %2495 = vmatpush.msra.mxu3 %v2045_v6  ;;  %v541_v35 = vld [vmem:[%s2802_s18 + $0x1ab] sm:$0x1]  ;;  %v542_v36 = vld [vmem:[%s2802_s18 + $0x1b3] sm:$0x1]  ;;  %v351_v39 = vld [vmem:[%s2802_s18 + $0x1b9] sm:$0x1]  ;;  %v1114_v49 = vadd.f32 %v538_v32, %v442_v22  ;;  %v1115_v50 = vadd.f32 %v539_v33, %v443_v23  ;;  %v1116_v57 = vadd.f32 %v540_v34, %v444_v26 }
  0x1f   : > { %2103 = vmatpush.msra.mxu0 %v2045_v6  ;;  %2493 = vmatpush.msra.mxu1 %v2045_v6  ;;  %v447_v40 = vld [vmem:[%s2802_s18 + $0x1ba] sm:$0x1]  ;;  %v543_v41 = vld [vmem:[%s2802_s18 + $0x1bb] sm:$0x1]  ;;  %v632_v46 = vld [vmem:[%s2802_s18 + $0x184] sm:$0x1]  ;;  %v1117_v58 = vadd.f32 %v541_v35, %v445_v27  ;;  %v1118_v59 = vadd.f32 %v542_v36, %v446_v28  ;;  %v1023_v2 = vadd.f32 %v351_v39, %v255_v30 }
  0x20   : > { %2497 = vmatpush.msra.mxu2 %v2044_v7  ;;  %2498 = vmatpush.msra.mxu3 %v2044_v7  ;;  %v633_v51 = vld [vmem:[%s2802_s18 + $0x18c] sm:$0x1]  ;;  %v634_v52 = vld [vmem:[%s2802_s18 + $0x194] sm:$0x1]  ;;  %v635_v53 = vld [vmem:[%s2802_s18 + $0x19c] sm:$0x1]  ;;  %v1119_v3 = vadd.f32 %v543_v41, %v447_v40  ;;  %v1400_v11 = vadd.f32 %v1112_v47, %v1016_v37  ;;  %v1401_v12 = vadd.f32 %v1113_v48, %v1017_v38 }
  0x21   : > { %2104 = vmatpush.msra.mxu0 %v2044_v7  ;;  %2496 = vmatpush.msra.mxu1 %v2044_v7  ;;  %v728_v54 = vld [vmem:[%s2802_s18 + $0x185] sm:$0x1]  ;;  %v729_v55 = vld [vmem:[%s2802_s18 + $0x18d] sm:$0x1]  ;;  %v636_v60 = vld [vmem:[%s2802_s18 + $0x1a4] sm:$0x1]  ;;  %v1402_v13 = vadd.f32 %v1114_v49, %v1018_v42  ;;  %v1403_v14 = vadd.f32 %v1115_v50, %v1019_v43  ;;  %v1404_v19 = vadd.f32 %v1116_v57, %v1020_v44 }
  0x22   : > { %v637_v61 = vld [vmem:[%s2802_s18 + $0x1ac] sm:$0x1]  ;;  %v638_v62 = vld [vmem:[%s2802_s18 + $0x1b4] sm:$0x1]  ;;  %v730_v63 = vld [vmem:[%s2802_s18 + $0x195] sm:$0x1]  ;;  %v1208_v18 = vadd.f32 %v728_v54, %v632_v46  ;;  %v1405_v20 = vadd.f32 %v1117_v58, %v1021_v45  ;;  %v1406_v21 = vadd.f32 %v1118_v59, %v1022_v56  ;;  %v1209_v25 = vadd.f32 %v729_v55, %v633_v51 }
  0x23   : > { %v731_v0 = vld [vmem:[%s2802_s18 + $0x19d] sm:$0x1]  ;;  %v732_v1 = vld [vmem:[%s2802_s18 + $0x1a5] sm:$0x1]  ;;  %v639_v4 = vld [vmem:[%s2802_s18 + $0x1bc] sm:$0x1]  ;;  %v1210_v26 = vadd.f32 %v730_v63, %v634_v52  ;;  %v1407_v28 = vadd.f32 %v1119_v3, %v1023_v2 }
  0x24   : > { %v733_v5 = vld [vmem:[%s2802_s18 + $0x1ad] sm:$0x1]  ;;  %v734_v6 = vld [vmem:[%s2802_s18 + $0x1b5] sm:$0x1]  ;;  %v735_v7 = vld [vmem:[%s2802_s18 + $0x1bd] sm:$0x1]  ;;  %v1211_v27 = vadd.f32 %v731_v0, %v635_v53  ;;  %v1212_v32 = vadd.f32 %v732_v1, %v636_v60 }
  0x25   : > { %v824_v8 = vld [vmem:[%s2802_s18 + $0x186] sm:$0x1]  ;;  %v825_v9 = vld [vmem:[%s2802_s18 + $0x18e] sm:$0x1]  ;;  %v826_v10 = vld [vmem:[%s2802_s18 + $0x196] sm:$0x1]  ;;  %v1213_v33 = vadd.f32 %v733_v5, %v637_v61  ;;  %v1214_v34 = vadd.f32 %v734_v6, %v638_v62  ;;  %v1215_v39 = vadd.f32 %v735_v7, %v639_v4 }
  0x26   : > { %v827_v15 = vld [vmem:[%s2802_s18 + $0x19e] sm:$0x1]  ;;  %v828_v16 = vld [vmem:[%s2802_s18 + $0x1a6] sm:$0x1]  ;;  %v829_v17 = vld [vmem:[%s2802_s18 + $0x1ae] sm:$0x1] }
  0x27   : > { %v830_v22 = vld [vmem:[%s2802_s18 + $0x1b6] sm:$0x1]  ;;  %v831_v23 = vld [vmem:[%s2802_s18 + $0x1be] sm:$0x1]  ;;  %v920_v24 = vld [vmem:[%s2802_s18 + $0x187] sm:$0x1] }
  0x28   : > { %v921_v29 = vld [vmem:[%s2802_s18 + $0x18f] sm:$0x1]  ;;  %v922_v30 = vld [vmem:[%s2802_s18 + $0x197] sm:$0x1]  ;;  %v923_v31 = vld [vmem:[%s2802_s18 + $0x19f] sm:$0x1]  ;;  %v1304_v35 = vadd.f32 %v920_v24, %v824_v8 }
  0x29   : > { %v924_v36 = vld [vmem:[%s2802_s18 + $0x1a7] sm:$0x1]  ;;  %v925_v37 = vld [vmem:[%s2802_s18 + $0x1af] sm:$0x1]  ;;  %v926_v38 = vld [vmem:[%s2802_s18 + $0x1b7] sm:$0x1]  ;;  %v1305_v40 = vadd.f32 %v921_v29, %v825_v9  ;;  %v1306_v41 = vadd.f32 %v922_v30, %v826_v10  ;;  %v1307_v42 = vadd.f32 %v923_v31, %v827_v15 }
  0x2a   : > { %v927_v43 = vld [vmem:[%s2802_s18 + $0x1bf] sm:$0x1]  ;;  %v1308_v44 = vadd.f32 %v924_v36, %v828_v16  ;;  %v1309_v45 = vadd.f32 %v925_v37, %v829_v17  ;;  %v1310_v46 = vadd.f32 %v926_v38, %v830_v22  ;;  %v1496_v47 = vadd.f32 %v1304_v35, %v1208_v18  ;;  %v368_v15 = vld [vmem:[%s2802_s18 + $0x241] sm:$0x1]  ;;  %v273_v18 = vld [vmem:[%s2802_s18 + $0x248] sm:$0x1] }
  0x2b   : > { %v1311_v48 = vadd.f32 %v927_v43, %v831_v23  ;;  %v1497_v49 = vadd.f32 %v1305_v40, %v1209_v25  ;;  %v1498_v50 = vadd.f32 %v1306_v41, %v1210_v26  ;;  %v1499_v51 = vadd.f32 %v1307_v42, %v1211_v27  ;;  %v370_v22 = vld [vmem:[%s2802_s18 + $0x251] sm:$0x1]  ;;  %v371_v23 = vld [vmem:[%s2802_s18 + $0x259] sm:$0x1]  ;;  %v276_v26 = vld [vmem:[%s2802_s18 + $0x260] sm:$0x1] }
  0x2c   : > { %v1500_v52 = vadd.f32 %v1308_v44, %v1212_v32  ;;  %v1501_v53 = vadd.f32 %v1309_v45, %v1213_v33  ;;  %v1502_v54 = vadd.f32 %v1310_v46, %v1214_v34  ;;  %v1592_v55 = vadd.f32 %v1496_v47, %v1400_v11  ;;  %v372_v27 = vld [vmem:[%s2802_s18 + $0x261] sm:$0x1]  ;;  %v465_v29 = vld [vmem:[%s2802_s18 + $0x24a] sm:$0x1]  ;;  %v466_v30 = vld [vmem:[%s2802_s18 + $0x252] sm:$0x1] }
  0x2d   : > { %v1503_v56 = vadd.f32 %v1311_v48, %v1215_v39  ;;  %v1593_v57 = vadd.f32 %v1497_v49, %v1401_v12  ;;  %v1594_v58 = vadd.f32 %v1498_v50, %v1402_v13  ;;  %v1595_v59 = vadd.f32 %v1499_v51, %v1403_v14  ;;  %v272_v14 = vld [vmem:[%s2802_s18 + $0x240] sm:$0x1]  ;;  %v277_v32 = vld [vmem:[%s2802_s18 + $0x268] sm:$0x1]  ;;  %v373_v33 = vld [vmem:[%s2802_s18 + $0x269] sm:$0x1] }
  0x2e   : > { %v1596_v60 = vadd.f32 %v1500_v52, %v1404_v19  ;;  %v1597_v61 = vadd.f32 %v1501_v53, %v1405_v20  ;;  %v1598_v62 = vadd.f32 %v1502_v54, %v1406_v21  ;;  %v1688_v63 = vmul.f32 0.125, %v1592_v55  ;;  %v274_v19 = vld [vmem:[%s2802_s18 + $0x250] sm:$0x1]  ;;  %v275_v20 = vld [vmem:[%s2802_s18 + $0x258] sm:$0x1]  ;;  %s2163_s29 = ssub.s32 (%p2762_p3), 13, %s2162_s25 }
  0x2f   : > { %v1599_v0 = vadd.f32 %v1503_v56, %v1407_v28  ;;  %v1689_v1 = vmul.f32 0.125, %v1593_v57  ;;  %v1690_v2 = vmul.f32 0.125, %v1594_v58  ;;  %v1691_v3 = vmul.f32 0.125, %v1595_v59  ;;  %v369_v21 = vld [vmem:[%s2802_s18 + $0x249] sm:$0x1]  ;;  %p2164_p9 = scmp.lt.s32.totalorder (%p2762_p3), %s2163_s29, 12 }
  0x30   : > { %v1692_v4 = vmul.f32 0.125, %v1596_v60  ;;  %v1693_v5 = vmul.f32 0.125, %v1597_v61  ;;  %v1694_v6 = vmul.f32 0.125, %v1598_v62  ;;  %v464_v28 = vld [vmem:[%s2802_s18 + $0x242] sm:$0x1]  ;;  %v1040_v50 = vadd.f32 %v368_v15, %v272_v14 }
  0x31   : > { %v1695_v7 = vmul.f32 0.125, %v1599_v0  ;;  %v1923_v8 = vrot.slane %v1689_v1, 7  ;;  %v1925_v9 = vrot.slane %v1690_v2, 6  ;;  %v1927_v10 = vrot.slane %v1691_v3, 5  ;;  %v467_v34 = vld [vmem:[%s2802_s18 + $0x25a] sm:$0x1] }
  0x32   : > { %v1929_v11 = vrot.slane %v1692_v4, 4  ;;  %v1931_v13 = vrot.slane %v1693_v5, 3  ;;  %v1933_v17 = vrot.slane %v1694_v6, 2  ;;  %v468_v35 = vld [vmem:[%s2802_s18 + $0x262] sm:$0x1]  ;;  %v1041_v55 = vadd.f32 %v369_v21, %v273_v18 }
  0x33   : > { %v1924_v12 = vsel %vm1833_vm0, %v1923_v8, %v1688_v63  ;;  %v1935_v25 = vrot.slane %v1695_v7, 1  ;;  %v469_v36 = vld [vmem:[%s2802_s18 + $0x26a] sm:$0x1]  ;;  %v278_v38 = vld [vmem:[%s2802_s18 + $0x270] sm:$0x1]  ;;  %v1042_v56 = vadd.f32 %v370_v22, %v274_v19  ;;  %v1043_v57 = vadd.f32 %v371_v23, %v275_v20 }
  0x34   : > { %v1926_v16 = vsel %vm1836_vm1, %v1925_v9, %v1924_v12  ;;  %v279_v39 = vld [vmem:[%s2802_s18 + $0x278] sm:$0x1]  ;;  %v374_v40 = vld [vmem:[%s2802_s18 + $0x271] sm:$0x1]  ;;  %v375_v41 = vld [vmem:[%s2802_s18 + $0x279] sm:$0x1]  ;;  %v1044_v59 = vadd.f32 %v372_v27, %v276_v26  ;;  %v1045_v3 = vadd.f32 %v373_v33, %v277_v32 }
  0x35   : > { %v1928_v24 = vsel %vm1839_vm2, %v1927_v10, %v1926_v16  ;;  %v470_v42 = vld [vmem:[%s2802_s18 + $0x272] sm:$0x1]  ;;  %v560_v43 = vld [vmem:[%s2802_s18 + $0x243] sm:$0x1]  ;;  %v561_v44 = vld [vmem:[%s2802_s18 + $0x24b] sm:$0x1]  ;;  %v1047_v14 = vadd.f32 %v375_v41, %v279_v39 }
  0x36   : > { %v1930_v31 = vsel %vm1842_vm3, %v1929_v11, %v1928_v24  ;;  %v562_v45 = vld [vmem:[%s2802_s18 + $0x253] sm:$0x1]  ;;  %v563_v47 = vld [vmem:[%s2802_s18 + $0x25b] sm:$0x1]  ;;  %v564_v48 = vld [vmem:[%s2802_s18 + $0x263] sm:$0x1]  ;;  %v1136_v60 = vadd.f32 %v560_v43, %v464_v28  ;;  %v1137_v61 = vadd.f32 %v561_v44, %v465_v29 }
  0x37   : > { %v1932_v37 = vsel %vm1845_vm4, %v1931_v13, %v1930_v31  ;;  %v565_v49 = vld [vmem:[%s2802_s18 + $0x26b] sm:$0x1]  ;;  %v471_v52 = vld [vmem:[%s2802_s18 + $0x27a] sm:$0x1]  ;;  %v566_v53 = vld [vmem:[%s2802_s18 + $0x273] sm:$0x1]  ;;  %v1138_v62 = vadd.f32 %v562_v45, %v466_v30  ;;  %v1139_v4 = vadd.f32 %v563_v47, %v467_v34  ;;  %v1140_v5 = vadd.f32 %v564_v48, %v468_v35 }
  0x38   : > { %v1934_v46 = vsel %vm1848_vm5, %v1933_v17, %v1932_v37  ;;  %v567_v54 = vld [vmem:[%s2802_s18 + $0x27b] sm:$0x1]  ;;  %v656_v58 = vld [vmem:[%s2802_s18 + $0x244] sm:$0x1]  ;;  %v657_v63 = vld [vmem:[%s2802_s18 + $0x24c] sm:$0x1]  ;;  %v1141_v6 = vadd.f32 %v565_v49, %v469_v36  ;;  %v1046_v13 = vadd.f32 %v374_v40, %v278_v38  ;;  %v1142_v15 = vadd.f32 %v566_v53, %v470_v42 }
  0x39   : > { %v1936_v51 = vsel %vm1851_vm6, %v1935_v25, %v1934_v46  ;;  %v658_v0 = vld [vmem:[%s2802_s18 + $0x254] sm:$0x1]  ;;  %v752_v1 = vld [vmem:[%s2802_s18 + $0x245] sm:$0x1]  ;;  %v753_v2 = vld [vmem:[%s2802_s18 + $0x24d] sm:$0x1]  ;;  %v1143_v16 = vadd.f32 %v567_v54, %v471_v52  ;;  %v1424_v25 = vadd.f32 %v1136_v60, %v1040_v50  ;;  %v1425_v26 = vadd.f32 %v1137_v61, %v1041_v55 }
  0x3a   : > { %2026 = vst.msk [vmem:[#allocation2 + $0x30] sm:$0xff] %vm2019_vm7, %v1936_v51  ;;  %v659_v7 = vld [vmem:[%s2802_s18 + $0x25c] sm:$0x1]  ;;  %v660_v8 = vld [vmem:[%s2802_s18 + $0x264] sm:$0x1]  ;;  %v1426_v27 = vadd.f32 %v1138_v62, %v1042_v56  ;;  %v1232_v31 = vadd.f32 %v752_v1, %v656_v58  ;;  %v1427_v32 = vadd.f32 %v1139_v4, %v1043_v57  ;;  %v1428_v33 = vadd.f32 %v1140_v5, %v1044_v59 }
  0x3b   : > { %v661_v9 = vld [vmem:[%s2802_s18 + $0x26c] sm:$0x1]  ;;  %v754_v10 = vld [vmem:[%s2802_s18 + $0x255] sm:$0x1]  ;;  %v755_v11 = vld [vmem:[%s2802_s18 + $0x25d] sm:$0x1]  ;;  %v1429_v34 = vadd.f32 %v1141_v6, %v1045_v3  ;;  %v1233_v38 = vadd.f32 %v753_v2, %v657_v63  ;;  %v1430_v40 = vadd.f32 %v1142_v15, %v1046_v13  ;;  %v1431_v41 = vadd.f32 %v1143_v16, %v1047_v14 }
  0x3c   : > { %v756_v12 = vld [vmem:[%s2802_s18 + $0x265] sm:$0x1]  ;;  %v662_v17 = vld [vmem:[%s2802_s18 + $0x274] sm:$0x1]  ;;  %v663_v18 = vld [vmem:[%s2802_s18 + $0x27c] sm:$0x1]  ;;  %v1234_v39 = vadd.f32 %v754_v10, %v658_v0  ;;  %v1235_v45 = vadd.f32 %v755_v11, %v659_v7 }
  0x3d   : > { %v757_v19 = vld [vmem:[%s2802_s18 + $0x26d] sm:$0x1]  ;;  %v758_v20 = vld [vmem:[%s2802_s18 + $0x275] sm:$0x1]  ;;  %v759_v21 = vld [vmem:[%s2802_s18 + $0x27d] sm:$0x1]  ;;  %v1236_v46 = vadd.f32 %v756_v12, %v660_v8 }
  0x3e   : > { %v848_v22 = vld [vmem:[%s2802_s18 + $0x246] sm:$0x1]  ;;  %v849_v23 = vld [vmem:[%s2802_s18 + $0x24e] sm:$0x1]  ;;  %v850_v24 = vld [vmem:[%s2802_s18 + $0x256] sm:$0x1]  ;;  %v1237_v47 = vadd.f32 %v757_v19, %v661_v9  ;;  %v1238_v52 = vadd.f32 %v758_v20, %v662_v17  ;;  %v1239_v53 = vadd.f32 %v759_v21, %v663_v18 }
  0x3f   : > { %v851_v28 = vld [vmem:[%s2802_s18 + $0x25e] sm:$0x1]  ;;  %v852_v29 = vld [vmem:[%s2802_s18 + $0x266] sm:$0x1]  ;;  %v853_v30 = vld [vmem:[%s2802_s18 + $0x26e] sm:$0x1] }
  0x40   : > { %v854_v35 = vld [vmem:[%s2802_s18 + $0x276] sm:$0x1]  ;;  %v855_v36 = vld [vmem:[%s2802_s18 + $0x27e] sm:$0x1]  ;;  %v944_v37 = vld [vmem:[%s2802_s18 + $0x247] sm:$0x1] }
  0x41   : > { %v2038_v42 = vld [vmem:[#allocation2 + $0x30] sm:$0xff]  ;;  %v945_v43 = vld [vmem:[%s2802_s18 + $0x24f] sm:$0x1]  ;;  %v1328_v48 = vadd.f32 %v944_v37, %v848_v22  ;;  %v947_v49 = vld [vmem:[%s2802_s18 + $0x25f] sm:$0x1] }
  0x42   : > { %v946_v44 = vld [vmem:[%s2802_s18 + $0x257] sm:$0x1]  ;;  %2456 = vmatmul.msk.f32.vlgmr.msra.gmra.mxu2 %vm2019_vm7, %v2038_v42  ;;  %v948_v50 = vld [vmem:[%s2802_s18 + $0x267] sm:$0x1]  ;;  %v949_v51 = vld [vmem:[%s2802_s18 + $0x26f] sm:$0x1]  ;;  %v1329_v54 = vadd.f32 %v945_v43, %v849_v23  ;;  %v1331_v58 = vadd.f32 %v947_v49, %v851_v28 }
  0x43   : > { %v1330_v55 = vadd.f32 %v946_v44, %v850_v24  ;;  %v950_v56 = vld [vmem:[%s2802_s18 + $0x277] sm:$0x1]  ;;  %v951_v57 = vld [vmem:[%s2802_s18 + $0x27f] sm:$0x1]  ;;  %v1332_v59 = vadd.f32 %v948_v50, %v852_v29  ;;  %v1333_v60 = vadd.f32 %v949_v51, %v853_v30  ;;  %v1520_v61 = vadd.f32 %v1328_v48, %v1232_v31  ;;  %v200_v29 = vld [vmem:[%s2802_s18] sm:$0x1] }
  0x44   : > { %v1334_v62 = vadd.f32 %v950_v56, %v854_v35  ;;  %v1335_v63 = vadd.f32 %v951_v57, %v855_v36  ;;  %v1521_v0 = vadd.f32 %v1329_v54, %v1233_v38  ;;  %v1523_v2 = vadd.f32 %v1331_v58, %v1235_v45  ;;  %v296_v30 = vld [vmem:[%s2802_s18 + $0x1] sm:$0x1]  ;;  %v203_v35 = vld [vmem:[%s2802_s18 + $0x18] sm:$0x1]  ;;  %v297_v36 = vld [vmem:[%s2802_s18 + $0x9] sm:$0x1] }
  0x45   : > { %v1522_v1 = vadd.f32 %v1330_v55, %v1234_v39  ;;  %v1524_v3 = vadd.f32 %v1332_v59, %v1236_v46  ;;  %v1525_v4 = vadd.f32 %v1333_v60, %v1237_v47  ;;  %v1616_v5 = vadd.f32 %v1520_v61, %v1424_v25  ;;  %v298_v37 = vld [vmem:[%s2802_s18 + $0x11] sm:$0x1]  ;;  %v299_v38 = vld [vmem:[%s2802_s18 + $0x19] sm:$0x1]  ;;  %v300_v42 = vld [vmem:[%s2802_s18 + $0x21] sm:$0x1] }
  0x46   : > { %v1526_v6 = vadd.f32 %v1334_v62, %v1238_v52  ;;  %v1527_v7 = vadd.f32 %v1335_v63, %v1239_v53  ;;  %v1617_v8 = vadd.f32 %v1521_v0, %v1425_v26  ;;  %v1619_v10 = vadd.f32 %v1523_v2, %v1427_v32  ;;  %v392_v43 = vld [vmem:[%s2802_s18 + $0x2] sm:$0x1]  ;;  %v393_v44 = vld [vmem:[%s2802_s18 + $0xa] sm:$0x1]  ;;  %v394_v45 = vld [vmem:[%s2802_s18 + $0x12] sm:$0x1] }
  0x47   : > { %v1618_v9 = vadd.f32 %v1522_v1, %v1426_v27  ;;  %v1620_v11 = vadd.f32 %v1524_v3, %v1428_v33  ;;  %v1621_v12 = vadd.f32 %v1525_v4, %v1429_v34  ;;  %v1712_v13 = vmul.f32 0.125, %v1616_v5  ;;  %v201_v33 = vld [vmem:[%s2802_s18 + $0x8] sm:$0x1]  ;;  %v202_v34 = vld [vmem:[%s2802_s18 + $0x10] sm:$0x1] }
  0x48   : > { %v1622_v14 = vadd.f32 %v1526_v6, %v1430_v40  ;;  %v1623_v15 = vadd.f32 %v1527_v7, %v1431_v41  ;;  %v1713_v16 = vmul.f32 0.125, %v1617_v8  ;;  %v1715_v18 = vmul.f32 0.125, %v1619_v10  ;;  %v204_v41 = vld [vmem:[%s2802_s18 + $0x20] sm:$0x1]  ;;  %v205_v47 = vld [vmem:[%s2802_s18 + $0x28] sm:$0x1] }
  0x49   : > { %v1714_v17 = vmul.f32 0.125, %v1618_v9  ;;  %v1716_v19 = vmul.f32 0.125, %v1620_v11  ;;  %v1717_v20 = vmul.f32 0.125, %v1621_v12  ;;  %v301_v48 = vld [vmem:[%s2802_s18 + $0x29] sm:$0x1]  ;;  %v968_v1 = vadd.f32 %v296_v30, %v200_v29 }
  0x4a   : > { %v1718_v21 = vmul.f32 0.125, %v1622_v14  ;;  %v1719_v22 = vmul.f32 0.125, %v1623_v15  ;;  %v1965_v23 = vrot.slane %v1713_v16, 7  ;;  %v1969_v25 = vrot.slane %v1715_v18, 5  ;;  %v395_v49 = vld [vmem:[%s2802_s18 + $0x1a] sm:$0x1] }
  0x4b   : > { %v1967_v24 = vrot.slane %v1714_v17, 6  ;;  %v1971_v26 = vrot.slane %v1716_v19, 4  ;;  %v1973_v28 = vrot.slane %v1717_v20, 3  ;;  %v396_v50 = vld [vmem:[%s2802_s18 + $0x22] sm:$0x1]  ;;  %v969_v6 = vadd.f32 %v297_v36, %v201_v33 }
  0x4c   : > { %v1966_v27 = vsel %vm1833_vm0, %v1965_v23, %v1712_v13  ;;  %v1975_v32 = vrot.slane %v1718_v21, 2  ;;  %v1977_v40 = vrot.slane %v1719_v22, 1  ;;  %v397_v51 = vld [vmem:[%s2802_s18 + $0x2a] sm:$0x1]  ;;  %v206_v53 = vld [vmem:[%s2802_s18 + $0x30] sm:$0x1]  ;;  %v970_v7 = vadd.f32 %v298_v37, %v202_v34 }
  0x4d   : > { %v1968_v31 = vsel %vm1836_vm1, %v1967_v24, %v1966_v27  ;;  %v207_v54 = vld [vmem:[%s2802_s18 + $0x38] sm:$0x1]  ;;  %v302_v55 = vld [vmem:[%s2802_s18 + $0x31] sm:$0x1]  ;;  %v303_v56 = vld [vmem:[%s2802_s18 + $0x39] sm:$0x1]  ;;  %v971_v8 = vadd.f32 %v299_v38, %v203_v35  ;;  %v972_v10 = vadd.f32 %v300_v42, %v204_v41  ;;  %v973_v18 = vadd.f32 %v301_v48, %v205_v47 }
  0x4e   : > { %v1970_v39 = vsel %vm1839_vm2, %v1969_v25, %v1968_v31  ;;  %v398_v57 = vld [vmem:[%s2802_s18 + $0x32] sm:$0x1]  ;;  %v488_v58 = vld [vmem:[%s2802_s18 + $0x3] sm:$0x1]  ;;  %v489_v59 = vld [vmem:[%s2802_s18 + $0xb] sm:$0x1]  ;;  %v975_v29 = vadd.f32 %v303_v56, %v207_v54 }
  0x4f   : > { %v1972_v46 = vsel %vm1842_vm3, %v1971_v26, %v1970_v39  ;;  %v490_v60 = vld [vmem:[%s2802_s18 + $0x13] sm:$0x1]  ;;  %v491_v62 = vld [vmem:[%s2802_s18 + $0x1b] sm:$0x1]  ;;  %v492_v63 = vld [vmem:[%s2802_s18 + $0x23] sm:$0x1]  ;;  %v1064_v11 = vadd.f32 %v488_v58, %v392_v43  ;;  %v1065_v12 = vadd.f32 %v489_v59, %v393_v44 }
  0x50   : > { %v1974_v52 = vsel %vm1845_vm4, %v1973_v28, %v1972_v46  ;;  %v493_v0 = vld [vmem:[%s2802_s18 + $0x2b] sm:$0x1]  ;;  %v399_v3 = vld [vmem:[%s2802_s18 + $0x3a] sm:$0x1]  ;;  %v494_v4 = vld [vmem:[%s2802_s18 + $0x33] sm:$0x1]  ;;  %v1066_v13 = vadd.f32 %v490_v60, %v394_v45  ;;  %v1067_v19 = vadd.f32 %v491_v62, %v395_v49  ;;  %v1068_v20 = vadd.f32 %v492_v63, %v396_v50 }
  0x51   : > { %v1976_v61 = vsel %vm1848_vm5, %v1975_v32, %v1974_v52  ;;  %v495_v5 = vld [vmem:[%s2802_s18 + $0x3b] sm:$0x1]  ;;  %v584_v9 = vld [vmem:[%s2802_s18 + $0x4] sm:$0x1]  ;;  %v585_v14 = vld [vmem:[%s2802_s18 + $0xc] sm:$0x1]  ;;  %v1069_v21 = vadd.f32 %v493_v0, %v397_v51  ;;  %v974_v28 = vadd.f32 %v302_v55, %v206_v53  ;;  %v1070_v30 = vadd.f32 %v494_v4, %v398_v57 }
  0x52   : > { %v1978_v2 = vsel %vm1851_vm6, %v1977_v40, %v1976_v61  ;;  %v586_v15 = vld [vmem:[%s2802_s18 + $0x14] sm:$0x1]  ;;  %v680_v16 = vld [vmem:[%s2802_s18 + $0x5] sm:$0x1]  ;;  %v681_v17 = vld [vmem:[%s2802_s18 + $0xd] sm:$0x1]  ;;  %v1071_v31 = vadd.f32 %v495_v5, %v399_v3  ;;  %v1352_v40 = vadd.f32 %v1064_v11, %v968_v1  ;;  %v1353_v41 = vadd.f32 %v1065_v12, %v969_v6 }
  0x53   : > { %2029 = vst.msk [vmem:[#allocation2 + $0x48] sm:$0xff] %vm2019_vm7, %v1978_v2  ;;  %v587_v22 = vld [vmem:[%s2802_s18 + $0x1c] sm:$0x1]  ;;  %v588_v23 = vld [vmem:[%s2802_s18 + $0x24] sm:$0x1]  ;;  %v1354_v42 = vadd.f32 %v1066_v13, %v970_v7  ;;  %v1160_v46 = vadd.f32 %v680_v16, %v584_v9  ;;  %v1355_v47 = vadd.f32 %v1067_v19, %v971_v8  ;;  %v1356_v48 = vadd.f32 %v1068_v20, %v972_v10 }
  0x54   : > { %v589_v24 = vld [vmem:[%s2802_s18 + $0x2c] sm:$0x1]  ;;  %v682_v25 = vld [vmem:[%s2802_s18 + $0x15] sm:$0x1]  ;;  %v683_v26 = vld [vmem:[%s2802_s18 + $0x1d] sm:$0x1]  ;;  %v1357_v49 = vadd.f32 %v1069_v21, %v973_v18  ;;  %v1161_v53 = vadd.f32 %v681_v17, %v585_v14  ;;  %v1358_v55 = vadd.f32 %v1070_v30, %v974_v28  ;;  %v1359_v56 = vadd.f32 %v1071_v31, %v975_v29 }
  0x55   : > { %v684_v27 = vld [vmem:[%s2802_s18 + $0x25] sm:$0x1]  ;;  %v590_v32 = vld [vmem:[%s2802_s18 + $0x34] sm:$0x1]  ;;  %v591_v33 = vld [vmem:[%s2802_s18 + $0x3c] sm:$0x1]  ;;  %v1162_v54 = vadd.f32 %v682_v25, %v586_v15  ;;  %v1163_v60 = vadd.f32 %v683_v26, %v587_v22 }
  0x56   : > { %v685_v34 = vld [vmem:[%s2802_s18 + $0x2d] sm:$0x1]  ;;  %v686_v35 = vld [vmem:[%s2802_s18 + $0x35] sm:$0x1]  ;;  %v687_v36 = vld [vmem:[%s2802_s18 + $0x3d] sm:$0x1]  ;;  %v1164_v61 = vadd.f32 %v684_v27, %v588_v23 }
  0x57   : > { %v776_v37 = vld [vmem:[%s2802_s18 + $0x6] sm:$0x1]  ;;  %v777_v38 = vld [vmem:[%s2802_s18 + $0xe] sm:$0x1]  ;;  %v778_v39 = vld [vmem:[%s2802_s18 + $0x16] sm:$0x1]  ;;  %v1165_v62 = vadd.f32 %v685_v34, %v589_v24  ;;  %v1166_v3 = vadd.f32 %v686_v35, %v590_v32  ;;  %v1167_v4 = vadd.f32 %v687_v36, %v591_v33 }
  0x58   : > { %v779_v43 = vld [vmem:[%s2802_s18 + $0x1e] sm:$0x1]  ;;  %v780_v44 = vld [vmem:[%s2802_s18 + $0x26] sm:$0x1]  ;;  %v781_v45 = vld [vmem:[%s2802_s18 + $0x2e] sm:$0x1] }
  0x59   : > { %v782_v50 = vld [vmem:[%s2802_s18 + $0x36] sm:$0x1]  ;;  %v783_v51 = vld [vmem:[%s2802_s18 + $0x3e] sm:$0x1]  ;;  %v872_v52 = vld [vmem:[%s2802_s18 + $0x7] sm:$0x1] }
  0x5a   : > { %v2041_v57 = vld [vmem:[#allocation2 + $0x48] sm:$0xff]  ;;  %v874_v59 = vld [vmem:[%s2802_s18 + $0x17] sm:$0x1]  ;;  %v1256_v63 = vadd.f32 %v872_v52, %v776_v37  ;;  %v875_v0 = vld [vmem:[%s2802_s18 + $0x1f] sm:$0x1] }
  0x5b   : > { %v873_v58 = vld [vmem:[%s2802_s18 + $0xf] sm:$0x1]  ;;  %2459 = vmatmul.msk.f32.vlgmr.msra.gmra.mxu3 %vm2019_vm7, %v2041_v57  ;;  %v876_v1 = vld [vmem:[%s2802_s18 + $0x27] sm:$0x1]  ;;  %v1258_v6 = vadd.f32 %v874_v59, %v778_v39  ;;  %v878_v7 = vld [vmem:[%s2802_s18 + $0x37] sm:$0x1]  ;;  %v1259_v9 = vadd.f32 %v875_v0, %v779_v43 }
  0x5c   : > { %v877_v2 = vld [vmem:[%s2802_s18 + $0x2f] sm:$0x1]  ;;  %v1257_v5 = vadd.f32 %v873_v58, %v777_v38  ;;  %v879_v8 = vld [vmem:[%s2802_s18 + $0x3f] sm:$0x1]  ;;  %v1260_v10 = vadd.f32 %v876_v1, %v780_v44  ;;  %v1448_v12 = vadd.f32 %v1256_v63, %v1160_v46  ;;  %v1262_v13 = vadd.f32 %v878_v7, %v782_v50  ;;  %v224_v44 = vld [vmem:[%s2802_s18 + $0xc0] sm:$0x1] }
  0x5d   : > { %v1261_v11 = vadd.f32 %v877_v2, %v781_v45  ;;  %v1263_v14 = vadd.f32 %v879_v8, %v783_v51  ;;  %v1450_v16 = vadd.f32 %v1258_v6, %v1162_v54  ;;  %v1451_v17 = vadd.f32 %v1259_v9, %v1163_v60  ;;  %v320_v45 = vld [vmem:[%s2802_s18 + $0xc1] sm:$0x1]  ;;  %v227_v50 = vld [vmem:[%s2802_s18 + $0xd8] sm:$0x1]  ;;  %v321_v51 = vld [vmem:[%s2802_s18 + $0xc9] sm:$0x1] }
  0x5e   : > { %v1449_v15 = vadd.f32 %v1257_v5, %v1161_v53  ;;  %v1452_v18 = vadd.f32 %v1260_v10, %v1164_v61  ;;  %v1544_v20 = vadd.f32 %v1448_v12, %v1352_v40  ;;  %v1454_v21 = vadd.f32 %v1262_v13, %v1166_v3  ;;  %v322_v52 = vld [vmem:[%s2802_s18 + $0xd1] sm:$0x1]  ;;  %v323_v53 = vld [vmem:[%s2802_s18 + $0xd9] sm:$0x1]  ;;  %v324_v57 = vld [vmem:[%s2802_s18 + $0xe1] sm:$0x1] }
  0x5f   : > { %v1453_v19 = vadd.f32 %v1261_v11, %v1165_v62  ;;  %v1455_v22 = vadd.f32 %v1263_v14, %v1167_v4  ;;  %v1546_v24 = vadd.f32 %v1450_v16, %v1354_v42  ;;  %v1547_v25 = vadd.f32 %v1451_v17, %v1355_v47  ;;  %v416_v58 = vld [vmem:[%s2802_s18 + $0xc2] sm:$0x1]  ;;  %v417_v59 = vld [vmem:[%s2802_s18 + $0xca] sm:$0x1]  ;;  %v418_v60 = vld [vmem:[%s2802_s18 + $0xd2] sm:$0x1] }
  0x60   : > { %v1545_v23 = vadd.f32 %v1449_v15, %v1353_v41  ;;  %v1548_v26 = vadd.f32 %v1452_v18, %v1356_v48  ;;  %v1640_v28 = vmul.f32 0.125, %v1544_v20  ;;  %v1550_v29 = vadd.f32 %v1454_v21, %v1358_v55  ;;  %v225_v48 = vld [vmem:[%s2802_s18 + $0xc8] sm:$0x1]  ;;  %v325_v63 = vld [vmem:[%s2802_s18 + $0xe9] sm:$0x1] }
  0x61   : > { %v1549_v27 = vadd.f32 %v1453_v19, %v1357_v49  ;;  %v1551_v30 = vadd.f32 %v1455_v22, %v1359_v56  ;;  %v1642_v32 = vmul.f32 0.125, %v1546_v24  ;;  %v1643_v33 = vmul.f32 0.125, %v1547_v25  ;;  %v226_v49 = vld [vmem:[%s2802_s18 + $0xd0] sm:$0x1]  ;;  %v228_v56 = vld [vmem:[%s2802_s18 + $0xe0] sm:$0x1] }
  0x62   : > { %v1641_v31 = vmul.f32 0.125, %v1545_v23  ;;  %v1644_v34 = vmul.f32 0.125, %v1548_v26  ;;  %v1646_v36 = vmul.f32 0.125, %v1550_v29  ;;  %v229_v62 = vld [vmem:[%s2802_s18 + $0xe8] sm:$0x1]  ;;  %v992_v16 = vadd.f32 %v320_v45, %v224_v44 }
  0x63   : > { %v1645_v35 = vmul.f32 0.125, %v1549_v27  ;;  %v1647_v37 = vmul.f32 0.125, %v1551_v30  ;;  %v1835_v39 = vrot.slane %v1642_v32, 6  ;;  %v1838_v40 = vrot.slane %v1643_v33, 5  ;;  %v419_v0 = vld [vmem:[%s2802_s18 + $0xda] sm:$0x1] }
  0x64   : > { %v1832_v38 = vrot.slane %v1641_v31, 7  ;;  %v1841_v41 = vrot.slane %v1644_v34, 4  ;;  %v1847_v47 = vrot.slane %v1646_v36, 2  ;;  %v420_v1 = vld [vmem:[%s2802_s18 + $0xe2] sm:$0x1]  ;;  %v993_v21 = vadd.f32 %v321_v51, %v225_v48 }
  0x65   : > { %v1844_v43 = vrot.slane %v1645_v35, 3  ;;  %v1850_v55 = vrot.slane %v1647_v37, 1  ;;  %v421_v2 = vld [vmem:[%s2802_s18 + $0xea] sm:$0x1]  ;;  %v230_v4 = vld [vmem:[%s2802_s18 + $0xf0] sm:$0x1]  ;;  %v994_v22 = vadd.f32 %v322_v52, %v226_v49  ;;  %v995_v23 = vadd.f32 %v323_v53, %v227_v50 }
  0x66   : > { %v1834_v42 = vsel %vm1833_vm0, %v1832_v38, %v1640_v28  ;;  %v231_v5 = vld [vmem:[%s2802_s18 + $0xf8] sm:$0x1]  ;;  %v326_v6 = vld [vmem:[%s2802_s18 + $0xf1] sm:$0x1]  ;;  %v327_v7 = vld [vmem:[%s2802_s18 + $0xf9] sm:$0x1]  ;;  %v996_v25 = vadd.f32 %v324_v57, %v228_v56  ;;  %v997_v33 = vadd.f32 %v325_v63, %v229_v62 }
  0x67   : > { %v1837_v46 = vsel %vm1836_vm1, %v1835_v39, %v1834_v42  ;;  %v422_v8 = vld [vmem:[%s2802_s18 + $0xf2] sm:$0x1]  ;;  %v512_v9 = vld [vmem:[%s2802_s18 + $0xc3] sm:$0x1]  ;;  %v513_v10 = vld [vmem:[%s2802_s18 + $0xcb] sm:$0x1]  ;;  %v999_v44 = vadd.f32 %v327_v7, %v231_v5 }
  0x68   : > { %v1840_v54 = vsel %vm1839_vm2, %v1838_v40, %v1837_v46  ;;  %v514_v11 = vld [vmem:[%s2802_s18 + $0xd3] sm:$0x1]  ;;  %v515_v13 = vld [vmem:[%s2802_s18 + $0xdb] sm:$0x1]  ;;  %v516_v14 = vld [vmem:[%s2802_s18 + $0xe3] sm:$0x1]  ;;  %v1088_v26 = vadd.f32 %v512_v9, %v416_v58  ;;  %v1089_v27 = vadd.f32 %v513_v10, %v417_v59 }
  0x69   : > { %v1843_v61 = vsel %vm1842_vm3, %v1841_v41, %v1840_v54  ;;  %v517_v15 = vld [vmem:[%s2802_s18 + $0xeb] sm:$0x1]  ;;  %v423_v18 = vld [vmem:[%s2802_s18 + $0xfa] sm:$0x1]  ;;  %v518_v19 = vld [vmem:[%s2802_s18 + $0xf3] sm:$0x1]  ;;  %v1090_v28 = vadd.f32 %v514_v11, %v418_v60  ;;  %v1091_v34 = vadd.f32 %v515_v13, %v419_v0  ;;  %v1092_v35 = vadd.f32 %v516_v14, %v420_v1 }
  0x6a   : > { %v1846_v3 = vsel %vm1845_vm4, %v1844_v43, %v1843_v61  ;;  %v519_v20 = vld [vmem:[%s2802_s18 + $0xfb] sm:$0x1]  ;;  %v608_v24 = vld [vmem:[%s2802_s18 + $0xc4] sm:$0x1]  ;;  %v609_v29 = vld [vmem:[%s2802_s18 + $0xcc] sm:$0x1]  ;;  %v1093_v36 = vadd.f32 %v517_v15, %v421_v2  ;;  %v998_v43 = vadd.f32 %v326_v6, %v230_v4  ;;  %v1094_v45 = vadd.f32 %v518_v19, %v422_v8 }
  0x6b   : > { %v1849_v12 = vsel %vm1848_vm5, %v1847_v47, %v1846_v3  ;;  %v610_v30 = vld [vmem:[%s2802_s18 + $0xd4] sm:$0x1]  ;;  %v704_v31 = vld [vmem:[%s2802_s18 + $0xc5] sm:$0x1]  ;;  %v705_v32 = vld [vmem:[%s2802_s18 + $0xcd] sm:$0x1]  ;;  %v1095_v46 = vadd.f32 %v519_v20, %v423_v18  ;;  %v1377_v56 = vadd.f32 %v1089_v27, %v993_v21  ;;  %v1378_v57 = vadd.f32 %v1090_v28, %v994_v22 }
  0x6c   : > { %v1852_v17 = vsel %vm1851_vm6, %v1850_v55, %v1849_v12  ;;  %v611_v37 = vld [vmem:[%s2802_s18 + $0xdc] sm:$0x1]  ;;  %v612_v38 = vld [vmem:[%s2802_s18 + $0xe4] sm:$0x1]  ;;  %v613_v39 = vld [vmem:[%s2802_s18 + $0xec] sm:$0x1]  ;;  %v1376_v55 = vadd.f32 %v1088_v26, %v992_v16  ;;  %v1184_v61 = vadd.f32 %v704_v31, %v608_v24  ;;  %v1379_v62 = vadd.f32 %v1091_v34, %v995_v23 }
  0x6d   : > { %2020 = vst.msk [vmem:[#allocation2] sm:$0xff] %vm2019_vm7, %v1852_v17  ;;  %v706_v40 = vld [vmem:[%s2802_s18 + $0xd5] sm:$0x1]  ;;  %v707_v41 = vld [vmem:[%s2802_s18 + $0xdd] sm:$0x1]  ;;  %v1380_v63 = vadd.f32 %v1092_v35, %v996_v25  ;;  %v1381_v0 = vadd.f32 %v1093_v36, %v997_v33  ;;  %v1185_v4 = vadd.f32 %v705_v32, %v609_v29  ;;  %v1382_v6 = vadd.f32 %v1094_v45, %v998_v43 }
  0x6e   : > { %v708_v42 = vld [vmem:[%s2802_s18 + $0xe5] sm:$0x1]  ;;  %v614_v47 = vld [vmem:[%s2802_s18 + $0xf4] sm:$0x1]  ;;  %v615_v48 = vld [vmem:[%s2802_s18 + $0xfc] sm:$0x1]  ;;  %v1186_v5 = vadd.f32 %v706_v40, %v610_v30  ;;  %v1383_v7 = vadd.f32 %v1095_v46, %v999_v44  ;;  %v1187_v11 = vadd.f32 %v707_v41, %v611_v37 }
  0x6f   : > { %v709_v49 = vld [vmem:[%s2802_s18 + $0xed] sm:$0x1]  ;;  %v710_v50 = vld [vmem:[%s2802_s18 + $0xf5] sm:$0x1]  ;;  %v711_v51 = vld [vmem:[%s2802_s18 + $0xfd] sm:$0x1]  ;;  %v1188_v12 = vadd.f32 %v708_v42, %v612_v38 }
  0x70   : > { %v800_v52 = vld [vmem:[%s2802_s18 + $0xc6] sm:$0x1]  ;;  %v801_v53 = vld [vmem:[%s2802_s18 + $0xce] sm:$0x1]  ;;  %v802_v54 = vld [vmem:[%s2802_s18 + $0xd6] sm:$0x1]  ;;  %v1189_v13 = vadd.f32 %v709_v49, %v613_v39  ;;  %v1190_v18 = vadd.f32 %v710_v50, %v614_v47  ;;  %v1191_v19 = vadd.f32 %v711_v51, %v615_v48 }
  0x71   : > { %v803_v58 = vld [vmem:[%s2802_s18 + $0xde] sm:$0x1]  ;;  %v804_v59 = vld [vmem:[%s2802_s18 + $0xe6] sm:$0x1]  ;;  %v805_v60 = vld [vmem:[%s2802_s18 + $0xee] sm:$0x1] }
  0x72   : > { %v806_v1 = vld [vmem:[%s2802_s18 + $0xf6] sm:$0x1]  ;;  %v807_v2 = vld [vmem:[%s2802_s18 + $0xfe] sm:$0x1]  ;;  %v896_v3 = vld [vmem:[%s2802_s18 + $0xc7] sm:$0x1] }
  0x73   : > { %v897_v9 = vld [vmem:[%s2802_s18 + $0xcf] sm:$0x1]  ;;  %v898_v10 = vld [vmem:[%s2802_s18 + $0xd7] sm:$0x1]  ;;  %v1280_v14 = vadd.f32 %v896_v3, %v800_v52  ;;  %v899_v15 = vld [vmem:[%s2802_s18 + $0xdf] sm:$0x1] }
  0x74   : > { %v2032_v8 = vld [vmem:[#allocation2] sm:$0xff]  ;;  %v901_v17 = vld [vmem:[%s2802_s18 + $0xef] sm:$0x1]  ;;  %v1281_v20 = vadd.f32 %v897_v9, %v801_v53  ;;  %v1282_v21 = vadd.f32 %v898_v10, %v802_v54  ;;  %v902_v22 = vld [vmem:[%s2802_s18 + $0xf7] sm:$0x1]  ;;  %v1283_v24 = vadd.f32 %v899_v15, %v803_v58 }
  0x75   : > { %2450 = vmatmul.msk.f32.vlgmr.msra.gmra.mxu0 %vm2019_vm7, %v2032_v8  ;;  %v900_v16 = vld [vmem:[%s2802_s18 + $0xe7] sm:$0x1]  ;;  %v903_v23 = vld [vmem:[%s2802_s18 + $0xff] sm:$0x1]  ;;  %v1285_v26 = vadd.f32 %v901_v17, %v805_v60  ;;  %v1472_v27 = vadd.f32 %v1280_v14, %v1184_v61  ;;  %v1286_v28 = vadd.f32 %v902_v22, %v806_v1  ;;  %v352_v60 = vld [vmem:[%s2802_s18 + $0x1c1] sm:$0x1] }
  0x76   : > { %v1284_v25 = vadd.f32 %v900_v16, %v804_v59  ;;  %v1287_v29 = vadd.f32 %v903_v23, %v807_v2  ;;  %v1473_v30 = vadd.f32 %v1281_v20, %v1185_v4  ;;  %v1474_v31 = vadd.f32 %v1282_v21, %v1186_v5  ;;  %v256_v59 = vld [vmem:[%s2802_s18 + $0x1c0] sm:$0x1]  ;;  %v259_v1 = vld [vmem:[%s2802_s18 + $0x1d8] sm:$0x1]  ;;  %v353_v2 = vld [vmem:[%s2802_s18 + $0x1c9] sm:$0x1] }
  0x77   : > { %v1475_v32 = vadd.f32 %v1283_v24, %v1187_v11  ;;  %v1477_v34 = vadd.f32 %v1285_v26, %v1189_v13  ;;  %v1568_v35 = vadd.f32 %v1472_v27, %v1376_v55  ;;  %v1478_v36 = vadd.f32 %v1286_v28, %v1190_v18  ;;  %v354_v3 = vld [vmem:[%s2802_s18 + $0x1d1] sm:$0x1]  ;;  %v355_v4 = vld [vmem:[%s2802_s18 + $0x1d9] sm:$0x1]  ;;  %v356_v8 = vld [vmem:[%s2802_s18 + $0x1e1] sm:$0x1] }
  0x78   : > { %v1476_v33 = vadd.f32 %v1284_v25, %v1188_v12  ;;  %v1479_v37 = vadd.f32 %v1287_v29, %v1191_v19  ;;  %v1569_v38 = vadd.f32 %v1473_v30, %v1377_v56  ;;  %v1570_v39 = vadd.f32 %v1474_v31, %v1378_v57  ;;  %v448_v9 = vld [vmem:[%s2802_s18 + $0x1c2] sm:$0x1]  ;;  %v449_v10 = vld [vmem:[%s2802_s18 + $0x1ca] sm:$0x1]  ;;  %v450_v11 = vld [vmem:[%s2802_s18 + $0x1d2] sm:$0x1] }
  0x79   : > { %v1571_v40 = vadd.f32 %v1475_v32, %v1379_v62  ;;  %v1573_v42 = vadd.f32 %v1477_v34, %v1381_v0  ;;  %v1664_v43 = vmul.f32 0.125, %v1568_v35  ;;  %v1574_v44 = vadd.f32 %v1478_v36, %v1382_v6  ;;  %v258_v0 = vld [vmem:[%s2802_s18 + $0x1d0] sm:$0x1]  ;;  %v261_v13 = vld [vmem:[%s2802_s18 + $0x1e8] sm:$0x1] }
  0x7a   : > { %v1572_v41 = vadd.f32 %v1476_v33, %v1380_v63  ;;  %v1575_v45 = vadd.f32 %v1479_v37, %v1383_v7  ;;  %v1665_v46 = vmul.f32 0.125, %v1569_v38  ;;  %v1666_v47 = vmul.f32 0.125, %v1570_v39  ;;  %v257_v63 = vld [vmem:[%s2802_s18 + $0x1c8] sm:$0x1]  ;;  %v260_v7 = vld [vmem:[%s2802_s18 + $0x1e0] sm:$0x1] }
  0x7b   : > { %v1667_v48 = vmul.f32 0.125, %v1571_v40  ;;  %v1669_v50 = vmul.f32 0.125, %v1573_v42  ;;  %v1670_v51 = vmul.f32 0.125, %v1574_v44  ;;  %v357_v14 = vld [vmem:[%s2802_s18 + $0x1e9] sm:$0x1]  ;;  %v1024_v31 = vadd.f32 %v352_v60, %v256_v59 }
  0x7c   : > { %v1668_v49 = vmul.f32 0.125, %v1572_v41  ;;  %v1671_v52 = vmul.f32 0.125, %v1575_v45  ;;  %v1881_v53 = vrot.slane %v1665_v46, 7  ;;  %v1883_v54 = vrot.slane %v1666_v47, 6  ;;  %v451_v15 = vld [vmem:[%s2802_s18 + $0x1da] sm:$0x1] }
  0x7d   : > { %v1885_v55 = vrot.slane %v1667_v48, 5  ;;  %v1889_v58 = vrot.slane %v1669_v50, 3  ;;  %v1891_v62 = vrot.slane %v1670_v51, 2  ;;  %v452_v16 = vld [vmem:[%s2802_s18 + $0x1e2] sm:$0x1]  ;;  %v1025_v36 = vadd.f32 %v353_v2, %v257_v63 }
  0x7e   : > { %v1887_v56 = vrot.slane %v1668_v49, 4  ;;  %v1882_v57 = vsel %vm1833_vm0, %v1881_v53, %v1664_v43  ;;  %v1893_v6 = vrot.slane %v1671_v52, 1  ;;  %v453_v17 = vld [vmem:[%s2802_s18 + $0x1ea] sm:$0x1]  ;;  %v262_v19 = vld [vmem:[%s2802_s18 + $0x1f0] sm:$0x1]  ;;  %v1026_v37 = vadd.f32 %v354_v3, %v258_v0 }
  0x7f   : > { %v1884_v61 = vsel %vm1836_vm1, %v1883_v54, %v1882_v57  ;;  %v263_v20 = vld [vmem:[%s2802_s18 + $0x1f8] sm:$0x1]  ;;  %v358_v21 = vld [vmem:[%s2802_s18 + $0x1f1] sm:$0x1]  ;;  %v359_v22 = vld [vmem:[%s2802_s18 + $0x1f9] sm:$0x1]  ;;  %v1027_v38 = vadd.f32 %v355_v4, %v259_v1  ;;  %v1028_v40 = vadd.f32 %v356_v8, %v260_v7  ;;  %v1029_v48 = vadd.f32 %v357_v14, %v261_v13 }
  0x80   : > { %v1886_v5 = vsel %vm1839_vm2, %v1885_v55, %v1884_v61  ;;  %v454_v23 = vld [vmem:[%s2802_s18 + $0x1f2] sm:$0x1]  ;;  %v544_v24 = vld [vmem:[%s2802_s18 + $0x1c3] sm:$0x1]  ;;  %v545_v25 = vld [vmem:[%s2802_s18 + $0x1cb] sm:$0x1]  ;;  %v1031_v59 = vadd.f32 %v359_v22, %v263_v20 }
  0x81   : > { %v1888_v12 = vsel %vm1842_vm3, %v1887_v56, %v1886_v5  ;;  %v546_v26 = vld [vmem:[%s2802_s18 + $0x1d3] sm:$0x1]  ;;  %v547_v28 = vld [vmem:[%s2802_s18 + $0x1db] sm:$0x1]  ;;  %v548_v29 = vld [vmem:[%s2802_s18 + $0x1e3] sm:$0x1]  ;;  %v1120_v41 = vadd.f32 %v544_v24, %v448_v9  ;;  %v1121_v42 = vadd.f32 %v545_v25, %v449_v10 }
  0x82   : > { %v1890_v18 = vsel %vm1845_vm4, %v1889_v58, %v1888_v12  ;;  %v549_v30 = vld [vmem:[%s2802_s18 + $0x1eb] sm:$0x1]  ;;  %v455_v33 = vld [vmem:[%s2802_s18 + $0x1fa] sm:$0x1]  ;;  %v550_v34 = vld [vmem:[%s2802_s18 + $0x1f3] sm:$0x1]  ;;  %v1122_v43 = vadd.f32 %v546_v26, %v450_v11  ;;  %v1123_v49 = vadd.f32 %v547_v28, %v451_v15  ;;  %v1124_v50 = vadd.f32 %v548_v29, %v452_v16 }
  0x83   : > { %v1892_v27 = vsel %vm1848_vm5, %v1891_v62, %v1890_v18  ;;  %v551_v35 = vld [vmem:[%s2802_s18 + $0x1fb] sm:$0x1]  ;;  %v640_v39 = vld [vmem:[%s2802_s18 + $0x1c4] sm:$0x1]  ;;  %v641_v44 = vld [vmem:[%s2802_s18 + $0x1cc] sm:$0x1]  ;;  %v1125_v51 = vadd.f32 %v549_v30, %v453_v17  ;;  %v1030_v58 = vadd.f32 %v358_v21, %v262_v19  ;;  %v1126_v60 = vadd.f32 %v550_v34, %v454_v23 }
  0x84   : > { %v1894_v32 = vsel %vm1851_vm6, %v1893_v6, %v1892_v27  ;;  %v642_v45 = vld [vmem:[%s2802_s18 + $0x1d4] sm:$0x1]  ;;  %v736_v46 = vld [vmem:[%s2802_s18 + $0x1c5] sm:$0x1]  ;;  %v737_v47 = vld [vmem:[%s2802_s18 + $0x1cd] sm:$0x1]  ;;  %v1127_v61 = vadd.f32 %v551_v35, %v455_v33  ;;  %v1408_v6 = vadd.f32 %v1120_v41, %v1024_v31  ;;  %v1409_v7 = vadd.f32 %v1121_v42, %v1025_v36 }
  0x85   : > { %2023 = vst.msk [vmem:[#allocation2 + $0x18] sm:$0xff] %vm2019_vm7, %v1894_v32  ;;  %v643_v52 = vld [vmem:[%s2802_s18 + $0x1dc] sm:$0x1]  ;;  %v644_v53 = vld [vmem:[%s2802_s18 + $0x1e4] sm:$0x1]  ;;  %v1410_v8 = vadd.f32 %v1122_v43, %v1026_v37  ;;  %v1216_v12 = vadd.f32 %v736_v46, %v640_v39  ;;  %v1411_v13 = vadd.f32 %v1123_v49, %v1027_v38  ;;  %v1412_v14 = vadd.f32 %v1124_v50, %v1028_v40 }
  0x86   : > { %v645_v54 = vld [vmem:[%s2802_s18 + $0x1ec] sm:$0x1]  ;;  %v738_v55 = vld [vmem:[%s2802_s18 + $0x1d5] sm:$0x1]  ;;  %v739_v56 = vld [vmem:[%s2802_s18 + $0x1dd] sm:$0x1]  ;;  %v1413_v15 = vadd.f32 %v1125_v51, %v1029_v48  ;;  %v1217_v19 = vadd.f32 %v737_v47, %v641_v44  ;;  %v1414_v21 = vadd.f32 %v1126_v60, %v1030_v58  ;;  %v1415_v22 = vadd.f32 %v1127_v61, %v1031_v59 }
  0x87   : > { %v740_v57 = vld [vmem:[%s2802_s18 + $0x1e5] sm:$0x1]  ;;  %v646_v62 = vld [vmem:[%s2802_s18 + $0x1f4] sm:$0x1]  ;;  %v647_v63 = vld [vmem:[%s2802_s18 + $0x1fc] sm:$0x1]  ;;  %v1218_v20 = vadd.f32 %v738_v55, %v642_v45  ;;  %v1219_v26 = vadd.f32 %v739_v56, %v643_v52 }
  0x88   : > { %v741_v0 = vld [vmem:[%s2802_s18 + $0x1ed] sm:$0x1]  ;;  %v742_v1 = vld [vmem:[%s2802_s18 + $0x1f5] sm:$0x1]  ;;  %v743_v2 = vld [vmem:[%s2802_s18 + $0x1fd] sm:$0x1]  ;;  %v1220_v27 = vadd.f32 %v740_v57, %v644_v53 }
  0x89   : > { %v832_v3 = vld [vmem:[%s2802_s18 + $0x1c6] sm:$0x1]  ;;  %v833_v4 = vld [vmem:[%s2802_s18 + $0x1ce] sm:$0x1]  ;;  %v834_v5 = vld [vmem:[%s2802_s18 + $0x1d6] sm:$0x1]  ;;  %v1221_v28 = vadd.f32 %v741_v0, %v645_v54  ;;  %v1222_v33 = vadd.f32 %v742_v1, %v646_v62  ;;  %v1223_v34 = vadd.f32 %v743_v2, %v647_v63 }
  0x8a   : > { %v835_v9 = vld [vmem:[%s2802_s18 + $0x1de] sm:$0x1]  ;;  %v836_v10 = vld [vmem:[%s2802_s18 + $0x1e6] sm:$0x1]  ;;  %v837_v11 = vld [vmem:[%s2802_s18 + $0x1ee] sm:$0x1] }
  0x8b   : > { %v838_v16 = vld [vmem:[%s2802_s18 + $0x1f6] sm:$0x1]  ;;  %v839_v17 = vld [vmem:[%s2802_s18 + $0x1fe] sm:$0x1]  ;;  %v928_v18 = vld [vmem:[%s2802_s18 + $0x1c7] sm:$0x1] }
  0x8c   : > { %v2035_v23 = vld [vmem:[#allocation2 + $0x18] sm:$0xff]  ;;  %v929_v24 = vld [vmem:[%s2802_s18 + $0x1cf] sm:$0x1]  ;;  %v930_v25 = vld [vmem:[%s2802_s18 + $0x1d7] sm:$0x1]  ;;  %v1312_v29 = vadd.f32 %v928_v18, %v832_v3 }
  0x8d   : > { %2453 = vmatmul.msk.f32.vlgmr.msra.gmra.mxu1 %vm2019_vm7, %v2035_v23  ;;  %v931_v30 = vld [vmem:[%s2802_s18 + $0x1df] sm:$0x1]  ;;  %v932_v31 = vld [vmem:[%s2802_s18 + $0x1e7] sm:$0x1]  ;;  %v933_v32 = vld [vmem:[%s2802_s18 + $0x1ef] sm:$0x1]  ;;  %v1313_v35 = vadd.f32 %v929_v24, %v833_v4  ;;  %v1314_v36 = vadd.f32 %v930_v25, %v834_v5 }
  0x8e   : > { %v934_v37 = vld [vmem:[%s2802_s18 + $0x1f7] sm:$0x1]  ;;  %v935_v38 = vld [vmem:[%s2802_s18 + $0x1ff] sm:$0x1]  ;;  %v1315_v39 = vadd.f32 %v931_v30, %v835_v9  ;;  %v1316_v40 = vadd.f32 %v932_v31, %v836_v10  ;;  %v1317_v41 = vadd.f32 %v933_v32, %v837_v11  ;;  %v1504_v42 = vadd.f32 %v1312_v29, %v1216_v12  ;;  %v280_v10 = vld [vmem:[%s2802_s18 + $0x280] sm:$0x1] }
  0x8f   : > { %v1318_v43 = vadd.f32 %v934_v37, %v838_v16  ;;  %v1319_v44 = vadd.f32 %v935_v38, %v839_v17  ;;  %v1505_v45 = vadd.f32 %v1313_v35, %v1217_v19  ;;  %v1506_v46 = vadd.f32 %v1314_v36, %v1218_v20  ;;  %v376_v11 = vld [vmem:[%s2802_s18 + $0x281] sm:$0x1]  ;;  %v283_v16 = vld [vmem:[%s2802_s18 + $0x298] sm:$0x1]  ;;  %v377_v17 = vld [vmem:[%s2802_s18 + $0x289] sm:$0x1] }
  0x90   : > { %v1507_v47 = vadd.f32 %v1315_v39, %v1219_v26  ;;  %v1508_v48 = vadd.f32 %v1316_v40, %v1220_v27  ;;  %v1509_v49 = vadd.f32 %v1317_v41, %v1221_v28  ;;  %v1600_v50 = vadd.f32 %v1504_v42, %v1408_v6  ;;  %v378_v18 = vld [vmem:[%s2802_s18 + $0x291] sm:$0x1]  ;;  %v379_v19 = vld [vmem:[%s2802_s18 + $0x299] sm:$0x1]  ;;  %v380_v23 = vld [vmem:[%s2802_s18 + $0x2a1] sm:$0x1] }
  0x91   : > { %v1510_v51 = vadd.f32 %v1318_v43, %v1222_v33  ;;  %v1511_v52 = vadd.f32 %v1319_v44, %v1223_v34  ;;  %v1601_v53 = vadd.f32 %v1505_v45, %v1409_v7  ;;  %v1602_v54 = vadd.f32 %v1506_v46, %v1410_v8  ;;  %v472_v24 = vld [vmem:[%s2802_s18 + $0x282] sm:$0x1]  ;;  %v473_v25 = vld [vmem:[%s2802_s18 + $0x28a] sm:$0x1]  ;;  %v474_v26 = vld [vmem:[%s2802_s18 + $0x292] sm:$0x1] }
  0x92   : > { %v1603_v55 = vadd.f32 %v1507_v47, %v1411_v13  ;;  %v1604_v56 = vadd.f32 %v1508_v48, %v1412_v14  ;;  %v1605_v57 = vadd.f32 %v1509_v49, %v1413_v15  ;;  %v1696_v58 = vmul.f32 0.125, %v1600_v50  ;;  %v281_v14 = vld [vmem:[%s2802_s18 + $0x288] sm:$0x1]  ;;  %v282_v15 = vld [vmem:[%s2802_s18 + $0x290] sm:$0x1] }
  0x93   : > { %v1606_v59 = vadd.f32 %v1510_v51, %v1414_v21  ;;  %v1607_v60 = vadd.f32 %v1511_v52, %v1415_v22  ;;  %v1697_v61 = vmul.f32 0.125, %v1601_v53  ;;  %v1698_v62 = vmul.f32 0.125, %v1602_v54  ;;  %v284_v22 = vld [vmem:[%s2802_s18 + $0x2a0] sm:$0x1]  ;;  %v285_v28 = vld [vmem:[%s2802_s18 + $0x2a8] sm:$0x1] }
  0x94   : > { %v1699_v63 = vmul.f32 0.125, %v1603_v55  ;;  %v1700_v0 = vmul.f32 0.125, %v1604_v56  ;;  %v1701_v1 = vmul.f32 0.125, %v1605_v57  ;;  %v381_v29 = vld [vmem:[%s2802_s18 + $0x2a9] sm:$0x1]  ;;  %v1048_v46 = vadd.f32 %v376_v11, %v280_v10 }
  0x95   : > { %v1702_v2 = vmul.f32 0.125, %v1606_v59  ;;  %v1703_v3 = vmul.f32 0.125, %v1607_v60  ;;  %v1937_v4 = vrot.slane %v1697_v61, 7  ;;  %v1939_v5 = vrot.slane %v1698_v62, 6  ;;  %v475_v30 = vld [vmem:[%s2802_s18 + $0x29a] sm:$0x1] }
  0x96   : > { %v1941_v6 = vrot.slane %v1699_v63, 5  ;;  %v1943_v7 = vrot.slane %v1700_v0, 4  ;;  %v1945_v9 = vrot.slane %v1701_v1, 3  ;;  %v476_v31 = vld [vmem:[%s2802_s18 + $0x2a2] sm:$0x1]  ;;  %v1049_v51 = vadd.f32 %v377_v17, %v281_v14 }
  0x97   : > { %v1938_v8 = vsel %vm1833_vm0, %v1937_v4, %v1696_v58  ;;  %v1947_v13 = vrot.slane %v1702_v2, 2  ;;  %v1949_v21 = vrot.slane %v1703_v3, 1  ;;  %v477_v32 = vld [vmem:[%s2802_s18 + $0x2aa] sm:$0x1]  ;;  %v286_v34 = vld [vmem:[%s2802_s18 + $0x2b0] sm:$0x1]  ;;  %v1050_v52 = vadd.f32 %v378_v18, %v282_v15 }
  0x98   : > { %v1940_v12 = vsel %vm1836_vm1, %v1939_v5, %v1938_v8  ;;  %v287_v35 = vld [vmem:[%s2802_s18 + $0x2b8] sm:$0x1]  ;;  %v382_v36 = vld [vmem:[%s2802_s18 + $0x2b1] sm:$0x1]  ;;  %v383_v37 = vld [vmem:[%s2802_s18 + $0x2b9] sm:$0x1]  ;;  %v1051_v53 = vadd.f32 %v379_v19, %v283_v16  ;;  %v1052_v55 = vadd.f32 %v380_v23, %v284_v22  ;;  %v1053_v63 = vadd.f32 %v381_v29, %v285_v28 }
  0x99   : > { %v1942_v20 = vsel %vm1839_vm2, %v1941_v6, %v1940_v12  ;;  %v478_v38 = vld [vmem:[%s2802_s18 + $0x2b2] sm:$0x1]  ;;  %v568_v39 = vld [vmem:[%s2802_s18 + $0x283] sm:$0x1]  ;;  %v569_v40 = vld [vmem:[%s2802_s18 + $0x28b] sm:$0x1]  ;;  %v1055_v10 = vadd.f32 %v383_v37, %v287_v35 }
  0x9a   : > { %v1944_v27 = vsel %vm1842_vm3, %v1943_v7, %v1942_v20  ;;  %v570_v41 = vld [vmem:[%s2802_s18 + $0x293] sm:$0x1]  ;;  %v571_v43 = vld [vmem:[%s2802_s18 + $0x29b] sm:$0x1]  ;;  %v572_v44 = vld [vmem:[%s2802_s18 + $0x2a3] sm:$0x1]  ;;  %v1144_v56 = vadd.f32 %v568_v39, %v472_v24  ;;  %v1145_v57 = vadd.f32 %v569_v40, %v473_v25 }
  0x9b   : > { %v1946_v33 = vsel %vm1845_vm4, %v1945_v9, %v1944_v27  ;;  %v573_v45 = vld [vmem:[%s2802_s18 + $0x2ab] sm:$0x1]  ;;  %v479_v48 = vld [vmem:[%s2802_s18 + $0x2ba] sm:$0x1]  ;;  %v574_v49 = vld [vmem:[%s2802_s18 + $0x2b3] sm:$0x1]  ;;  %v1146_v58 = vadd.f32 %v570_v41, %v474_v26  ;;  %v1147_v0 = vadd.f32 %v571_v43, %v475_v30  ;;  %v1148_v1 = vadd.f32 %v572_v44, %v476_v31 }
  0x9c   : > { %v1948_v42 = vsel %vm1848_vm5, %v1947_v13, %v1946_v33  ;;  %v575_v50 = vld [vmem:[%s2802_s18 + $0x2bb] sm:$0x1]  ;;  %v664_v54 = vld [vmem:[%s2802_s18 + $0x284] sm:$0x1]  ;;  %v665_v59 = vld [vmem:[%s2802_s18 + $0x28c] sm:$0x1]  ;;  %v1149_v2 = vadd.f32 %v573_v45, %v477_v32  ;;  %v1054_v9 = vadd.f32 %v382_v36, %v286_v34  ;;  %v1150_v11 = vadd.f32 %v574_v49, %v478_v38 }
  0x9d   : > { %v1950_v47 = vsel %vm1851_vm6, %v1949_v21, %v1948_v42  ;;  %v666_v60 = vld [vmem:[%s2802_s18 + $0x294] sm:$0x1]  ;;  %v760_v61 = vld [vmem:[%s2802_s18 + $0x285] sm:$0x1]  ;;  %v761_v62 = vld [vmem:[%s2802_s18 + $0x28d] sm:$0x1]  ;;  %v1151_v12 = vadd.f32 %v575_v50, %v479_v48  ;;  %v1432_v21 = vadd.f32 %v1144_v56, %v1048_v46  ;;  %v1433_v22 = vadd.f32 %v1145_v57, %v1049_v51 }
  0x9e   : > { %2027 = vst.msk [vmem:[#allocation2 + $0x38] sm:$0xff] %vm2019_vm7, %v1950_v47  ;;  %v667_v3 = vld [vmem:[%s2802_s18 + $0x29c] sm:$0x1]  ;;  %v668_v4 = vld [vmem:[%s2802_s18 + $0x2a4] sm:$0x1]  ;;  %v1434_v23 = vadd.f32 %v1146_v58, %v1050_v52  ;;  %v1240_v27 = vadd.f32 %v760_v61, %v664_v54  ;;  %v1435_v28 = vadd.f32 %v1147_v0, %v1051_v53  ;;  %v1436_v29 = vadd.f32 %v1148_v1, %v1052_v55 }
  0x9f   : > { %v669_v5 = vld [vmem:[%s2802_s18 + $0x2ac] sm:$0x1]  ;;  %v762_v6 = vld [vmem:[%s2802_s18 + $0x295] sm:$0x1]  ;;  %v763_v7 = vld [vmem:[%s2802_s18 + $0x29d] sm:$0x1]  ;;  %v1437_v30 = vadd.f32 %v1149_v2, %v1053_v63  ;;  %v1241_v34 = vadd.f32 %v761_v62, %v665_v59  ;;  %v1438_v36 = vadd.f32 %v1150_v11, %v1054_v9  ;;  %v1439_v37 = vadd.f32 %v1151_v12, %v1055_v10 }
  0xa0   : > { %v764_v8 = vld [vmem:[%s2802_s18 + $0x2a5] sm:$0x1]  ;;  %v670_v13 = vld [vmem:[%s2802_s18 + $0x2b4] sm:$0x1]  ;;  %v671_v14 = vld [vmem:[%s2802_s18 + $0x2bc] sm:$0x1]  ;;  %v1242_v35 = vadd.f32 %v762_v6, %v666_v60  ;;  %v1243_v41 = vadd.f32 %v763_v7, %v667_v3 }
  0xa1   : > { %v765_v15 = vld [vmem:[%s2802_s18 + $0x2ad] sm:$0x1]  ;;  %v766_v16 = vld [vmem:[%s2802_s18 + $0x2b5] sm:$0x1]  ;;  %v767_v17 = vld [vmem:[%s2802_s18 + $0x2bd] sm:$0x1]  ;;  %v1244_v42 = vadd.f32 %v764_v8, %v668_v4 }
  0xa2   : > { %v856_v18 = vld [vmem:[%s2802_s18 + $0x286] sm:$0x1]  ;;  %v857_v19 = vld [vmem:[%s2802_s18 + $0x28e] sm:$0x1]  ;;  %v858_v20 = vld [vmem:[%s2802_s18 + $0x296] sm:$0x1]  ;;  %v1245_v43 = vadd.f32 %v765_v15, %v669_v5  ;;  %v1246_v48 = vadd.f32 %v766_v16, %v670_v13  ;;  %v1247_v49 = vadd.f32 %v767_v17, %v671_v14 }
  0xa3   : > { %v859_v24 = vld [vmem:[%s2802_s18 + $0x29e] sm:$0x1]  ;;  %v860_v25 = vld [vmem:[%s2802_s18 + $0x2a6] sm:$0x1]  ;;  %v861_v26 = vld [vmem:[%s2802_s18 + $0x2ae] sm:$0x1] }
  0xa4   : > { %v862_v31 = vld [vmem:[%s2802_s18 + $0x2b6] sm:$0x1]  ;;  %v863_v32 = vld [vmem:[%s2802_s18 + $0x2be] sm:$0x1]  ;;  %v952_v33 = vld [vmem:[%s2802_s18 + $0x287] sm:$0x1] }
  0xa5   : > { %v2039_v38 = vld [vmem:[#allocation2 + $0x38] sm:$0xff]  ;;  %v953_v39 = vld [vmem:[%s2802_s18 + $0x28f] sm:$0x1]  ;;  %v954_v40 = vld [vmem:[%s2802_s18 + $0x297] sm:$0x1]  ;;  %v1336_v44 = vadd.f32 %v952_v33, %v856_v18 }
  0xa6   : > { %2457 = vmatmul.msk.f32.gmra.mxu2 %vm2019_vm7, %v2039_v38  ;;  %v955_v45 = vld [vmem:[%s2802_s18 + $0x29f] sm:$0x1]  ;;  %v956_v46 = vld [vmem:[%s2802_s18 + $0x2a7] sm:$0x1]  ;;  %v957_v47 = vld [vmem:[%s2802_s18 + $0x2af] sm:$0x1]  ;;  %v1337_v50 = vadd.f32 %v953_v39, %v857_v19  ;;  %v1338_v51 = vadd.f32 %v954_v40, %v858_v20 }
  0xa7   : > { %v958_v52 = vld [vmem:[%s2802_s18 + $0x2b7] sm:$0x1]  ;;  %v959_v53 = vld [vmem:[%s2802_s18 + $0x2bf] sm:$0x1]  ;;  %v1339_v54 = vadd.f32 %v955_v45, %v859_v24  ;;  %v1340_v55 = vadd.f32 %v956_v46, %v860_v25  ;;  %v1341_v56 = vadd.f32 %v957_v47, %v861_v26  ;;  %v1528_v57 = vadd.f32 %v1336_v44, %v1240_v27  ;;  %v208_v25 = vld [vmem:[%s2802_s18 + $0x40] sm:$0x1] }
  0xa8   : > { %v1342_v58 = vadd.f32 %v958_v52, %v862_v31  ;;  %v1343_v59 = vadd.f32 %v959_v53, %v863_v32  ;;  %v1529_v60 = vadd.f32 %v1337_v50, %v1241_v34  ;;  %v1530_v61 = vadd.f32 %v1338_v51, %v1242_v35  ;;  %v304_v26 = vld [vmem:[%s2802_s18 + $0x41] sm:$0x1]  ;;  %v211_v31 = vld [vmem:[%s2802_s18 + $0x58] sm:$0x1]  ;;  %v305_v32 = vld [vmem:[%s2802_s18 + $0x49] sm:$0x1] }
  0xa9   : > { %v1531_v62 = vadd.f32 %v1339_v54, %v1243_v41  ;;  %v1532_v63 = vadd.f32 %v1340_v55, %v1244_v42  ;;  %v1533_v0 = vadd.f32 %v1341_v56, %v1245_v43  ;;  %v1624_v1 = vadd.f32 %v1528_v57, %v1432_v21  ;;  %v306_v33 = vld [vmem:[%s2802_s18 + $0x51] sm:$0x1]  ;;  %v307_v34 = vld [vmem:[%s2802_s18 + $0x59] sm:$0x1]  ;;  %v308_v38 = vld [vmem:[%s2802_s18 + $0x61] sm:$0x1] }
  0xaa   : > { %v1534_v2 = vadd.f32 %v1342_v58, %v1246_v48  ;;  %v1535_v3 = vadd.f32 %v1343_v59, %v1247_v49  ;;  %v1625_v4 = vadd.f32 %v1529_v60, %v1433_v22  ;;  %v1626_v5 = vadd.f32 %v1530_v61, %v1434_v23  ;;  %v400_v39 = vld [vmem:[%s2802_s18 + $0x42] sm:$0x1]  ;;  %v401_v40 = vld [vmem:[%s2802_s18 + $0x4a] sm:$0x1]  ;;  %v402_v41 = vld [vmem:[%s2802_s18 + $0x52] sm:$0x1] }
  0xab   : > { %v1627_v6 = vadd.f32 %v1531_v62, %v1435_v28  ;;  %v1628_v7 = vadd.f32 %v1532_v63, %v1436_v29  ;;  %v1629_v8 = vadd.f32 %v1533_v0, %v1437_v30  ;;  %v1720_v9 = vmul.f32 0.125, %v1624_v1  ;;  %v209_v29 = vld [vmem:[%s2802_s18 + $0x48] sm:$0x1]  ;;  %v210_v30 = vld [vmem:[%s2802_s18 + $0x50] sm:$0x1] }
  0xac   : > { %v1630_v10 = vadd.f32 %v1534_v2, %v1438_v36  ;;  %v1631_v11 = vadd.f32 %v1535_v3, %v1439_v37  ;;  %v1721_v12 = vmul.f32 0.125, %v1625_v4  ;;  %v1722_v13 = vmul.f32 0.125, %v1626_v5  ;;  %v212_v37 = vld [vmem:[%s2802_s18 + $0x60] sm:$0x1]  ;;  %v213_v43 = vld [vmem:[%s2802_s18 + $0x68] sm:$0x1] }
  0xad   : > { %v1723_v14 = vmul.f32 0.125, %v1627_v6  ;;  %v1724_v15 = vmul.f32 0.125, %v1628_v7  ;;  %v1725_v16 = vmul.f32 0.125, %v1629_v8  ;;  %v309_v44 = vld [vmem:[%s2802_s18 + $0x69] sm:$0x1]  ;;  %v976_v61 = vadd.f32 %v304_v26, %v208_v25 }
  0xae   : > { %v1726_v17 = vmul.f32 0.125, %v1630_v10  ;;  %v1727_v18 = vmul.f32 0.125, %v1631_v11  ;;  %v1979_v19 = vrot.slane %v1721_v12, 7  ;;  %v1981_v20 = vrot.slane %v1722_v13, 6  ;;  %v403_v45 = vld [vmem:[%s2802_s18 + $0x5a] sm:$0x1] }
  0xaf   : > { %v1983_v21 = vrot.slane %v1723_v14, 5  ;;  %v1985_v22 = vrot.slane %v1724_v15, 4  ;;  %v1987_v24 = vrot.slane %v1725_v16, 3  ;;  %v404_v46 = vld [vmem:[%s2802_s18 + $0x62] sm:$0x1]  ;;  %v977_v2 = vadd.f32 %v305_v32, %v209_v29 }
  0xb0   : > { %v1980_v23 = vsel %vm1833_vm0, %v1979_v19, %v1720_v9  ;;  %v1989_v28 = vrot.slane %v1726_v17, 2  ;;  %v1991_v36 = vrot.slane %v1727_v18, 1  ;;  %v405_v47 = vld [vmem:[%s2802_s18 + $0x6a] sm:$0x1]  ;;  %v214_v49 = vld [vmem:[%s2802_s18 + $0x70] sm:$0x1]  ;;  %v978_v3 = vadd.f32 %v306_v33, %v210_v30 }
  0xb1   : > { %v1982_v27 = vsel %vm1836_vm1, %v1981_v20, %v1980_v23  ;;  %v215_v50 = vld [vmem:[%s2802_s18 + $0x78] sm:$0x1]  ;;  %v310_v51 = vld [vmem:[%s2802_s18 + $0x71] sm:$0x1]  ;;  %v311_v52 = vld [vmem:[%s2802_s18 + $0x79] sm:$0x1]  ;;  %v979_v4 = vadd.f32 %v307_v34, %v211_v31  ;;  %v980_v6 = vadd.f32 %v308_v38, %v212_v37  ;;  %v981_v14 = vadd.f32 %v309_v44, %v213_v43 }
  0xb2   : > { %v1984_v35 = vsel %vm1839_vm2, %v1983_v21, %v1982_v27  ;;  %v406_v53 = vld [vmem:[%s2802_s18 + $0x72] sm:$0x1]  ;;  %v496_v54 = vld [vmem:[%s2802_s18 + $0x43] sm:$0x1]  ;;  %v497_v55 = vld [vmem:[%s2802_s18 + $0x4b] sm:$0x1]  ;;  %v983_v25 = vadd.f32 %v311_v52, %v215_v50 }
  0xb3   : > { %v1986_v42 = vsel %vm1842_vm3, %v1985_v22, %v1984_v35  ;;  %v498_v56 = vld [vmem:[%s2802_s18 + $0x53] sm:$0x1]  ;;  %v499_v58 = vld [vmem:[%s2802_s18 + $0x5b] sm:$0x1]  ;;  %v500_v59 = vld [vmem:[%s2802_s18 + $0x63] sm:$0x1]  ;;  %v1072_v7 = vadd.f32 %v496_v54, %v400_v39  ;;  %v1073_v8 = vadd.f32 %v497_v55, %v401_v40 }
  0xb4   : > { %v1988_v48 = vsel %vm1845_vm4, %v1987_v24, %v1986_v42  ;;  %v501_v60 = vld [vmem:[%s2802_s18 + $0x6b] sm:$0x1]  ;;  %v407_v63 = vld [vmem:[%s2802_s18 + $0x7a] sm:$0x1]  ;;  %v502_v0 = vld [vmem:[%s2802_s18 + $0x73] sm:$0x1]  ;;  %v1074_v9 = vadd.f32 %v498_v56, %v402_v41  ;;  %v1075_v15 = vadd.f32 %v499_v58, %v403_v45  ;;  %v1076_v16 = vadd.f32 %v500_v59, %v404_v46 }
  0xb5   : > { %v1990_v57 = vsel %vm1848_vm5, %v1989_v28, %v1988_v48  ;;  %v503_v1 = vld [vmem:[%s2802_s18 + $0x7b] sm:$0x1]  ;;  %v592_v5 = vld [vmem:[%s2802_s18 + $0x44] sm:$0x1]  ;;  %v593_v10 = vld [vmem:[%s2802_s18 + $0x4c] sm:$0x1]  ;;  %v1077_v17 = vadd.f32 %v501_v60, %v405_v47  ;;  %v982_v24 = vadd.f32 %v310_v51, %v214_v49  ;;  %v1078_v26 = vadd.f32 %v502_v0, %v406_v53 }
  0xb6   : > { %v1992_v62 = vsel %vm1851_vm6, %v1991_v36, %v1990_v57  ;;  %v594_v11 = vld [vmem:[%s2802_s18 + $0x54] sm:$0x1]  ;;  %v688_v12 = vld [vmem:[%s2802_s18 + $0x45] sm:$0x1]  ;;  %v689_v13 = vld [vmem:[%s2802_s18 + $0x4d] sm:$0x1]  ;;  %v1079_v27 = vadd.f32 %v503_v1, %v407_v63  ;;  %v1360_v36 = vadd.f32 %v1072_v7, %v976_v61  ;;  %v1361_v37 = vadd.f32 %v1073_v8, %v977_v2 }
  0xb7   : > { %2030 = vst.msk [vmem:[#allocation2 + $0x50] sm:$0xff] %vm2019_vm7, %v1992_v62  ;;  %v595_v18 = vld [vmem:[%s2802_s18 + $0x5c] sm:$0x1]  ;;  %v596_v19 = vld [vmem:[%s2802_s18 + $0x64] sm:$0x1]  ;;  %v1362_v38 = vadd.f32 %v1074_v9, %v978_v3  ;;  %v1168_v42 = vadd.f32 %v688_v12, %v592_v5  ;;  %v1363_v43 = vadd.f32 %v1075_v15, %v979_v4  ;;  %v1364_v44 = vadd.f32 %v1076_v16, %v980_v6 }
  0xb8   : > { %v597_v20 = vld [vmem:[%s2802_s18 + $0x6c] sm:$0x1]  ;;  %v690_v21 = vld [vmem:[%s2802_s18 + $0x55] sm:$0x1]  ;;  %v691_v22 = vld [vmem:[%s2802_s18 + $0x5d] sm:$0x1]  ;;  %v1365_v45 = vadd.f32 %v1077_v17, %v981_v14  ;;  %v1169_v49 = vadd.f32 %v689_v13, %v593_v10  ;;  %v1366_v51 = vadd.f32 %v1078_v26, %v982_v24  ;;  %v1367_v52 = vadd.f32 %v1079_v27, %v983_v25 }
  0xb9   : > { %v692_v23 = vld [vmem:[%s2802_s18 + $0x65] sm:$0x1]  ;;  %v598_v28 = vld [vmem:[%s2802_s18 + $0x74] sm:$0x1]  ;;  %v599_v29 = vld [vmem:[%s2802_s18 + $0x7c] sm:$0x1]  ;;  %v1170_v50 = vadd.f32 %v690_v21, %v594_v11  ;;  %v1171_v56 = vadd.f32 %v691_v22, %v595_v18 }
  0xba   : > { %v693_v30 = vld [vmem:[%s2802_s18 + $0x6d] sm:$0x1]  ;;  %v694_v31 = vld [vmem:[%s2802_s18 + $0x75] sm:$0x1]  ;;  %v695_v32 = vld [vmem:[%s2802_s18 + $0x7d] sm:$0x1]  ;;  %v1172_v57 = vadd.f32 %v692_v23, %v596_v19 }
  0xbb   : > { %v784_v33 = vld [vmem:[%s2802_s18 + $0x46] sm:$0x1]  ;;  %v785_v34 = vld [vmem:[%s2802_s18 + $0x4e] sm:$0x1]  ;;  %v786_v35 = vld [vmem:[%s2802_s18 + $0x56] sm:$0x1]  ;;  %v1173_v58 = vadd.f32 %v693_v30, %v597_v20  ;;  %v1174_v63 = vadd.f32 %v694_v31, %v598_v28  ;;  %v1175_v0 = vadd.f32 %v695_v32, %v599_v29 }
  0xbc   : > { %v787_v39 = vld [vmem:[%s2802_s18 + $0x5e] sm:$0x1]  ;;  %v788_v40 = vld [vmem:[%s2802_s18 + $0x66] sm:$0x1]  ;;  %v789_v41 = vld [vmem:[%s2802_s18 + $0x6e] sm:$0x1] }
  0xbd   : > { %v790_v46 = vld [vmem:[%s2802_s18 + $0x76] sm:$0x1]  ;;  %v791_v47 = vld [vmem:[%s2802_s18 + $0x7e] sm:$0x1]  ;;  %v880_v48 = vld [vmem:[%s2802_s18 + $0x47] sm:$0x1] }
  0xbe   : > { %v2042_v53 = vld [vmem:[#allocation2 + $0x50] sm:$0xff]  ;;  %v881_v54 = vld [vmem:[%s2802_s18 + $0x4f] sm:$0x1]  ;;  %v1264_v59 = vadd.f32 %v880_v48, %v784_v33  ;;  %v883_v60 = vld [vmem:[%s2802_s18 + $0x5f] sm:$0x1] }
  0xbf   : > { %v882_v55 = vld [vmem:[%s2802_s18 + $0x57] sm:$0x1]  ;;  %2460 = vmatmul.msk.f32.gmra.mxu3 %vm2019_vm7, %v2042_v53  ;;  %v884_v61 = vld [vmem:[%s2802_s18 + $0x67] sm:$0x1]  ;;  %v885_v62 = vld [vmem:[%s2802_s18 + $0x6f] sm:$0x1]  ;;  %v1265_v1 = vadd.f32 %v881_v54, %v785_v34  ;;  %v1267_v5 = vadd.f32 %v883_v60, %v787_v39 }
  0xc0   : > { %v1266_v2 = vadd.f32 %v882_v55, %v786_v35  ;;  %v886_v3 = vld [vmem:[%s2802_s18 + $0x77] sm:$0x1]  ;;  %v887_v4 = vld [vmem:[%s2802_s18 + $0x7f] sm:$0x1]  ;;  %v1268_v6 = vadd.f32 %v884_v61, %v788_v40  ;;  %v1269_v7 = vadd.f32 %v885_v62, %v789_v41  ;;  %v1456_v8 = vadd.f32 %v1264_v59, %v1168_v42  ;;  %v232_v40 = vld [vmem:[%s2802_s18 + $0x100] sm:$0x1] }
  0xc1   : > { %v1270_v9 = vadd.f32 %v886_v3, %v790_v46  ;;  %v1271_v10 = vadd.f32 %v887_v4, %v791_v47  ;;  %v1457_v11 = vadd.f32 %v1265_v1, %v1169_v49  ;;  %v1459_v13 = vadd.f32 %v1267_v5, %v1171_v56  ;;  %v328_v41 = vld [vmem:[%s2802_s18 + $0x101] sm:$0x1]  ;;  %v235_v46 = vld [vmem:[%s2802_s18 + $0x118] sm:$0x1]  ;;  %v329_v47 = vld [vmem:[%s2802_s18 + $0x109] sm:$0x1] }
  0xc2   : > { %v1458_v12 = vadd.f32 %v1266_v2, %v1170_v50  ;;  %v1460_v14 = vadd.f32 %v1268_v6, %v1172_v57  ;;  %v1461_v15 = vadd.f32 %v1269_v7, %v1173_v58  ;;  %v1552_v16 = vadd.f32 %v1456_v8, %v1360_v36  ;;  %v330_v48 = vld [vmem:[%s2802_s18 + $0x111] sm:$0x1]  ;;  %v331_v49 = vld [vmem:[%s2802_s18 + $0x119] sm:$0x1]  ;;  %v332_v53 = vld [vmem:[%s2802_s18 + $0x121] sm:$0x1] }
  0xc3   : > { %v1462_v17 = vadd.f32 %v1270_v9, %v1174_v63  ;;  %v1463_v18 = vadd.f32 %v1271_v10, %v1175_v0  ;;  %v1553_v19 = vadd.f32 %v1457_v11, %v1361_v37  ;;  %v1555_v21 = vadd.f32 %v1459_v13, %v1363_v43  ;;  %v424_v54 = vld [vmem:[%s2802_s18 + $0x102] sm:$0x1]  ;;  %v425_v55 = vld [vmem:[%s2802_s18 + $0x10a] sm:$0x1]  ;;  %v426_v56 = vld [vmem:[%s2802_s18 + $0x112] sm:$0x1] }
  0xc4   : > { %v1554_v20 = vadd.f32 %v1458_v12, %v1362_v38  ;;  %v1556_v22 = vadd.f32 %v1460_v14, %v1364_v44  ;;  %v1557_v23 = vadd.f32 %v1461_v15, %v1365_v45  ;;  %v1648_v24 = vmul.f32 0.125, %v1552_v16  ;;  %v233_v44 = vld [vmem:[%s2802_s18 + $0x108] sm:$0x1]  ;;  %v234_v45 = vld [vmem:[%s2802_s18 + $0x110] sm:$0x1] }
  0xc5   : > { %v1558_v25 = vadd.f32 %v1462_v17, %v1366_v51  ;;  %v1559_v26 = vadd.f32 %v1463_v18, %v1367_v52  ;;  %v1649_v27 = vmul.f32 0.125, %v1553_v19  ;;  %v1651_v29 = vmul.f32 0.125, %v1555_v21  ;;  %v236_v52 = vld [vmem:[%s2802_s18 + $0x120] sm:$0x1]  ;;  %v237_v58 = vld [vmem:[%s2802_s18 + $0x128] sm:$0x1] }
  0xc6   : > { %v1650_v28 = vmul.f32 0.125, %v1554_v20  ;;  %v1652_v30 = vmul.f32 0.125, %v1556_v22  ;;  %v1653_v31 = vmul.f32 0.125, %v1557_v23  ;;  %v333_v59 = vld [vmem:[%s2802_s18 + $0x129] sm:$0x1]  ;;  %v1000_v12 = vadd.f32 %v328_v41, %v232_v40 }
  0xc7   : > { %v1654_v32 = vmul.f32 0.125, %v1558_v25  ;;  %v1655_v33 = vmul.f32 0.125, %v1559_v26  ;;  %v1853_v34 = vrot.slane %v1649_v27, 7  ;;  %v1857_v36 = vrot.slane %v1651_v29, 5  ;;  %v427_v60 = vld [vmem:[%s2802_s18 + $0x11a] sm:$0x1] }
  0xc8   : > { %v1855_v35 = vrot.slane %v1650_v28, 6  ;;  %v1859_v37 = vrot.slane %v1652_v30, 4  ;;  %v1861_v39 = vrot.slane %v1653_v31, 3  ;;  %v428_v61 = vld [vmem:[%s2802_s18 + $0x122] sm:$0x1]  ;;  %v1001_v17 = vadd.f32 %v329_v47, %v233_v44 }
  0xc9   : > { %v1854_v38 = vsel %vm1833_vm0, %v1853_v34, %v1648_v24  ;;  %v1863_v43 = vrot.slane %v1654_v32, 2  ;;  %v1865_v51 = vrot.slane %v1655_v33, 1  ;;  %v429_v62 = vld [vmem:[%s2802_s18 + $0x12a] sm:$0x1]  ;;  %v238_v0 = vld [vmem:[%s2802_s18 + $0x130] sm:$0x1]  ;;  %v1002_v18 = vadd.f32 %v330_v48, %v234_v45 }
  0xca   : > { %v1856_v42 = vsel %vm1836_vm1, %v1855_v35, %v1854_v38  ;;  %v239_v1 = vld [vmem:[%s2802_s18 + $0x138] sm:$0x1]  ;;  %v334_v2 = vld [vmem:[%s2802_s18 + $0x131] sm:$0x1]  ;;  %v335_v3 = vld [vmem:[%s2802_s18 + $0x139] sm:$0x1]  ;;  %v1003_v19 = vadd.f32 %v331_v49, %v235_v46  ;;  %v1004_v21 = vadd.f32 %v332_v53, %v236_v52  ;;  %v1005_v29 = vadd.f32 %v333_v59, %v237_v58 }
  0xcb   : > { %v1858_v50 = vsel %vm1839_vm2, %v1857_v36, %v1856_v42  ;;  %v430_v4 = vld [vmem:[%s2802_s18 + $0x132] sm:$0x1]  ;;  %v520_v5 = vld [vmem:[%s2802_s18 + $0x103] sm:$0x1]  ;;  %v521_v6 = vld [vmem:[%s2802_s18 + $0x10b] sm:$0x1]  ;;  %v1007_v40 = vadd.f32 %v335_v3, %v239_v1 }
  0xcc   : > { %v1860_v57 = vsel %vm1842_vm3, %v1859_v37, %v1858_v50  ;;  %v522_v7 = vld [vmem:[%s2802_s18 + $0x113] sm:$0x1]  ;;  %v523_v9 = vld [vmem:[%s2802_s18 + $0x11b] sm:$0x1]  ;;  %v524_v10 = vld [vmem:[%s2802_s18 + $0x123] sm:$0x1]  ;;  %v1096_v22 = vadd.f32 %v520_v5, %v424_v54  ;;  %v1097_v23 = vadd.f32 %v521_v6, %v425_v55 }
  0xcd   : > { %v1862_v63 = vsel %vm1845_vm4, %v1861_v39, %v1860_v57  ;;  %v525_v11 = vld [vmem:[%s2802_s18 + $0x12b] sm:$0x1]  ;;  %v431_v14 = vld [vmem:[%s2802_s18 + $0x13a] sm:$0x1]  ;;  %v526_v15 = vld [vmem:[%s2802_s18 + $0x133] sm:$0x1]  ;;  %v1098_v24 = vadd.f32 %v522_v7, %v426_v56  ;;  %v1099_v30 = vadd.f32 %v523_v9, %v427_v60  ;;  %v1100_v31 = vadd.f32 %v524_v10, %v428_v61 }
  0xce   : > { %v1864_v8 = vsel %vm1848_vm5, %v1863_v43, %v1862_v63  ;;  %v527_v16 = vld [vmem:[%s2802_s18 + $0x13b] sm:$0x1]  ;;  %v616_v20 = vld [vmem:[%s2802_s18 + $0x104] sm:$0x1]  ;;  %v617_v25 = vld [vmem:[%s2802_s18 + $0x10c] sm:$0x1]  ;;  %v1101_v32 = vadd.f32 %v525_v11, %v429_v62  ;;  %v1006_v39 = vadd.f32 %v334_v2, %v238_v0  ;;  %v1102_v41 = vadd.f32 %v526_v15, %v430_v4 }
  0xcf   : > { %v1866_v13 = vsel %vm1851_vm6, %v1865_v51, %v1864_v8  ;;  %v618_v26 = vld [vmem:[%s2802_s18 + $0x114] sm:$0x1]  ;;  %v712_v27 = vld [vmem:[%s2802_s18 + $0x105] sm:$0x1]  ;;  %v713_v28 = vld [vmem:[%s2802_s18 + $0x10d] sm:$0x1]  ;;  %v1103_v42 = vadd.f32 %v527_v16, %v431_v14  ;;  %v1384_v51 = vadd.f32 %v1096_v22, %v1000_v12  ;;  %v1385_v52 = vadd.f32 %v1097_v23, %v1001_v17 }
  0xd0   : > { %2021 = vst.msk [vmem:[#allocation2 + $0x8] sm:$0xff] %vm2019_vm7, %v1866_v13  ;;  %v619_v33 = vld [vmem:[%s2802_s18 + $0x11c] sm:$0x1]  ;;  %v620_v34 = vld [vmem:[%s2802_s18 + $0x124] sm:$0x1]  ;;  %v1386_v53 = vadd.f32 %v1098_v24, %v1002_v18  ;;  %v1192_v57 = vadd.f32 %v712_v27, %v616_v20  ;;  %v1387_v58 = vadd.f32 %v1099_v30, %v1003_v19  ;;  %v1388_v59 = vadd.f32 %v1100_v31, %v1004_v21 }
  0xd1   : > { %v621_v35 = vld [vmem:[%s2802_s18 + $0x12c] sm:$0x1]  ;;  %v714_v36 = vld [vmem:[%s2802_s18 + $0x115] sm:$0x1]  ;;  %v715_v37 = vld [vmem:[%s2802_s18 + $0x11d] sm:$0x1]  ;;  %v1389_v60 = vadd.f32 %v1101_v32, %v1005_v29  ;;  %v1193_v0 = vadd.f32 %v713_v28, %v617_v25  ;;  %v1390_v2 = vadd.f32 %v1102_v41, %v1006_v39  ;;  %v1391_v3 = vadd.f32 %v1103_v42, %v1007_v40 }
  0xd2   : > { %v716_v38 = vld [vmem:[%s2802_s18 + $0x125] sm:$0x1]  ;;  %v622_v43 = vld [vmem:[%s2802_s18 + $0x134] sm:$0x1]  ;;  %v623_v44 = vld [vmem:[%s2802_s18 + $0x13c] sm:$0x1]  ;;  %v1194_v1 = vadd.f32 %v714_v36, %v618_v26  ;;  %v1195_v7 = vadd.f32 %v715_v37, %v619_v33 }
  0xd3   : > { %v717_v45 = vld [vmem:[%s2802_s18 + $0x12d] sm:$0x1]  ;;  %v718_v46 = vld [vmem:[%s2802_s18 + $0x135] sm:$0x1]  ;;  %v719_v47 = vld [vmem:[%s2802_s18 + $0x13d] sm:$0x1]  ;;  %v1196_v8 = vadd.f32 %v716_v38, %v620_v34 }
  0xd4   : > { %v808_v48 = vld [vmem:[%s2802_s18 + $0x106] sm:$0x1]  ;;  %v809_v49 = vld [vmem:[%s2802_s18 + $0x10e] sm:$0x1]  ;;  %v810_v50 = vld [vmem:[%s2802_s18 + $0x116] sm:$0x1]  ;;  %v1197_v9 = vadd.f32 %v717_v45, %v621_v35  ;;  %v1198_v14 = vadd.f32 %v718_v46, %v622_v43  ;;  %v1199_v15 = vadd.f32 %v719_v47, %v623_v44 }
  0xd5   : > { %v811_v54 = vld [vmem:[%s2802_s18 + $0x11e] sm:$0x1]  ;;  %v812_v55 = vld [vmem:[%s2802_s18 + $0x126] sm:$0x1]  ;;  %v813_v56 = vld [vmem:[%s2802_s18 + $0x12e] sm:$0x1] }
  0xd6   : > { %v814_v61 = vld [vmem:[%s2802_s18 + $0x136] sm:$0x1]  ;;  %v815_v62 = vld [vmem:[%s2802_s18 + $0x13e] sm:$0x1]  ;;  %v904_v63 = vld [vmem:[%s2802_s18 + $0x107] sm:$0x1] }
  0xd7   : > { %v2033_v4 = vld [vmem:[#allocation2 + $0x8] sm:$0xff]  ;;  %v906_v6 = vld [vmem:[%s2802_s18 + $0x117] sm:$0x1]  ;;  %v1288_v10 = vadd.f32 %v904_v63, %v808_v48  ;;  %v907_v11 = vld [vmem:[%s2802_s18 + $0x11f] sm:$0x1] }
  0xd8   : > { %v905_v5 = vld [vmem:[%s2802_s18 + $0x10f] sm:$0x1]  ;;  %2451 = vmatmul.msk.f32.gmra.mxu0 %vm2019_vm7, %v2033_v4  ;;  %v908_v12 = vld [vmem:[%s2802_s18 + $0x127] sm:$0x1]  ;;  %v1290_v17 = vadd.f32 %v906_v6, %v810_v50  ;;  %v910_v18 = vld [vmem:[%s2802_s18 + $0x137] sm:$0x1]  ;;  %v1291_v20 = vadd.f32 %v907_v11, %v811_v54 }
  0xd9   : > { %v909_v13 = vld [vmem:[%s2802_s18 + $0x12f] sm:$0x1]  ;;  %v1289_v16 = vadd.f32 %v905_v5, %v809_v49  ;;  %v911_v19 = vld [vmem:[%s2802_s18 + $0x13f] sm:$0x1]  ;;  %v1292_v21 = vadd.f32 %v908_v12, %v812_v55  ;;  %v1480_v23 = vadd.f32 %v1288_v10, %v1192_v57  ;;  %v1294_v24 = vadd.f32 %v910_v18, %v814_v61  ;;  %v264_v55 = vld [vmem:[%s2802_s18 + $0x200] sm:$0x1] }
  0xda   : > { %v1293_v22 = vadd.f32 %v909_v13, %v813_v56  ;;  %v1295_v25 = vadd.f32 %v911_v19, %v815_v62  ;;  %v1482_v27 = vadd.f32 %v1290_v17, %v1194_v1  ;;  %v1483_v28 = vadd.f32 %v1291_v20, %v1195_v7  ;;  %v360_v56 = vld [vmem:[%s2802_s18 + $0x201] sm:$0x1]  ;;  %v267_v61 = vld [vmem:[%s2802_s18 + $0x218] sm:$0x1]  ;;  %v361_v62 = vld [vmem:[%s2802_s18 + $0x209] sm:$0x1] }
  0xdb   : > { %v1481_v26 = vadd.f32 %v1289_v16, %v1193_v0  ;;  %v1484_v29 = vadd.f32 %v1292_v21, %v1196_v8  ;;  %v1576_v31 = vadd.f32 %v1480_v23, %v1384_v51  ;;  %v1486_v32 = vadd.f32 %v1294_v24, %v1198_v14  ;;  %v362_v63 = vld [vmem:[%s2802_s18 + $0x211] sm:$0x1]  ;;  %v363_v0 = vld [vmem:[%s2802_s18 + $0x219] sm:$0x1]  ;;  %v364_v4 = vld [vmem:[%s2802_s18 + $0x221] sm:$0x1] }
  0xdc   : > { %v1485_v30 = vadd.f32 %v1293_v22, %v1197_v9  ;;  %v1487_v33 = vadd.f32 %v1295_v25, %v1199_v15  ;;  %v1578_v35 = vadd.f32 %v1482_v27, %v1386_v53  ;;  %v1579_v36 = vadd.f32 %v1483_v28, %v1387_v58  ;;  %v456_v5 = vld [vmem:[%s2802_s18 + $0x202] sm:$0x1]  ;;  %v457_v6 = vld [vmem:[%s2802_s18 + $0x20a] sm:$0x1]  ;;  %v458_v7 = vld [vmem:[%s2802_s18 + $0x212] sm:$0x1] }
  0xdd   : > { %v1577_v34 = vadd.f32 %v1481_v26, %v1385_v52  ;;  %v1580_v37 = vadd.f32 %v1484_v29, %v1388_v59  ;;  %v1672_v39 = vmul.f32 0.125, %v1576_v31  ;;  %v1582_v40 = vadd.f32 %v1486_v32, %v1390_v2  ;;  %v265_v59 = vld [vmem:[%s2802_s18 + $0x208] sm:$0x1]  ;;  %v365_v10 = vld [vmem:[%s2802_s18 + $0x229] sm:$0x1] }
  0xde   : > { %v1581_v38 = vadd.f32 %v1485_v30, %v1389_v60  ;;  %v1583_v41 = vadd.f32 %v1487_v33, %v1391_v3  ;;  %v1674_v43 = vmul.f32 0.125, %v1578_v35  ;;  %v1675_v44 = vmul.f32 0.125, %v1579_v36  ;;  %v266_v60 = vld [vmem:[%s2802_s18 + $0x210] sm:$0x1]  ;;  %v268_v3 = vld [vmem:[%s2802_s18 + $0x220] sm:$0x1] }
  0xdf   : > { %v1673_v42 = vmul.f32 0.125, %v1577_v34  ;;  %v1676_v45 = vmul.f32 0.125, %v1580_v37  ;;  %v1678_v47 = vmul.f32 0.125, %v1582_v40  ;;  %v269_v9 = vld [vmem:[%s2802_s18 + $0x228] sm:$0x1]  ;;  %v1032_v27 = vadd.f32 %v360_v56, %v264_v55 }
  0xe0   : > { %v1677_v46 = vmul.f32 0.125, %v1581_v38  ;;  %v1679_v48 = vmul.f32 0.125, %v1583_v41  ;;  %v1897_v50 = vrot.slane %v1674_v43, 6  ;;  %v1899_v51 = vrot.slane %v1675_v44, 5  ;;  %v459_v11 = vld [vmem:[%s2802_s18 + $0x21a] sm:$0x1] }
  0xe1   : > { %v1895_v49 = vrot.slane %v1673_v42, 7  ;;  %v1901_v52 = vrot.slane %v1676_v45, 4  ;;  %v1905_v58 = vrot.slane %v1678_v47, 2  ;;  %v460_v12 = vld [vmem:[%s2802_s18 + $0x222] sm:$0x1]  ;;  %v1033_v32 = vadd.f32 %v361_v62, %v265_v59 }
  0xe2   : > { %v1903_v54 = vrot.slane %v1677_v46, 3  ;;  %v1907_v2 = vrot.slane %v1679_v48, 1  ;;  %v461_v13 = vld [vmem:[%s2802_s18 + $0x22a] sm:$0x1]  ;;  %v270_v15 = vld [vmem:[%s2802_s18 + $0x230] sm:$0x1]  ;;  %v1034_v33 = vadd.f32 %v362_v63, %v266_v60  ;;  %v1035_v34 = vadd.f32 %v363_v0, %v267_v61 }
  0xe3   : > { %v1896_v53 = vsel %vm1833_vm0, %v1895_v49, %v1672_v39  ;;  %v271_v16 = vld [vmem:[%s2802_s18 + $0x238] sm:$0x1]  ;;  %v366_v17 = vld [vmem:[%s2802_s18 + $0x231] sm:$0x1]  ;;  %v367_v18 = vld [vmem:[%s2802_s18 + $0x239] sm:$0x1]  ;;  %v1036_v36 = vadd.f32 %v364_v4, %v268_v3  ;;  %v1037_v44 = vadd.f32 %v365_v10, %v269_v9 }
  0xe4   : > { %v1898_v57 = vsel %vm1836_vm1, %v1897_v50, %v1896_v53  ;;  %v462_v19 = vld [vmem:[%s2802_s18 + $0x232] sm:$0x1]  ;;  %v552_v20 = vld [vmem:[%s2802_s18 + $0x203] sm:$0x1]  ;;  %v553_v21 = vld [vmem:[%s2802_s18 + $0x20b] sm:$0x1]  ;;  %v1039_v55 = vadd.f32 %v367_v18, %v271_v16 }
  0xe5   : > { %v1900_v1 = vsel %vm1839_vm2, %v1899_v51, %v1898_v57  ;;  %v554_v22 = vld [vmem:[%s2802_s18 + $0x213] sm:$0x1]  ;;  %v555_v24 = vld [vmem:[%s2802_s18 + $0x21b] sm:$0x1]  ;;  %v556_v25 = vld [vmem:[%s2802_s18 + $0x223] sm:$0x1]  ;;  %v1128_v37 = vadd.f32 %v552_v20, %v456_v5  ;;  %v1129_v38 = vadd.f32 %v553_v21, %v457_v6 }
  0xe6   : > { %v1902_v8 = vsel %vm1842_vm3, %v1901_v52, %v1900_v1  ;;  %v557_v26 = vld [vmem:[%s2802_s18 + $0x22b] sm:$0x1]  ;;  %v463_v29 = vld [vmem:[%s2802_s18 + $0x23a] sm:$0x1]  ;;  %v558_v30 = vld [vmem:[%s2802_s18 + $0x233] sm:$0x1]  ;;  %v1130_v39 = vadd.f32 %v554_v22, %v458_v7  ;;  %v1131_v45 = vadd.f32 %v555_v24, %v459_v11  ;;  %v1132_v46 = vadd.f32 %v556_v25, %v460_v12 }
  0xe7   : > { %v1904_v14 = vsel %vm1845_vm4, %v1903_v54, %v1902_v8  ;;  %v559_v31 = vld [vmem:[%s2802_s18 + $0x23b] sm:$0x1]  ;;  %v648_v35 = vld [vmem:[%s2802_s18 + $0x204] sm:$0x1]  ;;  %v649_v40 = vld [vmem:[%s2802_s18 + $0x20c] sm:$0x1]  ;;  %v1133_v47 = vadd.f32 %v557_v26, %v461_v13  ;;  %v1038_v54 = vadd.f32 %v366_v17, %v270_v15  ;;  %v1134_v56 = vadd.f32 %v558_v30, %v462_v19 }
  0xe8   : > { %v1906_v23 = vsel %vm1848_vm5, %v1905_v58, %v1904_v14  ;;  %v650_v41 = vld [vmem:[%s2802_s18 + $0x214] sm:$0x1]  ;;  %v744_v42 = vld [vmem:[%s2802_s18 + $0x205] sm:$0x1]  ;;  %v745_v43 = vld [vmem:[%s2802_s18 + $0x20d] sm:$0x1]  ;;  %v1135_v57 = vadd.f32 %v559_v31, %v463_v29  ;;  %v1417_v3 = vadd.f32 %v1129_v38, %v1033_v32  ;;  %v1418_v4 = vadd.f32 %v1130_v39, %v1034_v33 }
  0xe9   : > { %v1908_v28 = vsel %vm1851_vm6, %v1907_v2, %v1906_v23  ;;  %v651_v48 = vld [vmem:[%s2802_s18 + $0x21c] sm:$0x1]  ;;  %v652_v49 = vld [vmem:[%s2802_s18 + $0x224] sm:$0x1]  ;;  %v653_v50 = vld [vmem:[%s2802_s18 + $0x22c] sm:$0x1]  ;;  %v1416_v2 = vadd.f32 %v1128_v37, %v1032_v27  ;;  %v1224_v8 = vadd.f32 %v744_v42, %v648_v35  ;;  %v1419_v9 = vadd.f32 %v1131_v45, %v1035_v34 }
  0xea   : > { %2024 = vst.msk [vmem:[#allocation2 + $0x20] sm:$0xff] %vm2019_vm7, %v1908_v28  ;;  %v746_v51 = vld [vmem:[%s2802_s18 + $0x215] sm:$0x1]  ;;  %v747_v52 = vld [vmem:[%s2802_s18 + $0x21d] sm:$0x1]  ;;  %v1420_v10 = vadd.f32 %v1132_v46, %v1036_v36  ;;  %v1421_v11 = vadd.f32 %v1133_v47, %v1037_v44  ;;  %v1225_v15 = vadd.f32 %v745_v43, %v649_v40  ;;  %v1422_v17 = vadd.f32 %v1134_v56, %v1038_v54 }
  0xeb   : > { %v748_v53 = vld [vmem:[%s2802_s18 + $0x225] sm:$0x1]  ;;  %v654_v58 = vld [vmem:[%s2802_s18 + $0x234] sm:$0x1]  ;;  %v655_v59 = vld [vmem:[%s2802_s18 + $0x23c] sm:$0x1]  ;;  %v1226_v16 = vadd.f32 %v746_v51, %v650_v41  ;;  %v1423_v18 = vadd.f32 %v1135_v57, %v1039_v55  ;;  %v1227_v22 = vadd.f32 %v747_v52, %v651_v48 }
  0xec   : > { %v749_v60 = vld [vmem:[%s2802_s18 + $0x22d] sm:$0x1]  ;;  %v750_v61 = vld [vmem:[%s2802_s18 + $0x235] sm:$0x1]  ;;  %v751_v62 = vld [vmem:[%s2802_s18 + $0x23d] sm:$0x1]  ;;  %v1228_v23 = vadd.f32 %v748_v53, %v652_v49 }
  0xed   : > { %v840_v63 = vld [vmem:[%s2802_s18 + $0x206] sm:$0x1]  ;;  %v841_v0 = vld [vmem:[%s2802_s18 + $0x20e] sm:$0x1]  ;;  %v842_v1 = vld [vmem:[%s2802_s18 + $0x216] sm:$0x1]  ;;  %v1229_v24 = vadd.f32 %v749_v60, %v653_v50  ;;  %v1230_v29 = vadd.f32 %v750_v61, %v654_v58  ;;  %v1231_v30 = vadd.f32 %v751_v62, %v655_v59 }
  0xee   : > { %v843_v5 = vld [vmem:[%s2802_s18 + $0x21e] sm:$0x1]  ;;  %v844_v6 = vld [vmem:[%s2802_s18 + $0x226] sm:$0x1]  ;;  %v845_v7 = vld [vmem:[%s2802_s18 + $0x22e] sm:$0x1] }
  0xef   : > { %v846_v12 = vld [vmem:[%s2802_s18 + $0x236] sm:$0x1]  ;;  %v847_v13 = vld [vmem:[%s2802_s18 + $0x23e] sm:$0x1]  ;;  %v936_v14 = vld [vmem:[%s2802_s18 + $0x207] sm:$0x1] }
  0xf0   : > { %v937_v20 = vld [vmem:[%s2802_s18 + $0x20f] sm:$0x1]  ;;  %v938_v21 = vld [vmem:[%s2802_s18 + $0x217] sm:$0x1]  ;;  %v1320_v25 = vadd.f32 %v936_v14, %v840_v63  ;;  %v939_v26 = vld [vmem:[%s2802_s18 + $0x21f] sm:$0x1] }
  0xf1   : > { %v2036_v19 = vld [vmem:[#allocation2 + $0x20] sm:$0xff]  ;;  %v941_v28 = vld [vmem:[%s2802_s18 + $0x22f] sm:$0x1]  ;;  %v1321_v31 = vadd.f32 %v937_v20, %v841_v0  ;;  %v1322_v32 = vadd.f32 %v938_v21, %v842_v1  ;;  %v942_v33 = vld [vmem:[%s2802_s18 + $0x237] sm:$0x1]  ;;  %v1323_v35 = vadd.f32 %v939_v26, %v843_v5 }
  0xf2   : > { %2454 = vmatmul.msk.f32.gmra.mxu1 %vm2019_vm7, %v2036_v19  ;;  %v940_v27 = vld [vmem:[%s2802_s18 + $0x227] sm:$0x1]  ;;  %v943_v34 = vld [vmem:[%s2802_s18 + $0x23f] sm:$0x1]  ;;  %v1325_v37 = vadd.f32 %v941_v28, %v845_v7  ;;  %v1512_v38 = vadd.f32 %v1320_v25, %v1224_v8  ;;  %v1326_v39 = vadd.f32 %v942_v33, %v846_v12  ;;  %v384_v7 = vld [vmem:[%s2802_s18 + $0x2c1] sm:$0x1] }
  0xf3   : > { %v1324_v36 = vadd.f32 %v940_v27, %v844_v6  ;;  %v1327_v40 = vadd.f32 %v943_v34, %v847_v13  ;;  %v1513_v41 = vadd.f32 %v1321_v31, %v1225_v15  ;;  %v1514_v42 = vadd.f32 %v1322_v32, %v1226_v16  ;;  %v288_v6 = vld [vmem:[%s2802_s18 + $0x2c0] sm:$0x1]  ;;  %v291_v12 = vld [vmem:[%s2802_s18 + $0x2d8] sm:$0x1]  ;;  %v385_v13 = vld [vmem:[%s2802_s18 + $0x2c9] sm:$0x1] }
  0xf4   : > { %v1515_v43 = vadd.f32 %v1323_v35, %v1227_v22  ;;  %v1517_v45 = vadd.f32 %v1325_v37, %v1229_v24  ;;  %v1608_v46 = vadd.f32 %v1512_v38, %v1416_v2  ;;  %v1518_v47 = vadd.f32 %v1326_v39, %v1230_v29  ;;  %v386_v14 = vld [vmem:[%s2802_s18 + $0x2d1] sm:$0x1]  ;;  %v387_v15 = vld [vmem:[%s2802_s18 + $0x2d9] sm:$0x1]  ;;  %v388_v19 = vld [vmem:[%s2802_s18 + $0x2e1] sm:$0x1] }
  0xf5   : > { %v1516_v44 = vadd.f32 %v1324_v36, %v1228_v23  ;;  %v1519_v48 = vadd.f32 %v1327_v40, %v1231_v30  ;;  %v1609_v49 = vadd.f32 %v1513_v41, %v1417_v3  ;;  %v1610_v50 = vadd.f32 %v1514_v42, %v1418_v4  ;;  %v480_v20 = vld [vmem:[%s2802_s18 + $0x2c2] sm:$0x1]  ;;  %v481_v21 = vld [vmem:[%s2802_s18 + $0x2ca] sm:$0x1]  ;;  %v482_v22 = vld [vmem:[%s2802_s18 + $0x2d2] sm:$0x1] }
  0xf6   : > { %v1611_v51 = vadd.f32 %v1515_v43, %v1419_v9  ;;  %v1613_v53 = vadd.f32 %v1517_v45, %v1421_v11  ;;  %v1704_v54 = vmul.f32 0.125, %v1608_v46  ;;  %v1614_v55 = vadd.f32 %v1518_v47, %v1422_v17  ;;  %v290_v11 = vld [vmem:[%s2802_s18 + $0x2d0] sm:$0x1]  ;;  %v293_v24 = vld [vmem:[%s2802_s18 + $0x2e8] sm:$0x1] }
  0xf7   : > { %v1612_v52 = vadd.f32 %v1516_v44, %v1420_v10  ;;  %v1615_v56 = vadd.f32 %v1519_v48, %v1423_v18  ;;  %v1705_v57 = vmul.f32 0.125, %v1609_v49  ;;  %v1706_v58 = vmul.f32 0.125, %v1610_v50  ;;  %v289_v10 = vld [vmem:[%s2802_s18 + $0x2c8] sm:$0x1]  ;;  %v292_v18 = vld [vmem:[%s2802_s18 + $0x2e0] sm:$0x1] }
  0xf8   : > { %v1707_v59 = vmul.f32 0.125, %v1611_v51  ;;  %v1709_v61 = vmul.f32 0.125, %v1613_v53  ;;  %v1710_v62 = vmul.f32 0.125, %v1614_v55  ;;  %v389_v25 = vld [vmem:[%s2802_s18 + $0x2e9] sm:$0x1]  ;;  %v1056_v42 = vadd.f32 %v384_v7, %v288_v6 }
  0xf9   : > { %v1708_v60 = vmul.f32 0.125, %v1612_v52  ;;  %v1711_v63 = vmul.f32 0.125, %v1615_v56  ;;  %v1951_v0 = vrot.slane %v1705_v57, 7  ;;  %v1953_v1 = vrot.slane %v1706_v58, 6  ;;  %v483_v26 = vld [vmem:[%s2802_s18 + $0x2da] sm:$0x1] }
  0xfa   : > { %v1955_v2 = vrot.slane %v1707_v59, 5  ;;  %v1959_v5 = vrot.slane %v1709_v61, 3  ;;  %v1961_v9 = vrot.slane %v1710_v62, 2  ;;  %v484_v27 = vld [vmem:[%s2802_s18 + $0x2e2] sm:$0x1]  ;;  %v1057_v47 = vadd.f32 %v385_v13, %v289_v10 }
  0xfb   : > { %v1957_v3 = vrot.slane %v1708_v60, 4  ;;  %v1952_v4 = vsel %vm1833_vm0, %v1951_v0, %v1704_v54  ;;  %v1963_v17 = vrot.slane %v1711_v63, 1  ;;  %v485_v28 = vld [vmem:[%s2802_s18 + $0x2ea] sm:$0x1]  ;;  %v294_v30 = vld [vmem:[%s2802_s18 + $0x2f0] sm:$0x1]  ;;  %v1058_v48 = vadd.f32 %v386_v14, %v290_v11 }
  0xfc   : > { %v1954_v8 = vsel %vm1836_vm1, %v1953_v1, %v1952_v4  ;;  %v295_v31 = vld [vmem:[%s2802_s18 + $0x2f8] sm:$0x1]  ;;  %v390_v32 = vld [vmem:[%s2802_s18 + $0x2f1] sm:$0x1]  ;;  %v391_v33 = vld [vmem:[%s2802_s18 + $0x2f9] sm:$0x1]  ;;  %v1059_v49 = vadd.f32 %v387_v15, %v291_v12  ;;  %v1060_v51 = vadd.f32 %v388_v19, %v292_v18  ;;  %v1061_v59 = vadd.f32 %v389_v25, %v293_v24 }
  0xfd   : > { %v1956_v16 = vsel %vm1839_vm2, %v1955_v2, %v1954_v8  ;;  %v486_v34 = vld [vmem:[%s2802_s18 + $0x2f2] sm:$0x1]  ;;  %v576_v35 = vld [vmem:[%s2802_s18 + $0x2c3] sm:$0x1]  ;;  %v577_v36 = vld [vmem:[%s2802_s18 + $0x2cb] sm:$0x1]  ;;  %v1063_v6 = vadd.f32 %v391_v33, %v295_v31 }
  0xfe   : > { %v1958_v23 = vsel %vm1842_vm3, %v1957_v3, %v1956_v16  ;;  %v578_v37 = vld [vmem:[%s2802_s18 + $0x2d3] sm:$0x1]  ;;  %v579_v39 = vld [vmem:[%s2802_s18 + $0x2db] sm:$0x1]  ;;  %v580_v40 = vld [vmem:[%s2802_s18 + $0x2e3] sm:$0x1]  ;;  %v1152_v52 = vadd.f32 %v576_v35, %v480_v20  ;;  %v1153_v53 = vadd.f32 %v577_v36, %v481_v21 }
  0xff   : > { %v1960_v29 = vsel %vm1845_vm4, %v1959_v5, %v1958_v23  ;;  %v581_v41 = vld [vmem:[%s2802_s18 + $0x2eb] sm:$0x1]  ;;  %v487_v44 = vld [vmem:[%s2802_s18 + $0x2fa] sm:$0x1]  ;;  %v582_v45 = vld [vmem:[%s2802_s18 + $0x2f3] sm:$0x1]  ;;  %v1154_v54 = vadd.f32 %v578_v37, %v482_v22  ;;  %v1155_v60 = vadd.f32 %v579_v39, %v483_v26  ;;  %v1156_v61 = vadd.f32 %v580_v40, %v484_v27 }
 0x100   : > { %v1962_v38 = vsel %vm1848_vm5, %v1961_v9, %v1960_v29  ;;  %v583_v46 = vld [vmem:[%s2802_s18 + $0x2fb] sm:$0x1]  ;;  %v672_v50 = vld [vmem:[%s2802_s18 + $0x2c4] sm:$0x1]  ;;  %v673_v55 = vld [vmem:[%s2802_s18 + $0x2cc] sm:$0x1]  ;;  %v1157_v62 = vadd.f32 %v581_v41, %v485_v28  ;;  %v1062_v5 = vadd.f32 %v390_v32, %v294_v30  ;;  %v1158_v7 = vadd.f32 %v582_v45, %v486_v34 }
 0x101   : > { %v1964_v43 = vsel %vm1851_vm6, %v1963_v17, %v1962_v38  ;;  %v674_v56 = vld [vmem:[%s2802_s18 + $0x2d4] sm:$0x1]  ;;  %v768_v57 = vld [vmem:[%s2802_s18 + $0x2c5] sm:$0x1]  ;;  %v769_v58 = vld [vmem:[%s2802_s18 + $0x2cd] sm:$0x1]  ;;  %v1159_v8 = vadd.f32 %v583_v46, %v487_v44  ;;  %v1440_v17 = vadd.f32 %v1152_v52, %v1056_v42  ;;  %v1441_v18 = vadd.f32 %v1153_v53, %v1057_v47 }
 0x102   : > { %2028 = vst.msk [vmem:[#allocation2 + $0x40] sm:$0xff] %vm2019_vm7, %v1964_v43  ;;  %v675_v63 = vld [vmem:[%s2802_s18 + $0x2dc] sm:$0x1]  ;;  %v676_v0 = vld [vmem:[%s2802_s18 + $0x2e4] sm:$0x1]  ;;  %v1442_v19 = vadd.f32 %v1154_v54, %v1058_v48  ;;  %v1248_v23 = vadd.f32 %v768_v57, %v672_v50  ;;  %v1443_v24 = vadd.f32 %v1155_v60, %v1059_v49  ;;  %v1444_v25 = vadd.f32 %v1156_v61, %v1060_v51 }
 0x103   : > { %v677_v1 = vld [vmem:[%s2802_s18 + $0x2ec] sm:$0x1]  ;;  %v770_v2 = vld [vmem:[%s2802_s18 + $0x2d5] sm:$0x1]  ;;  %v771_v3 = vld [vmem:[%s2802_s18 + $0x2dd] sm:$0x1]  ;;  %v1445_v26 = vadd.f32 %v1157_v62, %v1061_v59  ;;  %v1249_v30 = vadd.f32 %v769_v58, %v673_v55  ;;  %v1446_v32 = vadd.f32 %v1158_v7, %v1062_v5  ;;  %v1447_v33 = vadd.f32 %v1159_v8, %v1063_v6 }
 0x104   : > { %v772_v4 = vld [vmem:[%s2802_s18 + $0x2e5] sm:$0x1]  ;;  %v678_v9 = vld [vmem:[%s2802_s18 + $0x2f4] sm:$0x1]  ;;  %v679_v10 = vld [vmem:[%s2802_s18 + $0x2fc] sm:$0x1]  ;;  %v1250_v31 = vadd.f32 %v770_v2, %v674_v56  ;;  %v1251_v37 = vadd.f32 %v771_v3, %v675_v63 }
 0x105   : > { %v773_v11 = vld [vmem:[%s2802_s18 + $0x2ed] sm:$0x1]  ;;  %v774_v12 = vld [vmem:[%s2802_s18 + $0x2f5] sm:$0x1]  ;;  %v775_v13 = vld [vmem:[%s2802_s18 + $0x2fd] sm:$0x1]  ;;  %v1252_v38 = vadd.f32 %v772_v4, %v676_v0 }
 0x106   : > { %v864_v14 = vld [vmem:[%s2802_s18 + $0x2c6] sm:$0x1]  ;;  %v865_v15 = vld [vmem:[%s2802_s18 + $0x2ce] sm:$0x1]  ;;  %v866_v16 = vld [vmem:[%s2802_s18 + $0x2d6] sm:$0x1]  ;;  %v1253_v39 = vadd.f32 %v773_v11, %v677_v1  ;;  %v1254_v44 = vadd.f32 %v774_v12, %v678_v9  ;;  %v1255_v45 = vadd.f32 %v775_v13, %v679_v10 }
 0x107   : > { %v867_v20 = vld [vmem:[%s2802_s18 + $0x2de] sm:$0x1]  ;;  %v868_v21 = vld [vmem:[%s2802_s18 + $0x2e6] sm:$0x1]  ;;  %v869_v22 = vld [vmem:[%s2802_s18 + $0x2ee] sm:$0x1] }
 0x108   : > { %v870_v27 = vld [vmem:[%s2802_s18 + $0x2f6] sm:$0x1]  ;;  %v871_v28 = vld [vmem:[%s2802_s18 + $0x2fe] sm:$0x1]  ;;  %v960_v29 = vld [vmem:[%s2802_s18 + $0x2c7] sm:$0x1] }
 0x109   : > { %v2040_v34 = vld [vmem:[#allocation2 + $0x40] sm:$0xff]  ;;  %v961_v35 = vld [vmem:[%s2802_s18 + $0x2cf] sm:$0x1]  ;;  %v962_v36 = vld [vmem:[%s2802_s18 + $0x2d7] sm:$0x1]  ;;  %v1344_v40 = vadd.f32 %v960_v29, %v864_v14 }
 0x10a   : > { %2458 = vmatmul.msk.f32.gmra.mxu2 %vm2019_vm7, %v2040_v34  ;;  %v963_v41 = vld [vmem:[%s2802_s18 + $0x2df] sm:$0x1]  ;;  %v964_v42 = vld [vmem:[%s2802_s18 + $0x2e7] sm:$0x1]  ;;  %v965_v43 = vld [vmem:[%s2802_s18 + $0x2ef] sm:$0x1]  ;;  %v1345_v46 = vadd.f32 %v961_v35, %v865_v15  ;;  %v1346_v47 = vadd.f32 %v962_v36, %v866_v16 }
 0x10b   : > { %v966_v48 = vld [vmem:[%s2802_s18 + $0x2f7] sm:$0x1]  ;;  %v967_v49 = vld [vmem:[%s2802_s18 + $0x2ff] sm:$0x1]  ;;  %v1347_v50 = vadd.f32 %v963_v41, %v867_v20  ;;  %v1348_v51 = vadd.f32 %v964_v42, %v868_v21  ;;  %v1349_v52 = vadd.f32 %v965_v43, %v869_v22  ;;  %v1536_v53 = vadd.f32 %v1344_v40, %v1248_v23  ;;  %v216_v21 = vld [vmem:[%s2802_s18 + $0x80] sm:$0x1] }
 0x10c   : > { %v1350_v54 = vadd.f32 %v966_v48, %v870_v27  ;;  %v1351_v55 = vadd.f32 %v967_v49, %v871_v28  ;;  %v1537_v56 = vadd.f32 %v1345_v46, %v1249_v30  ;;  %v1538_v57 = vadd.f32 %v1346_v47, %v1250_v31  ;;  %v312_v22 = vld [vmem:[%s2802_s18 + $0x81] sm:$0x1]  ;;  %v219_v27 = vld [vmem:[%s2802_s18 + $0x98] sm:$0x1]  ;;  %v313_v28 = vld [vmem:[%s2802_s18 + $0x89] sm:$0x1] }
 0x10d   : > { %v1539_v58 = vadd.f32 %v1347_v50, %v1251_v37  ;;  %v1540_v59 = vadd.f32 %v1348_v51, %v1252_v38  ;;  %v1541_v60 = vadd.f32 %v1349_v52, %v1253_v39  ;;  %v1632_v61 = vadd.f32 %v1536_v53, %v1440_v17  ;;  %v314_v29 = vld [vmem:[%s2802_s18 + $0x91] sm:$0x1]  ;;  %v315_v30 = vld [vmem:[%s2802_s18 + $0x99] sm:$0x1]  ;;  %v316_v34 = vld [vmem:[%s2802_s18 + $0xa1] sm:$0x1] }
 0x10e   : > { %v1542_v62 = vadd.f32 %v1350_v54, %v1254_v44  ;;  %v1543_v63 = vadd.f32 %v1351_v55, %v1255_v45  ;;  %v1633_v0 = vadd.f32 %v1537_v56, %v1441_v18  ;;  %v1634_v1 = vadd.f32 %v1538_v57, %v1442_v19  ;;  %v408_v35 = vld [vmem:[%s2802_s18 + $0x82] sm:$0x1]  ;;  %v409_v36 = vld [vmem:[%s2802_s18 + $0x8a] sm:$0x1]  ;;  %v410_v37 = vld [vmem:[%s2802_s18 + $0x92] sm:$0x1] }
 0x10f   : > { %v1635_v2 = vadd.f32 %v1539_v58, %v1443_v24  ;;  %v1636_v3 = vadd.f32 %v1540_v59, %v1444_v25  ;;  %v1637_v4 = vadd.f32 %v1541_v60, %v1445_v26  ;;  %v1728_v5 = vmul.f32 0.125, %v1632_v61  ;;  %v217_v25 = vld [vmem:[%s2802_s18 + $0x88] sm:$0x1]  ;;  %v218_v26 = vld [vmem:[%s2802_s18 + $0x90] sm:$0x1] }
 0x110   : > { %v1638_v6 = vadd.f32 %v1542_v62, %v1446_v32  ;;  %v1639_v7 = vadd.f32 %v1543_v63, %v1447_v33  ;;  %v1729_v8 = vmul.f32 0.125, %v1633_v0  ;;  %v1730_v9 = vmul.f32 0.125, %v1634_v1  ;;  %v220_v33 = vld [vmem:[%s2802_s18 + $0xa0] sm:$0x1]  ;;  %v221_v39 = vld [vmem:[%s2802_s18 + $0xa8] sm:$0x1] }
 0x111   : > { %v1731_v10 = vmul.f32 0.125, %v1635_v2  ;;  %v1732_v11 = vmul.f32 0.125, %v1636_v3  ;;  %v1733_v12 = vmul.f32 0.125, %v1637_v4  ;;  %v317_v40 = vld [vmem:[%s2802_s18 + $0xa9] sm:$0x1]  ;;  %v984_v57 = vadd.f32 %v312_v22, %v216_v21 }
 0x112   : > { %v1734_v13 = vmul.f32 0.125, %v1638_v6  ;;  %v1735_v14 = vmul.f32 0.125, %v1639_v7  ;;  %v1993_v15 = vrot.slane %v1729_v8, 7  ;;  %v1995_v16 = vrot.slane %v1730_v9, 6  ;;  %v411_v41 = vld [vmem:[%s2802_s18 + $0x9a] sm:$0x1] }
 0x113   : > { %v1997_v17 = vrot.slane %v1731_v10, 5  ;;  %v1999_v18 = vrot.slane %v1732_v11, 4  ;;  %v2001_v20 = vrot.slane %v1733_v12, 3  ;;  %v412_v42 = vld [vmem:[%s2802_s18 + $0xa2] sm:$0x1]  ;;  %v985_v62 = vadd.f32 %v313_v28, %v217_v25 }
 0x114   : > { %v1994_v19 = vsel %vm1833_vm0, %v1993_v15, %v1728_v5  ;;  %v2003_v24 = vrot.slane %v1734_v13, 2  ;;  %v2005_v32 = vrot.slane %v1735_v14, 1  ;;  %v413_v43 = vld [vmem:[%s2802_s18 + $0xaa] sm:$0x1]  ;;  %v222_v45 = vld [vmem:[%s2802_s18 + $0xb0] sm:$0x1]  ;;  %v986_v63 = vadd.f32 %v314_v29, %v218_v26 }
 0x115   : > { %v1996_v23 = vsel %vm1836_vm1, %v1995_v16, %v1994_v19  ;;  %v223_v46 = vld [vmem:[%s2802_s18 + $0xb8] sm:$0x1]  ;;  %v318_v47 = vld [vmem:[%s2802_s18 + $0xb1] sm:$0x1]  ;;  %v319_v48 = vld [vmem:[%s2802_s18 + $0xb9] sm:$0x1]  ;;  %v987_v0 = vadd.f32 %v315_v30, %v219_v27  ;;  %v988_v2 = vadd.f32 %v316_v34, %v220_v33  ;;  %v989_v10 = vadd.f32 %v317_v40, %v221_v39 }
 0x116   : > { %v1998_v31 = vsel %vm1839_vm2, %v1997_v17, %v1996_v23  ;;  %v414_v49 = vld [vmem:[%s2802_s18 + $0xb2] sm:$0x1]  ;;  %v504_v50 = vld [vmem:[%s2802_s18 + $0x83] sm:$0x1]  ;;  %v505_v51 = vld [vmem:[%s2802_s18 + $0x8b] sm:$0x1]  ;;  %v991_v21 = vadd.f32 %v319_v48, %v223_v46 }
 0x117   : > { %v2000_v38 = vsel %vm1842_vm3, %v1999_v18, %v1998_v31  ;;  %v506_v52 = vld [vmem:[%s2802_s18 + $0x93] sm:$0x1]  ;;  %v507_v54 = vld [vmem:[%s2802_s18 + $0x9b] sm:$0x1]  ;;  %v508_v55 = vld [vmem:[%s2802_s18 + $0xa3] sm:$0x1]  ;;  %v1080_v3 = vadd.f32 %v504_v50, %v408_v35  ;;  %v1081_v4 = vadd.f32 %v505_v51, %v409_v36 }
 0x118   : > { %v2002_v44 = vsel %vm1845_vm4, %v2001_v20, %v2000_v38  ;;  %v509_v56 = vld [vmem:[%s2802_s18 + $0xab] sm:$0x1]  ;;  %v415_v59 = vld [vmem:[%s2802_s18 + $0xba] sm:$0x1]  ;;  %v510_v60 = vld [vmem:[%s2802_s18 + $0xb3] sm:$0x1]  ;;  %v1082_v5 = vadd.f32 %v506_v52, %v410_v37  ;;  %v1083_v11 = vadd.f32 %v507_v54, %v411_v41  ;;  %v1084_v12 = vadd.f32 %v508_v55, %v412_v42 }
 0x119   : > { %v2004_v53 = vsel %vm1848_vm5, %v2003_v24, %v2002_v44  ;;  %v511_v61 = vld [vmem:[%s2802_s18 + $0xbb] sm:$0x1]  ;;  %v600_v1 = vld [vmem:[%s2802_s18 + $0x84] sm:$0x1]  ;;  %v601_v6 = vld [vmem:[%s2802_s18 + $0x8c] sm:$0x1]  ;;  %v1085_v13 = vadd.f32 %v509_v56, %v413_v43  ;;  %v990_v20 = vadd.f32 %v318_v47, %v222_v45  ;;  %v1086_v22 = vadd.f32 %v510_v60, %v414_v49 }
 0x11a   : > { %v2006_v58 = vsel %vm1851_vm6, %v2005_v32, %v2004_v53  ;;  %v602_v7 = vld [vmem:[%s2802_s18 + $0x94] sm:$0x1]  ;;  %v696_v8 = vld [vmem:[%s2802_s18 + $0x85] sm:$0x1]  ;;  %v697_v9 = vld [vmem:[%s2802_s18 + $0x8d] sm:$0x1]  ;;  %v1087_v23 = vadd.f32 %v511_v61, %v415_v59  ;;  %v1368_v32 = vadd.f32 %v1080_v3, %v984_v57  ;;  %v1369_v33 = vadd.f32 %v1081_v4, %v985_v62 }
 0x11b   : > { %2031 = vst.msk [vmem:[#allocation2 + $0x58] sm:$0xff] %vm2019_vm7, %v2006_v58  ;;  %v603_v14 = vld [vmem:[%s2802_s18 + $0x9c] sm:$0x1]  ;;  %v604_v15 = vld [vmem:[%s2802_s18 + $0xa4] sm:$0x1]  ;;  %v1370_v34 = vadd.f32 %v1082_v5, %v986_v63  ;;  %v1176_v38 = vadd.f32 %v696_v8, %v600_v1  ;;  %v1371_v39 = vadd.f32 %v1083_v11, %v987_v0  ;;  %v1372_v40 = vadd.f32 %v1084_v12, %v988_v2 }
 0x11c   : > { %v605_v16 = vld [vmem:[%s2802_s18 + $0xac] sm:$0x1]  ;;  %v698_v17 = vld [vmem:[%s2802_s18 + $0x95] sm:$0x1]  ;;  %v699_v18 = vld [vmem:[%s2802_s18 + $0x9d] sm:$0x1]  ;;  %v1373_v41 = vadd.f32 %v1085_v13, %v989_v10  ;;  %v1177_v45 = vadd.f32 %v697_v9, %v601_v6  ;;  %v1374_v47 = vadd.f32 %v1086_v22, %v990_v20  ;;  %v1375_v48 = vadd.f32 %v1087_v23, %v991_v21 }
 0x11d   : > { %v700_v19 = vld [vmem:[%s2802_s18 + $0xa5] sm:$0x1]  ;;  %v606_v24 = vld [vmem:[%s2802_s18 + $0xb4] sm:$0x1]  ;;  %v607_v25 = vld [vmem:[%s2802_s18 + $0xbc] sm:$0x1]  ;;  %v1178_v46 = vadd.f32 %v698_v17, %v602_v7  ;;  %v1179_v52 = vadd.f32 %v699_v18, %v603_v14 }
 0x11e   : > { %v701_v26 = vld [vmem:[%s2802_s18 + $0xad] sm:$0x1]  ;;  %v702_v27 = vld [vmem:[%s2802_s18 + $0xb5] sm:$0x1]  ;;  %v703_v28 = vld [vmem:[%s2802_s18 + $0xbd] sm:$0x1]  ;;  %v1180_v53 = vadd.f32 %v700_v19, %v604_v15 }
 0x11f   : > { %v792_v29 = vld [vmem:[%s2802_s18 + $0x86] sm:$0x1]  ;;  %v793_v30 = vld [vmem:[%s2802_s18 + $0x8e] sm:$0x1]  ;;  %v794_v31 = vld [vmem:[%s2802_s18 + $0x96] sm:$0x1]  ;;  %v1181_v54 = vadd.f32 %v701_v26, %v605_v16  ;;  %v1182_v59 = vadd.f32 %v702_v27, %v606_v24  ;;  %v1183_v60 = vadd.f32 %v703_v28, %v607_v25 }
 0x120   : > { %v795_v35 = vld [vmem:[%s2802_s18 + $0x9e] sm:$0x1]  ;;  %v796_v36 = vld [vmem:[%s2802_s18 + $0xa6] sm:$0x1]  ;;  %v797_v37 = vld [vmem:[%s2802_s18 + $0xae] sm:$0x1] }
 0x121   : > { %v798_v42 = vld [vmem:[%s2802_s18 + $0xb6] sm:$0x1]  ;;  %v799_v43 = vld [vmem:[%s2802_s18 + $0xbe] sm:$0x1]  ;;  %v888_v44 = vld [vmem:[%s2802_s18 + $0x87] sm:$0x1] }
 0x122   : > { %v2043_v49 = vld [vmem:[#allocation2 + $0x58] sm:$0xff]  ;;  %v889_v50 = vld [vmem:[%s2802_s18 + $0x8f] sm:$0x1]  ;;  %v890_v51 = vld [vmem:[%s2802_s18 + $0x97] sm:$0x1]  ;;  %v1272_v55 = vadd.f32 %v888_v44, %v792_v29 }
 0x123   : > { %2461 = vmatmul.msk.f32.gmra.mxu3 %vm2019_vm7, %v2043_v49  ;;  %v891_v56 = vld [vmem:[%s2802_s18 + $0x9f] sm:$0x1]  ;;  %v892_v57 = vld [vmem:[%s2802_s18 + $0xa7] sm:$0x1]  ;;  %v893_v58 = vld [vmem:[%s2802_s18 + $0xaf] sm:$0x1]  ;;  %v1273_v61 = vadd.f32 %v889_v50, %v793_v30  ;;  %v1274_v62 = vadd.f32 %v890_v51, %v794_v31 }
 0x124   : > { %v894_v63 = vld [vmem:[%s2802_s18 + $0xb7] sm:$0x1]  ;;  %v895_v0 = vld [vmem:[%s2802_s18 + $0xbf] sm:$0x1]  ;;  %v1275_v1 = vadd.f32 %v891_v56, %v795_v35  ;;  %v1276_v2 = vadd.f32 %v892_v57, %v796_v36  ;;  %v1277_v3 = vadd.f32 %v893_v58, %v797_v37  ;;  %v1464_v4 = vadd.f32 %v1272_v55, %v1176_v38  ;;  %v240_v36 = vld [vmem:[%s2802_s18 + $0x140] sm:$0x1] }
 0x125   : > { %v1278_v5 = vadd.f32 %v894_v63, %v798_v42  ;;  %v1279_v6 = vadd.f32 %v895_v0, %v799_v43  ;;  %v1465_v7 = vadd.f32 %v1273_v61, %v1177_v45  ;;  %v1466_v8 = vadd.f32 %v1274_v62, %v1178_v46  ;;  %v241_v37 = vld [vmem:[%s2802_s18 + $0x148] sm:$0x1]  ;;  %v242_v38 = vld [vmem:[%s2802_s18 + $0x150] sm:$0x1]  ;;  %v243_v45 = vld [vmem:[%s2802_s18 + $0x158] sm:$0x1] }
 0x126   : > { %v1467_v9 = vadd.f32 %v1275_v1, %v1179_v52  ;;  %v1468_v10 = vadd.f32 %v1276_v2, %v1180_v53  ;;  %v1469_v11 = vadd.f32 %v1277_v3, %v1181_v54  ;;  %v1560_v12 = vadd.f32 %v1464_v4, %v1368_v32  ;;  %v244_v46 = vld [vmem:[%s2802_s18 + $0x160] sm:$0x1]  ;;  %v340_v49 = vld [vmem:[%s2802_s18 + $0x161] sm:$0x1]  ;;  %v341_v50 = vld [vmem:[%s2802_s18 + $0x169] sm:$0x1] }
 0x127   : > { %v1470_v13 = vadd.f32 %v1278_v5, %v1182_v59  ;;  %v1471_v14 = vadd.f32 %v1279_v6, %v1183_v60  ;;  %v1561_v15 = vadd.f32 %v1465_v7, %v1369_v33  ;;  %v1562_v16 = vadd.f32 %v1466_v8, %v1370_v34  ;;  %v432_v52 = vld [vmem:[%s2802_s18 + $0x142] sm:$0x1]  ;;  %v433_v53 = vld [vmem:[%s2802_s18 + $0x14a] sm:$0x1]  ;;  %v434_v54 = vld [vmem:[%s2802_s18 + $0x152] sm:$0x1] }
 0x128   : > { %v1563_v17 = vadd.f32 %v1467_v9, %v1371_v39  ;;  %v1564_v18 = vadd.f32 %v1468_v10, %v1372_v40  ;;  %v1565_v19 = vadd.f32 %v1469_v11, %v1373_v41  ;;  %v1656_v20 = vmul.f32 0.125, %v1560_v12  ;;  %v336_v39 = vld [vmem:[%s2802_s18 + $0x141] sm:$0x1]  ;;  %v337_v40 = vld [vmem:[%s2802_s18 + $0x149] sm:$0x1] }
 0x129   : > { %v1566_v21 = vadd.f32 %v1470_v13, %v1374_v47  ;;  %v1567_v22 = vadd.f32 %v1471_v14, %v1375_v48  ;;  %v1657_v23 = vmul.f32 0.125, %v1561_v15  ;;  %v1658_v24 = vmul.f32 0.125, %v1562_v16  ;;  %v338_v41 = vld [vmem:[%s2802_s18 + $0x151] sm:$0x1]  ;;  %v245_v47 = vld [vmem:[%s2802_s18 + $0x168] sm:$0x1] }
 0x12a   : > { %v1659_v25 = vmul.f32 0.125, %v1563_v17  ;;  %v1660_v26 = vmul.f32 0.125, %v1564_v18  ;;  %v1661_v27 = vmul.f32 0.125, %v1565_v19  ;;  %v339_v48 = vld [vmem:[%s2802_s18 + $0x159] sm:$0x1]  ;;  %v1008_v8 = vadd.f32 %v336_v39, %v240_v36 }
 0x12b   : > { %v1662_v28 = vmul.f32 0.125, %v1566_v21  ;;  %v1663_v29 = vmul.f32 0.125, %v1567_v22  ;;  %v1867_v30 = vrot.slane %v1657_v23, 7  ;;  %v1869_v31 = vrot.slane %v1658_v24, 6  ;;  %v435_v55 = vld [vmem:[%s2802_s18 + $0x15a] sm:$0x1] }
 0x12c   : > { %v1871_v32 = vrot.slane %v1659_v25, 5  ;;  %v1873_v33 = vrot.slane %v1660_v26, 4  ;;  %v1875_v35 = vrot.slane %v1661_v27, 3  ;;  %v246_v57 = vld [vmem:[%s2802_s18 + $0x170] sm:$0x1]  ;;  %v1009_v9 = vadd.f32 %v337_v40, %v241_v37 }
 0x12d   : > { %v1868_v34 = vsel %vm1833_vm0, %v1867_v30, %v1656_v20  ;;  %v1877_v43 = vrot.slane %v1662_v28, 2  ;;  %v1879_v44 = vrot.slane %v1663_v29, 1  ;;  %v342_v58 = vld [vmem:[%s2802_s18 + $0x171] sm:$0x1]  ;;  %v436_v59 = vld [vmem:[%s2802_s18 + $0x162] sm:$0x1]  ;;  %v1010_v10 = vadd.f32 %v338_v41, %v242_v38 }
 0x12e   : > { %v1870_v42 = vsel %vm1836_vm1, %v1869_v31, %v1868_v34  ;;  %v437_v60 = vld [vmem:[%s2802_s18 + $0x16a] sm:$0x1]  ;;  %v438_v61 = vld [vmem:[%s2802_s18 + $0x172] sm:$0x1]  ;;  %v528_v62 = vld [vmem:[%s2802_s18 + $0x143] sm:$0x1]  ;;  %v1011_v15 = vadd.f32 %v339_v48, %v243_v45  ;;  %v1012_v16 = vadd.f32 %v340_v49, %v244_v46  ;;  %v1013_v17 = vadd.f32 %v341_v50, %v245_v47 }
 0x12f   : > { %v1872_v51 = vsel %vm1839_vm2, %v1871_v32, %v1870_v42  ;;  %v247_v0 = vld [vmem:[%s2802_s18 + $0x178] sm:$0x1]  ;;  %v529_v1 = vld [vmem:[%s2802_s18 + $0x14b] sm:$0x1]  ;;  %v530_v2 = vld [vmem:[%s2802_s18 + $0x153] sm:$0x1]  ;;  %v1104_v19 = vadd.f32 %v528_v62, %v432_v52  ;;  %v1014_v28 = vadd.f32 %v342_v58, %v246_v57 }
 0x130   : > { %v1874_v56 = vsel %vm1842_vm3, %v1873_v33, %v1872_v51  ;;  %v531_v3 = vld [vmem:[%s2802_s18 + $0x15b] sm:$0x1]  ;;  %v532_v5 = vld [vmem:[%s2802_s18 + $0x163] sm:$0x1]  ;;  %v533_v6 = vld [vmem:[%s2802_s18 + $0x16b] sm:$0x1]  ;;  %v1105_v20 = vadd.f32 %v529_v1, %v433_v53  ;;  %v1106_v21 = vadd.f32 %v530_v2, %v434_v54  ;;  %v2106_v1 = vpop.f32.mrf.mxu0 }
 0x131   : > { %v1876_v63 = vsel %vm1845_vm4, %v1875_v35, %v1874_v56  ;;  %v534_v7 = vld [vmem:[%s2802_s18 + $0x173] sm:$0x1]  ;;  %v343_v12 = vld [vmem:[%s2802_s18 + $0x179] sm:$0x1]  ;;  %v439_v13 = vld [vmem:[%s2802_s18 + $0x17a] sm:$0x1]  ;;  %v1107_v22 = vadd.f32 %v531_v3, %v435_v55  ;;  %v1108_v29 = vadd.f32 %v532_v5, %v436_v59  ;;  %v1109_v30 = vadd.f32 %v533_v6, %v437_v60 }
 0x132   : > { %v1878_v4 = vsel %vm1848_vm5, %v1877_v43, %v1876_v63  ;;  %v535_v14 = vld [vmem:[%s2802_s18 + $0x17b] sm:$0x1]  ;;  %v624_v18 = vld [vmem:[%s2802_s18 + $0x144] sm:$0x1]  ;;  %v625_v23 = vld [vmem:[%s2802_s18 + $0x14c] sm:$0x1]  ;;  %v1110_v31 = vadd.f32 %v534_v7, %v438_v61  ;;  %v1015_v37 = vadd.f32 %v343_v12, %v247_v0  ;;  %v1392_v47 = vadd.f32 %v1104_v19, %v1008_v8  ;;  %v2115_v8 = vpop.f32.mrf.mxu1 }
 0x133   : > { %v1880_v11 = vsel %vm1851_vm6, %v1879_v44, %v1878_v4  ;;  %v626_v24 = vld [vmem:[%s2802_s18 + $0x154] sm:$0x1]  ;;  %v627_v25 = vld [vmem:[%s2802_s18 + $0x15c] sm:$0x1]  ;;  %v720_v26 = vld [vmem:[%s2802_s18 + $0x145] sm:$0x1]  ;;  %v1111_v38 = vadd.f32 %v535_v14, %v439_v13  ;;  %v1393_v48 = vadd.f32 %v1105_v20, %v1009_v9  ;;  %v1394_v49 = vadd.f32 %v1106_v21, %v1010_v10 }
 0x134   : > { %2022 = vst.msk [vmem:[#allocation2 + $0x10] sm:$0xff] %vm2019_vm7, %v1880_v11  ;;  %v721_v27 = vld [vmem:[%s2802_s18 + $0x14d] sm:$0x1]  ;;  %v628_v32 = vld [vmem:[%s2802_s18 + $0x164] sm:$0x1]  ;;  %v1395_v50 = vadd.f32 %v1107_v22, %v1011_v15  ;;  %v1200_v54 = vadd.f32 %v720_v26, %v624_v18  ;;  %v1396_v55 = vadd.f32 %v1108_v29, %v1012_v16  ;;  %v1397_v56 = vadd.f32 %v1109_v30, %v1013_v17  ;;  %v2124_v16 = vpop.f32.mrf.mxu2 }
 0x135   : > { %v629_v33 = vld [vmem:[%s2802_s18 + $0x16c] sm:$0x1]  ;;  %v722_v34 = vld [vmem:[%s2802_s18 + $0x155] sm:$0x1]  ;;  %v723_v35 = vld [vmem:[%s2802_s18 + $0x15d] sm:$0x1]  ;;  %v1398_v57 = vadd.f32 %v1110_v31, %v1014_v28  ;;  %v1201_v61 = vadd.f32 %v721_v27, %v625_v23  ;;  %v1399_v0 = vadd.f32 %v1111_v38, %v1015_v37  ;;  %v2133_v23 = vpop.f32.mrf.mxu3 }
 0x136   : > { %v724_v36 = vld [vmem:[%s2802_s18 + $0x165] sm:$0x1]  ;;  %v630_v39 = vld [vmem:[%s2802_s18 + $0x174] sm:$0x1]  ;;  %v631_v40 = vld [vmem:[%s2802_s18 + $0x17c] sm:$0x1]  ;;  %v1202_v62 = vadd.f32 %v722_v34, %v626_v24  ;;  %v1203_v63 = vadd.f32 %v723_v35, %v627_v25 }
 0x137   : > { %v725_v41 = vld [vmem:[%s2802_s18 + $0x16d] sm:$0x1]  ;;  %v726_v42 = vld [vmem:[%s2802_s18 + $0x175] sm:$0x1]  ;;  %v727_v43 = vld [vmem:[%s2802_s18 + $0x17d] sm:$0x1]  ;;  %v1204_v5 = vadd.f32 %v724_v36, %v628_v32 }
 0x138   : > { %v816_v44 = vld [vmem:[%s2802_s18 + $0x146] sm:$0x1]  ;;  %v817_v45 = vld [vmem:[%s2802_s18 + $0x14e] sm:$0x1]  ;;  %v818_v46 = vld [vmem:[%s2802_s18 + $0x156] sm:$0x1]  ;;  %v1205_v6 = vadd.f32 %v725_v41, %v629_v33  ;;  %v1206_v12 = vadd.f32 %v726_v42, %v630_v39  ;;  %v1207_v13 = vadd.f32 %v727_v43, %v631_v40 }
 0x139   : > { %v819_v51 = vld [vmem:[%s2802_s18 + $0x15e] sm:$0x1]  ;;  %v820_v52 = vld [vmem:[%s2802_s18 + $0x166] sm:$0x1]  ;;  %v821_v53 = vld [vmem:[%s2802_s18 + $0x16e] sm:$0x1] }
 0x13a   : > { %v822_v58 = vld [vmem:[%s2802_s18 + $0x176] sm:$0x1]  ;;  %v823_v59 = vld [vmem:[%s2802_s18 + $0x17e] sm:$0x1]  ;;  %v912_v60 = vld [vmem:[%s2802_s18 + $0x147] sm:$0x1] }
 0x13b   : > { %v2034_v2 = vld [vmem:[#allocation2 + $0x10] sm:$0xff]  ;;  %v913_v3 = vld [vmem:[%s2802_s18 + $0x14f] sm:$0x1]  ;;  %v1296_v7 = vadd.f32 %v912_v60, %v816_v44  ;;  %v915_v9 = vld [vmem:[%s2802_s18 + $0x15f] sm:$0x1]  ;;  %2143 = vst.msk [vmem:[%s3678_s23] sm:$0xff] %vm2142_vm8, %v2106_v1 }
 0x13c   : > { %v914_v4 = vld [vmem:[%s2802_s18 + $0x157] sm:$0x1]  ;;  %2452 = vmatmul.msk.f32.gmra.mxu0 %vm2019_vm7, %v2034_v2  ;;  %v916_v10 = vld [vmem:[%s2802_s18 + $0x167] sm:$0x1]  ;;  %v917_v11 = vld [vmem:[%s2802_s18 + $0x16f] sm:$0x1]  ;;  %v1297_v14 = vadd.f32 %v913_v3, %v817_v45  ;;  %v1299_v19 = vadd.f32 %v915_v9, %v819_v51 }
 0x13d   : > { %v1298_v15 = vadd.f32 %v914_v4, %v818_v46  ;;  %v918_v17 = vld [vmem:[%s2802_s18 + $0x177] sm:$0x1]  ;;  %v919_v18 = vld [vmem:[%s2802_s18 + $0x17f] sm:$0x1]  ;;  %v1300_v20 = vadd.f32 %v916_v10, %v820_v52  ;;  %v1301_v21 = vadd.f32 %v917_v11, %v821_v53  ;;  %v1488_v22 = vadd.f32 %v1296_v7, %v1200_v54  ;;  %2146 = vst.msk [vmem:[%s3678_s23 + $0x18] sm:$0xff] %vm2142_vm8, %v2115_v8 }
 0x13e   : > { %v1302_v24 = vadd.f32 %v918_v17, %v822_v58  ;;  %v1303_v25 = vadd.f32 %v919_v18, %v823_v59  ;;  %v1489_v26 = vadd.f32 %v1297_v14, %v1201_v61  ;;  %v1491_v28 = vadd.f32 %v1299_v19, %v1203_v63  ;;  %2149 = vst.msk [vmem:[%s3678_s23 + $0x30] sm:$0xff] %vm2142_vm8, %v2124_v16  ;;  %v2127_v63 = vpop.f32.mrf.mxu2 }
 0x13f   : > { %v1490_v27 = vadd.f32 %v1298_v15, %v1202_v62  ;;  %v1492_v29 = vadd.f32 %v1300_v20, %v1204_v5  ;;  %v1493_v30 = vadd.f32 %v1301_v21, %v1205_v6  ;;  %v1584_v31 = vadd.f32 %v1488_v22, %v1392_v47  ;;  %2152 = vst.msk [vmem:[%s3678_s23 + $0x48] sm:$0xff] %vm2142_vm8, %v2133_v23 }
 0x140   : > { %v1494_v32 = vadd.f32 %v1302_v24, %v1206_v12  ;;  %v1495_v33 = vadd.f32 %v1303_v25, %v1207_v13  ;;  %v1585_v34 = vadd.f32 %v1489_v26, %v1393_v48  ;;  %v1587_v36 = vadd.f32 %v1491_v28, %v1395_v50  ;;  %2150 = vst.msk [vmem:[%s3678_s23 + $0x38] sm:$0xff] %vm2142_vm8, %v2127_v63 }
 0x141   : > { %v1586_v35 = vadd.f32 %v1490_v27, %v1394_v49  ;;  %v1588_v37 = vadd.f32 %v1492_v29, %v1396_v55  ;;  %v1589_v38 = vadd.f32 %v1493_v30, %v1397_v56  ;;  %v1680_v39 = vmul.f32 0.125, %v1584_v31 }
 0x142   : > { %v1590_v40 = vadd.f32 %v1494_v32, %v1398_v57  ;;  %v1591_v41 = vadd.f32 %v1495_v33, %v1399_v0  ;;  %v1681_v42 = vmul.f32 0.125, %v1585_v34  ;;  %v1683_v44 = vmul.f32 0.125, %v1587_v36  ;;  %v2136_v0 = vpop.f32.mrf.mxu3 }
 0x143   : > { %v1682_v43 = vmul.f32 0.125, %v1586_v35  ;;  %v1684_v45 = vmul.f32 0.125, %v1588_v37  ;;  %v1685_v46 = vmul.f32 0.125, %v1589_v38  ;;  %2153 = vst.msk [vmem:[%s3678_s23 + $0x50] sm:$0xff] %vm2142_vm8, %v2136_v0 }
 0x144   : > { %v1686_v47 = vmul.f32 0.125, %v1590_v40  ;;  %v1687_v51 = vmul.f32 0.125, %v1591_v41  ;;  %v1909_v52 = vrot.slane %v1681_v42, 7  ;;  %v1913_v48 = vrot.slane %v1683_v44, 5 }
 0x145   : > { %v1911_v53 = vrot.slane %v1682_v43, 6  ;;  %v1915_v49 = vrot.slane %v1684_v45, 4  ;;  %v1917_v54 = vrot.slane %v1685_v46, 3 }
 0x146   : > { %v1910_v50 = vsel %vm1833_vm0, %v1909_v52, %v1680_v39  ;;  %v1919_v56 = vrot.slane %v1686_v47, 2  ;;  %v1921_v58 = vrot.slane %v1687_v51, 1 }
 0x147   : > { %v1912_v55 = vsel %vm1836_vm1, %v1911_v53, %v1910_v50 }
 0x148   : > { %v1914_v57 = vsel %vm1839_vm2, %v1913_v48, %v1912_v55 }
 0x149   : > { %v1916_v59 = vsel %vm1842_vm3, %v1915_v49, %v1914_v57 }
 0x14a   : > { %v1918_v60 = vsel %vm1845_vm4, %v1917_v54, %v1916_v59 }
 0x14b   : > { %v1920_v61 = vsel %vm1848_vm5, %v1919_v56, %v1918_v60 }
 0x14c   : > { %v1922_v62 = vsel %vm1851_vm6, %v1921_v58, %v1920_v61 }
 0x14d   : > { %2025 = vst.msk [vmem:[#allocation2 + $0x28] sm:$0xff] %vm2019_vm7, %v1922_v62 }
 0x154   : > { %v2037_v1 = vld [vmem:[#allocation2 + $0x28] sm:$0xff] }
 0x155   : > { %2455 = vmatmul.msk.f32.gmra.mxu1 %vm2019_vm7, %v2037_v1  ;;  %v2109_v2 = vpop.f32.mrf.mxu0 }
 0x156   : > { %2144 = vst.msk [vmem:[%s3678_s23 + $0x8] sm:$0xff] %vm2142_vm8, %v2109_v2 }
 0x16f   : > { %v2118_v3 = vpop.f32.mrf.mxu1 }
 0x170   : > { %2147 = vst.msk [vmem:[%s3678_s23 + $0x20] sm:$0xff] %vm2142_vm8, %v2118_v3 }
 0x18d   : > { %v2130_v4 = vpop.f32.mrf.mxu2 }
 0x18e   : > { %2151 = vst.msk [vmem:[%s3678_s23 + $0x40] sm:$0xff] %vm2142_vm8, %v2130_v4 }
 0x1a6   : > { %v2139_v5 = vpop.f32.mrf.mxu3 }
 0x1a7   : > { %2154 = vst.msk [vmem:[%s3678_s23 + $0x58] sm:$0xff] %vm2142_vm8, %v2139_v5 }
 0x1b9   : > { %v2112_v6 = vpop.f32.mrf.mxu0 }
 0x1ba   : > { %2145 = vst.msk [vmem:[%s3678_s23 + $0x10] sm:$0xff] %vm2142_vm8, %v2112_v6 }
 0x1cf   : > { %2161 = sbr.rel (!%p2762_p3) target bundleno = 527 (0x20f), region = 36 }
 0x1d2   : > { %v2121_v7 = vpop.f32.mrf.mxu1 }
 0x1d3   : > { %2148 = vst.msk [vmem:[%s3678_s23 + $0x28] sm:$0xff] %vm2142_vm8, %v2121_v7 }
 0x1d4   : > { %s3811_s29 = smov (!%p2164_p9, %s2163_s29), 12 }
 0x1d5   : > { %s2462_s30 = sshll.u32 %s3811_s29, 3 }
 0x1d6   : > { %p2465_p10 = scmp.eq.s32.totalorder %s2462_s30, 0 }
 0x1d7   : > { %2605 = sdivrem.u32 (!%p2465_p10), %s3811_s29, 12 }
 0x1d8   : > { %2173 = sbr.rel (%p2465_p10) target bundleno = 527 (0x20f), region = 40 }
 0x1e0   : > { %s3726_s17 = spop.drf %2605 }
 0x1e1   : > { %s2607_s3 = spop.drf %2605  ;;  %p2466_p11 = scmp.le.s32.totalorder %s3726_s17, 0 }
 0x1e2   : > { %s3799_s11 = smov (!%p2466_p11), %s3720_s28  ;;  %s3800_s24 = smov (!%p2466_p11), %s3678_s23 }
 0x1e3   : > { %2382 = sbr.rel (%p2466_p11) target bundleno = 501 (0x1f5), region = 119  ;;  %s3735_s4 = smov (!%p2466_p11), 0  }
 0x1e4   : > { %s3737_s5 = smov (!%p2466_p11), 0  }
 0x1e8 LB: >> { %v2260_v8 = vld [vmem:[%s2689_s24] sm:$0xff]  ;;  %v2262_v9 = vld [vmem:[%s2689_s24 + $0x8] sm:$0xff]  ;;  %v2264_v10 = vld [vmem:[%s2689_s24 + $0x10] sm:$0xff]  ;;  %s2284_s6 = sadd.s32 1, %s2693_s4  ;;  %s2254_s5 = sadd.s32 1, %s2697_s5   ;;  %s2697_s5 = sphi %s3737_s5, %s2254_s5   ;;  %s2693_s4 = sphi %s3735_s4, %s3803_s4   ;;  %s2689_s24 = sphi %s3800_s24, %s3802_s24   ;;  %s2685_s11 = sphi %s3799_s11, %s3801_s11  }
 0x1e9   : >> { %2261 = vst [vmem:[%s2685_s11] sm:$0xff] %v2260_v8  ;;  %v2266_v11 = vld [vmem:[%s2689_s24 + $0x18] sm:$0xff]  ;;  %p2285_p12 = scmp.ge.s32.totalorder %s2284_s6, %s3726_s17  ;;  %v2268_v12 = vld [vmem:[%s2689_s24 + $0x20] sm:$0xff]  ;;  %v2270_v13 = vld [vmem:[%s2689_s24 + $0x28] sm:$0xff]  ;;  %p2253_p13 = scmp.ge.s32.totalorder %s2254_s5, %s3726_s17 }
 0x1ea   : >> { %2263 = vst [vmem:[%s2685_s11 + $0x8] sm:$0xff] %v2262_v9  ;;  %v2272_v14 = vld [vmem:[%s2689_s24 + $0x30] sm:$0xff]  ;;  %v2274_v15 = vld [vmem:[%s2689_s24 + $0x38] sm:$0xff]  ;;  %v2276_v16 = vld [vmem:[%s2689_s24 + $0x40] sm:$0xff] }
 0x1eb   : >> { %2265 = vst [vmem:[%s2685_s11 + $0x10] sm:$0xff] %v2264_v10  ;;  %s3813_s6 = smov (%p2285_p12, %s2284_s6), 0  ;;  %v2278_v17 = vld [vmem:[%s2689_s24 + $0x48] sm:$0xff]  ;;  %v2280_v18 = vld [vmem:[%s2689_s24 + $0x50] sm:$0xff]  ;;  %v2282_v19 = vld [vmem:[%s2689_s24 + $0x58] sm:$0xff] }
 0x1ec   : >> { %2267 = vst [vmem:[%s2685_s11 + $0x18] sm:$0xff] %v2266_v11  ;;  %s2287_s7 = smul.u32 96, %s3813_s6  ;;  %s3803_s4 = smov %s3813_s6 }
 0x1ed   : >> { %2269 = vst [vmem:[%s2685_s11 + $0x20] sm:$0xff] %v2268_v12 }
 0x1ee   : >> { %2271 = vst [vmem:[%s2685_s11 + $0x28] sm:$0xff] %v2270_v13  ;;  %s2289_s8 = scalar_lea.vmem %s3678_s23, %s2287_s7 [#allocation3]   ;;  %s2290_s14 = scalar_lea.vmem %s3720_s28, %s2287_s7  }
 0x1ef   : >> { %2273 = vst [vmem:[%s2685_s11 + $0x30] sm:$0xff] %v2272_v14  ;;  %s3802_s24 = smov %s2289_s8 }
 0x1f0   : >> { %2275 = vst [vmem:[%s2685_s11 + $0x38] sm:$0xff] %v2274_v15  ;;  %2256 = sbr.rel (!%p2253_p13) target bundleno = 488 (0x1e8), region = 125 }
 0x1f1   : >> { %2277 = vst [vmem:[%s2685_s11 + $0x40] sm:$0xff] %v2276_v16 }
 0x1f2   : >> { %2279 = vst [vmem:[%s2685_s11 + $0x48] sm:$0xff] %v2278_v17 }
 0x1f3   : >> { %2281 = vst [vmem:[%s2685_s11 + $0x50] sm:$0xff] %v2280_v18 }
 0x1f4   : >> { %2283 = vst [vmem:[%s2685_s11 + $0x58] sm:$0xff] %v2282_v19  ;;  %s3801_s11 = smov %s2290_s14 }
 0x1f5 PF: > { %2608 = sdivrem.u32 %s3811_s29, 12 }
 0x1f6   : > { %s2467_s16 = smul.u32 96, %s3726_s17 }
 0x1f8   : > { %s3775_s18 = scalar_lea.vmem %s3678_s23, %s2467_s16 [#allocation3]   ;;  %s2297_s20 = scalar_lea.vmem %s3720_s28, %s2467_s16  }
 0x1fe   : > { %s2609_s21 = spop.drf %2608 }
 0x1ff   : > { %s2610_s22 = spop.drf %2608 }
 0x200   : > { %p2469_p0 = scmp.le.s32.totalorder %s2610_s22, 0 }
 0x201   : > { %s2699_s9 = smov (!%p2469_p0), %s2297_s20   ;;  %s2703_s25 = smov (!%p2469_p0), %s3775_s18  }
 0x202   : > { %2396 = sbr.rel (%p2469_p0) target bundleno = 527 (0x20f), region = 130  ;;  %s2707_s26 = smov (!%p2469_p0), 0  }
 0x203   : > { %s2711_s27 = smov (!%p2469_p0), 0  }
 0x207 LB: >> { %v2307_v20 = vld [vmem:[%s2705_s25] sm:$0xff]  ;;  %s2309_s23 = sadd.s32 1, %s2709_s26  ;;  %s2301_s27 = sadd.s32 1, %s2713_s27   ;;  %s2713_s27 = sphi %s2711_s27, %s2301_s27   ;;  %s2709_s26 = sphi %s2707_s26, %s2708_s26   ;;  %s2705_s25 = sphi %s2703_s25, %s2314_s25   ;;  %s2701_s9 = sphi %s2699_s9, %s2315_s9  }
 0x208   : >> { %2308 = vst [vmem:[%s2701_s9] sm:$0xff] %v2307_v20  ;;  %p2310_p1 = scmp.ge.s32.totalorder %s2309_s23, %s2610_s22  ;;  %p2300_p2 = scmp.ge.s32.totalorder %s2301_s27, %s2610_s22 }
 0x20a   : >> { %s3815_s23 = smov (%p2310_p1, %s2309_s23), 0  ;;  %2303 = sbr.rel (!%p2300_p2) target bundleno = 519 (0x207), region = 136 }
 0x20b   : >> { %s2470_s28 = sshll.u32 %s3815_s23, 3  ;;  %s2708_s26 = smov %s3815_s23  }
 0x20c   : >> { %s2314_s25 = scalar_lea.vmem %s3775_s18, %s2470_s28 [#allocation3]   ;;  %s2315_s9 = scalar_lea.vmem %s2297_s20, %s2470_s28  }
 0x20f PF: > { %s12_s13 = sadd.s32 1, %s2681_s13   ;;  %s3804_s9 = smov %s2669_s10 }
 0x210   : > { %p9_p3 = scmp.ge.s32.totalorder %s12_s13, 4   ;;  %s3805_s10 = smov %s2771_s19 }
 0x211   : > { %s3806_s11 = smov %s2677_s12  ;;  %s3807_s12 = smov %s3809_s15 }
 0x212   :  { %11 = sbr.rel (!%p9_p3) target bundleno = 3 (0x3), region = 147 }

</bundles_post_ra>
